<compile_context>
chip_gen: v7x
topology: tpu7x:2x2x1
jax: 0.10.0
libtpu: 0.0.40
codegen_flags: <defaults>
</compile_context>

<pallas_src>
import functools
import math

import jax
import jax.numpy as jnp
from jax import lax
from jax.experimental import pallas as pl
from jax.experimental.pallas import tpu as pltpu


_COMPILER_PARAMS = pltpu.CompilerParams(
    dimension_semantics=("parallel",),
    vmem_limit_bytes=48 * 1024 * 1024,
)


# --------------------------------------------------------------------------
# Tiling helpers
# --------------------------------------------------------------------------
def _row_block(rows, target=512):
    """Largest row tile (MXU-friendly) that evenly divides `rows`."""
    if rows <= target:
        return rows
    for blk in (512, 384, 256, 128, 64, 32, 16, 8):
        if blk <= target and rows % blk == 0:
            return blk
    return rows


def _full_spec(a):
    nd = a.ndim
    return pl.BlockSpec(a.shape, lambda *_, _nd=nd: (0,) * _nd)


# --------------------------------------------------------------------------
# Shared in-kernel VMP math
# --------------------------------------------------------------------------
def _ln_vmp_math(x, vx, g, gv, bg, bgv, tol):
    # single fused moment pass: var = E[x^2] - E[x]^2
    mu = jnp.mean(x, axis=-1, keepdims=True)
    ex2 = jnp.mean(x * x, axis=-1, keepdims=True)
    var = jnp.maximum(ex2 - mu * mu, 0.0)
    inv = lax.rsqrt(var + tol)
    xh = (x - mu) * inv
    xln = g * xh + bg
    # TODO(synk): diagonal-Jacobian variance propagation; exact LayerNormVMP
    #             moment matching of the original helper is unknown.
    vxln = (g * g) * vx * (inv * inv) + gv * (xh * xh) + bgv
    return xln, vxln


def _linear_vmp_math(x, vx, wt, vt):
    # y = x W^T ; var_y = [var_x | x^2] @ [(W*W+Wv)^T ; Wv^T]  (one stacked matmul)
    y = jnp.dot(x, wt, preferred_element_type=jnp.float32)
    vin = jnp.concatenate([vx, x * x], axis=-1).astype(vt.dtype)
    vy = jnp.dot(vin, vt, preferred_element_type=jnp.float32)
    return y, vy


def _head_attn_vmp(q, vq, k, vk, v, vv, scale, mask):
    # quadratic_vmp(q, k^T); mean path f32, variance path bf16 (fused k^2+vk term)
    s = jnp.dot(q, k.T, preferred_element_type=jnp.float32) * scale
    kvar = (k * k + vk).astype(jnp.bfloat16)
    vs = (jnp.dot(vq.astype(jnp.bfloat16), kvar.T, preferred_element_type=jnp.float32)
          + jnp.dot((q * q).astype(jnp.bfloat16), vk.astype(jnp.bfloat16).T,
                    preferred_element_type=jnp.float32)) * (scale * scale)
    if mask is not None:
        s = jnp.where(mask, -1e30, s)   # triu(diagonal=1) mask; exp underflows to 0
    # softmax_vmp
    m = jnp.max(s, axis=-1, keepdims=True)
    e = jnp.exp(s - m)
    p = e * pl.reciprocal(jnp.sum(e, axis=-1, keepdims=True), approx=True)
    # TODO(synk): softmax_vmp variance via diagonal-Jacobian approximation.
    vp = (p * (1.0 - p)) ** 2 * vs
    # quadratic_vmp(p, v)
    o = jnp.dot(p, v, preferred_element_type=jnp.float32)
    vvar = (v * v + vv).astype(jnp.bfloat16)
    vo = (jnp.dot(vp.astype(jnp.bfloat16), vvar, preferred_element_type=jnp.float32)
          + jnp.dot((p * p).astype(jnp.bfloat16), vv.astype(jnp.bfloat16),
                    preferred_element_type=jnp.float32))
    return o, vo


# --------------------------------------------------------------------------
# Kernels
# --------------------------------------------------------------------------
def _self_block_kernel(x_ref, vx_ref, g_ref, gv_ref, bg_ref, bgv_ref,
                       wt_ref, vt_ref, o_ref, vo_ref, *, H, dh, scale, tol):
    """LN1 + fused QKV projection + self-attention VMP + residual (layers > 0)."""
    x = x_ref[0]
    vx = vx_ref[0]
    xr, vxr = _ln_vmp_math(x, vx, g_ref[...], gv_ref[...], bg_ref[...], bgv_ref[...], tol)
    qkv, vqkv = _linear_vmp_math(xr, vxr, wt_ref[...], vt_ref[...])
    T = x.shape[0]
    D = H * dh
    row = lax.broadcasted_iota(jnp.int32, (T, T), 0)
    col = lax.broadcasted_iota(jnp.int32, (T, T), 1)
    mask = col > row
    for h in range(H):
        lo = h * dh
        o, vo = _head_attn_vmp(
            qkv[:, lo:lo + dh], vqkv[:, lo:lo + dh],
            qkv[:, D + lo:D + lo + dh], vqkv[:, D + lo:D + lo + dh],
            qkv[:, 2 * D + lo:2 * D + lo + dh], vqkv[:, 2 * D + lo:2 * D + lo + dh],
            scale, mask)
        # direct per-head store of residual + attention output (no lane concat)
        # TODO(synk): residual_vmp 'identity'/'taylor' modes unknown; independent sum.
        o_ref[0, :, lo:lo + dh] = xr[:, lo:lo + dh] + o
        vo_ref[0, :, lo:lo + dh] = vxr[:, lo:lo + dh] + vo


def _self_block0_kernel(x_ref, wt_ref, wvt_ref, o_ref, vo_ref, *, H, dh, scale):
    """Layer-0 variant: no LayerNorm and var_x == 0 (vx stream / matmul skipped)."""
    x = x_ref[0]
    qkv = jnp.dot(x, wt_ref[...], preferred_element_type=jnp.float32)
    vqkv = jnp.dot((x * x).astype(jnp.bfloat16), wvt_ref[...],
                   preferred_element_type=jnp.float32)
    T = x.shape[0]
    D = H * dh
    row = lax.broadcasted_iota(jnp.int32, (T, T), 0)
    col = lax.broadcasted_iota(jnp.int32, (T, T), 1)
    mask = col > row
    for h in range(H):
        lo = h * dh
        o, vo = _head_attn_vmp(
            qkv[:, lo:lo + dh], vqkv[:, lo:lo + dh],
            qkv[:, D + lo:D + lo + dh], vqkv[:, D + lo:D + lo + dh],
            qkv[:, 2 * D + lo:2 * D + lo + dh], vqkv[:, 2 * D + lo:2 * D + lo + dh],
            scale, mask)
        o_ref[0, :, lo:lo + dh] = x[:, lo:lo + dh] + o
        vo_ref[0, :, lo:lo + dh] = vo          # residual variance is zero at layer 0


def _cross_block_kernel(x_ref, vx_ref, g_ref, gv_ref, bg_ref, bgv_ref,
                        wt_ref, vt_ref, kt_ref, kvst_ref, v_ref, vvst_ref,
                        o_ref, vo_ref, *, H, dh, scale, tol):
    """LN2 + Q projection + cross-attention VMP (pre-stacked encoder K/V) + residual."""
    x = x_ref[0]
    vx = vx_ref[0]
    xr, vxr = _ln_vmp_math(x, vx, g_ref[...], gv_ref[...], bg_ref[...], bgv_ref[...], tol)
    q, vq = _linear_vmp_math(xr, vxr, wt_ref[...], vt_ref[...])
    T = x.shape[0]
    S = kt_ref.shape[3]
    row = lax.broadcasted_iota(jnp.int32, (T, S), 0)
    col = lax.broadcasted_iota(jnp.int32, (T, S), 1)
    mask = col > row      # reference DecoderHeadVMP applies triu(1) mask unconditionally
    for h in range(H):
        lo = h * dh
        qh = q[:, lo:lo + dh]
        vqh = vq[:, lo:lo + dh]
        s = jnp.dot(qh, kt_ref[0, h], preferred_element_type=jnp.float32) * scale
        vqq = jnp.concatenate([vqh, qh * qh], axis=-1).astype(jnp.bfloat16)
        vs = jnp.dot(vqq, kvst_ref[0, h],
                     preferred_element_type=jnp.float32) * (scale * scale)
        s = jnp.where(mask, -1e30, s)
        m = jnp.max(s, axis=-1, keepdims=True)
        e = jnp.exp(s - m)
        p = e * pl.reciprocal(jnp.sum(e, axis=-1, keepdims=True), approx=True)
        vp = (p * (1.0 - p)) ** 2 * vs
        o = jnp.dot(p, v_ref[0, h], preferred_element_type=jnp.float32)
        vpp = jnp.concatenate([vp, p * p], axis=-1).astype(jnp.bfloat16)
        vo = jnp.dot(vpp, vvst_ref[0, h], preferred_element_type=jnp.float32)
        o_ref[0, :, lo:lo + dh] = xr[:, lo:lo + dh] + o
        vo_ref[0, :, lo:lo + dh] = vxr[:, lo:lo + dh] + vo


def _ln_fc_relu_res_kernel(x_ref, vx_ref, g_ref, gv_ref, bg_ref, bgv_ref,
                           wt_ref, vt_ref, b_ref, bv_ref,
                           y_ref, vy_ref, *, tol, apply_sigmoid):
    xln, vxln = _ln_vmp_math(x_ref[...], vx_ref[...], g_ref[...], gv_ref[...],
                             bg_ref[...], bgv_ref[...], tol)
    y, vy = _linear_vmp_math(xln, vxln, wt_ref[...], vt_ref[...])
    y = y + b_ref[...]
    vy = vy + bv_ref[...]
    # relu_vmp(..., return_jac=True): Jacobian^2 = indicator
    relu_mask = (y > 0).astype(y.dtype)
    y = y * relu_mask
    vy = vy * relu_mask
    # residual with the LayerNorm output
    y = xln + y
    vy = vxln + vy
    if apply_sigmoid:
        s = jax.nn.sigmoid(y)
        vy = (s * (1.0 - s)) ** 2 * vy
        y = s
    y_ref[...] = y
    vy_ref[...] = vy


# --------------------------------------------------------------------------
# Wrappers (pallas_call plumbing)
# --------------------------------------------------------------------------
def self_attention_block(layer, x, vx, h, scale, tol, first_layer):
    B, T, D = x.shape
    dh = D // h
    spec_d = pl.BlockSpec((1, T, D), lambda b: (b, 0, 0))
    qkv = layer["qkv"]
    if first_layer:
        kern = functools.partial(_self_block0_kernel, H=h, dh=dh, scale=scale)
        return pl.pallas_call(
            kern, grid=(B,),
            in_specs=[spec_d, _full_spec(qkv["wt"]), _full_spec(qkv["wvt"])],
            out_specs=[spec_d, spec_d],
            out_shape=(jax.ShapeDtypeStruct((B, T, D), jnp.float32),) * 2,
            compiler_params=_COMPILER_PARAMS,
        )(x, qkv["wt"], qkv["wvt"])
    ln = layer["norm1"]
    kern = functools.partial(_self_block_kernel, H=h, dh=dh, scale=scale, tol=tol)
    return pl.pallas_call(
        kern, grid=(B,),
        in_specs=[spec_d, spec_d,
                  _full_spec(ln["g"]), _full_spec(ln["gv"]),
                  _full_spec(ln["b"]), _full_spec(ln["bv"]),
                  _full_spec(qkv["wt"]), _full_spec(qkv["vt"])],
        out_specs=[spec_d, spec_d],
        out_shape=(jax.ShapeDtypeStruct((B, T, D), jnp.float32),) * 2,
        compiler_params=_COMPILER_PARAMS,
    )(x, vx, ln["g"], ln["gv"], ln["b"], ln["bv"], qkv["wt"], qkv["vt"])


def cross_attention_block(layer, x, vx, kt_enc, kvst_enc, v_enc, vvst_enc,
                          h, scale, tol):
    B, T, D = x.shape
    dh = D // h
    spec_d = pl.BlockSpec((1, T, D), lambda b: (b, 0, 0))

    def enc_spec(a):
        return pl.BlockSpec((1,) + a.shape[1:], lambda b: (b, 0, 0, 0))

    ln = layer["norm2"]
    lin = layer["q2"]
    kern = functools.partial(_cross_block_kernel, H=h, dh=dh, scale=scale, tol=tol)
    return pl.pallas_call(
        kern, grid=(B,),
        in_specs=[spec_d, spec_d,
                  _full_spec(ln["g"]), _full_spec(ln["gv"]),
                  _full_spec(ln["b"]), _full_spec(ln["bv"]),
                  _full_spec(lin["wt"]), _full_spec(lin["vt"]),
                  enc_spec(kt_enc), enc_spec(kvst_enc),
                  enc_spec(v_enc), enc_spec(vvst_enc)],
        out_specs=[spec_d, spec_d],
        out_shape=(jax.ShapeDtypeStruct((B, T, D), jnp.float32),) * 2,
        compiler_params=_COMPILER_PARAMS,
    )(x, vx, ln["g"], ln["gv"], ln["b"], ln["bv"], lin["wt"], lin["vt"],
      kt_enc, kvst_enc, v_enc, vvst_enc)


def ln_fc_relu_residual(ln, lin, x, vx, tol, apply_sigmoid):
    """Fused LayerNormVMP + FC LinearVMP + ReLU(jac) + residual (+ sigmoid)."""
    B, T, D = x.shape
    dout = lin["wt"].shape[1]
    rows = B * T
    blk = _row_block(rows)
    x2 = x.reshape(rows, D)
    vx2 = vx.reshape(rows, D)
    row_in = pl.BlockSpec((blk, D), lambda i: (i, 0))
    row_out = pl.BlockSpec((blk, dout), lambda i: (i, 0))
    y, vy = pl.pallas_call(
        functools.partial(_ln_fc_relu_res_kernel, tol=tol,
                          apply_sigmoid=apply_sigmoid),
        grid=(rows // blk,),
        in_specs=[row_in, row_in,
                  _full_spec(ln["g"]), _full_spec(ln["gv"]),
                  _full_spec(ln["b"]), _full_spec(ln["bv"]),
                  _full_spec(lin["wt"]), _full_spec(lin["vt"]),
                  _full_spec(lin["b"]), _full_spec(lin["bv"])],
        out_specs=[row_out, row_out],
        out_shape=(jax.ShapeDtypeStruct((rows, dout), jnp.float32),) * 2,
        compiler_params=_COMPILER_PARAMS,
    )(x2, vx2, ln["g"], ln["gv"], ln["b"], ln["bv"],
      lin["wt"], lin["vt"], lin["b"], lin["bv"])
    return y.reshape(B, T, dout), vy.reshape(B, T, dout)


# --------------------------------------------------------------------------
# Parameter initialization (deterministic, in-script) with pre-fused weights
# --------------------------------------------------------------------------
def init_linear(key, d_in, d_out, bias, var_init):
    w = jax.random.normal(key, (d_out, d_in), jnp.float32) / jnp.sqrt(float(d_in))
    wv = jnp.full((d_out, d_in), var_init[0], jnp.float32)
    p = dict(
        wt=w.T,                                                             # f32 mean path
        vt=jnp.concatenate([(w * w + wv).T, wv.T], axis=0).astype(jnp.bfloat16),  # stacked var
        wvt=wv.T.astype(jnp.bfloat16),                                      # layer-0 (vx==0) path
    )
    if bias:
        p["b"] = jnp.zeros((1, d_out), jnp.float32)
        p["bv"] = jnp.full((1, d_out), var_init[1], jnp.float32)
    return p


def _concat_linear(ps):
    return dict(wt=jnp.concatenate([p["wt"] for p in ps], axis=1),
                vt=jnp.concatenate([p["vt"] for p in ps], axis=1),
                wvt=jnp.concatenate([p["wvt"] for p in ps], axis=1))


def init_layernorm(d, var_init):
    return dict(g=jnp.ones((1, d), jnp.float32),
                gv=jnp.full((1, d), var_init[0], jnp.float32),
                b=jnp.zeros((1, d), jnp.float32),
                bv=jnp.full((1, d), var_init[1], jnp.float32))


def get_positional_encoding(k, T):
    pos = jnp.arange(T, dtype=jnp.float32)[:, None]
    i = jnp.arange(k, dtype=jnp.float32)[None, :]
    angle = pos / jnp.power(10000.0, (2.0 * jnp.floor(i / 2.0)) / k)
    return jnp.where(jnp.mod(jnp.arange(k), 2) == 0, jnp.sin(angle), jnp.cos(angle))


def init_decoder_vmp(key, n, h, k_dim, var_init, t_out):
    keys = jax.random.split(key, n * 8)
    ki = iter(range(n * 8))
    layers = []
    for i in range(n):
        layer = {}
        if i != 0:
            layer["norm1"] = init_layernorm(k_dim, var_init)
        q = init_linear(keys[next(ki)], k_dim, k_dim, False, var_init)
        kk = init_linear(keys[next(ki)], k_dim, k_dim, False, var_init)
        vv = init_linear(keys[next(ki)], k_dim, k_dim, False, var_init)
        layer["qkv"] = _concat_linear([q, kk, vv])          # fused QKV projection
        layer["norm2"] = init_layernorm(k_dim, var_init)
        layer["q2"] = init_linear(keys[next(ki)], k_dim, k_dim, False, var_init)
        layer["norm3"] = init_layernorm(k_dim, var_init)
        layer["fc"] = init_linear(keys[next(ki)], k_dim, k_dim, True, var_init)
        layers.append(layer)
    return dict(layers=layers, pos=get_positional_encoding(k_dim, t_out + 1))


# --------------------------------------------------------------------------
# DecoderVMP forward (embed=False path: k == output_dim)
# --------------------------------------------------------------------------
def decoder_vmp_forward(params, x, k_enc, vk_enc, v_enc, vv_enc,
                        *, n, h, mode="identity", tol=1e-5):
    del mode  # TODO(synk): residual mode distinction unknown; independent sum used.
    B, T, D = x.shape
    scale = 1.0 / math.sqrt(D)      # reference divides by sqrt(d) (full model dim)
    vx = jnp.zeros_like(x)
    x = x + params["pos"][None, :, :]
    # One-time encoder K/V preprocessing shared by every layer's cross-attention:
    #   kt        : K^T per head           (B, H, dh, S)   f32  (mean path)
    #   kvst      : [(K*K+varK) ; varK]^T  (B, H, 2dh, S)  bf16 (stacked score variance)
    #   vvst      : [(V*V+varV) ; varV]    (B, H, 2S, dh)  bf16 (stacked PV variance)
    kt_enc = jnp.swapaxes(k_enc, 2, 3)
    kvst_enc = jnp.swapaxes(
        jnp.concatenate([k_enc * k_enc + vk_enc, vk_enc], axis=-1), 2, 3
    ).astype(jnp.bfloat16)
    vvst_enc = jnp.concatenate([v_enc * v_enc + vv_enc, vv_enc], axis=2).astype(jnp.bfloat16)
    for i in range(n):
        layer = params["layers"][i]
        # --- self-attention block: (LN1) + fused QKV proj + attn core + residual
        x, vx = self_attention_block(layer, x, vx, h, scale, tol, first_layer=(i == 0))
        # --- cross-attention block: LN2 + Q proj + attn core + residual
        x, vx = cross_attention_block(layer, x, vx, kt_enc, kvst_enc, v_enc, vvst_enc,
                                      h, scale, tol)
        # --- FFN block: LN3 + FC + ReLU(jac) + residual (+ final sigmoid)
        x, vx = ln_fc_relu_residual(layer["norm3"], layer["fc"], x, vx, tol,
                                    apply_sigmoid=(i == n - 1))
    return x, vx


# --------------------------------------------------------------------------
if __name__ == "__main__":
    B, T, D, H, N_LAYERS = 2, 8, 32, 4, 2
    S = 8                      # encoder sequence length
    DH = D // H
    VAR_INIT = (0.001, 0.01)

    key = jax.random.PRNGKey(0)
    k0, k1, k2, k3, k4 = jax.random.split(key, 5)
    x = jax.random.normal(k0, (B, T, D), jnp.float32)
    k_enc = jax.random.normal(k1, (B, H, S, DH), jnp.float32)
    vk_enc = jax.nn.softplus(jax.random.normal(k2, (B, H, S, DH))) * 0.01
    v_enc = jax.random.normal(k3, (B, H, S, DH), jnp.float32)
    vv_enc = jax.nn.softplus(jax.random.normal(k4, (B, H, S, DH))) * 0.01

    params = init_decoder_vmp(jax.random.PRNGKey(1), N_LAYERS, H, D,
                              VAR_INIT, t_out=T - 1)

    fwd = jax.jit(functools.partial(decoder_vmp_forward, n=N_LAYERS, h=H,
                                    mode="identity", tol=1e-5))
    y_mean, y_var = fwd(params, x, k_enc, vk_enc, v_enc, vv_enc)
    jax.block_until_ready((y_mean, y_var))

    assert y_mean.shape == (B, T, D) and y_var.shape == (B, T, D)
    assert bool(jnp.all(jnp.isfinite(y_mean))) and bool(jnp.all(jnp.isfinite(y_var)))
    assert bool(jnp.all(y_var >= 0.0))
    print("KERNEL_OK")
</pallas_src>

<mosaic_0001>
module attributes {stable_mosaic.version = 11 : i64} {
  func.func @_self_block0_kernel(%arg0: i32, %arg1: memref<1x8x32xf32, #tpu.memory_space<vmem>>, %arg2: memref<32x96xf32, #tpu.memory_space<vmem>>, %arg3: memref<32x96xbf16, #tpu.memory_space<vmem>>, %arg4: memref<1x8x32xf32, #tpu.memory_space<vmem>>, %arg5: memref<1x8x32xf32, #tpu.memory_space<vmem>>) attributes {dimension_semantics = [#tpu.dimension_semantics<parallel>], iteration_bounds = array<i64: 2>, scalar_prefetch = 0 : i64, scratch_operands = 0 : i64, tpu.core_type = #tpu.core_type<tc>, window_params = [{transform_indices = @transform_0, window_bounds = array<i64: 1, 8, 32>}, {pipeline_mode = #tpu.pipeline_mode<synchronous>, transform_indices = @transform_1, window_bounds = array<i64: 32, 96>}, {pipeline_mode = #tpu.pipeline_mode<synchronous>, transform_indices = @transform_2, window_bounds = array<i64: 32, 96>}, {transform_indices = @transform_3, window_bounds = array<i64: 1, 8, 32>}, {transform_indices = @transform_4, window_bounds = array<i64: 1, 8, 32>}]} {
    %c0 = arith.constant 0 : index
    %c0_0 = arith.constant 0 : index
    %c0_1 = arith.constant 0 : index
    %0 = vector.load %arg1[%c0, %c0_0, %c0_1] : memref<1x8x32xf32, #tpu.memory_space<vmem>>, vector<1x8x32xf32>
    %1 = vector.shape_cast %0 : vector<1x8x32xf32> to vector<8x32xf32>
    %c0_2 = arith.constant 0 : index
    %c0_3 = arith.constant 0 : index
    %2 = vector.load %arg2[%c0_2, %c0_3] : memref<32x96xf32, #tpu.memory_space<vmem>>, vector<32x96xf32>
    %cst = arith.constant dense<0.000000e+00> : vector<8x96xf32>
    %3 = tpu.matmul %1, %2, %cst {dimension_numbers = #tpu.dot_dimension_numbers<[1], [0], [0], [1], [0, 0, 1, 1], [], []>} : vector<8x32xf32>, vector<32x96xf32>, vector<8x96xf32> -> vector<8x96xf32>
    %4 = arith.mulf %1, %1 : vector<8x32xf32>
    %5 = arith.truncf %4 : vector<8x32xf32> to vector<8x32xbf16>
    %c0_4 = arith.constant 0 : index
    %c0_5 = arith.constant 0 : index
    %6 = vector.load %arg3[%c0_4, %c0_5] : memref<32x96xbf16, #tpu.memory_space<vmem>>, vector<32x96xbf16>
    %cst_6 = arith.constant dense<0.000000e+00> : vector<8x96xf32>
    %7 = tpu.matmul %5, %6, %cst_6 {dimension_numbers = #tpu.dot_dimension_numbers<[1], [0], [0], [1], [0, 0, 1, 1], [], []>} : vector<8x32xbf16>, vector<32x96xbf16>, vector<8x96xf32> -> vector<8x96xf32>
    %8 = tpu.iota {dimensions = array<i32: 0>} : vector<8x8xi32>
    %9 = tpu.iota {dimensions = array<i32: 1>} : vector<8x8xi32>
    %10 = arith.cmpi sgt, %9, %8 : vector<8x8xi32>
    %11 = vector.extract_strided_slice %3 {offsets = [0, 0], sizes = [8, 8], strides = [1, 1]} : vector<8x96xf32> to vector<8x8xf32>
    %12 = vector.extract_strided_slice %7 {offsets = [0, 0], sizes = [8, 8], strides = [1, 1]} : vector<8x96xf32> to vector<8x8xf32>
    %13 = vector.extract_strided_slice %3 {offsets = [0, 32], sizes = [8, 8], strides = [1, 1]} : vector<8x96xf32> to vector<8x8xf32>
    %14 = vector.extract_strided_slice %7 {offsets = [0, 32], sizes = [8, 8], strides = [1, 1]} : vector<8x96xf32> to vector<8x8xf32>
    %15 = vector.extract_strided_slice %3 {offsets = [0, 64], sizes = [8, 8], strides = [1, 1]} : vector<8x96xf32> to vector<8x8xf32>
    %16 = vector.extract_strided_slice %7 {offsets = [0, 64], sizes = [8, 8], strides = [1, 1]} : vector<8x96xf32> to vector<8x8xf32>
    %17 = tpu.transpose %13, [1, 0] : vector<8x8xf32> -> vector<8x8xf32>
    %cst_7 = arith.constant dense<0.000000e+00> : vector<8x8xf32>
    %18 = tpu.matmul %11, %17, %cst_7 {dimension_numbers = #tpu.dot_dimension_numbers<[1], [0], [0], [1], [0, 0, 1, 1], [], []>} : vector<8x8xf32>, vector<8x8xf32>, vector<8x8xf32> -> vector<8x8xf32>
    %cst_8 = arith.constant 0.176776692 : f32
    %19 = vector.broadcast %cst_8 : f32 to vector<8x8xf32>
    %20 = arith.mulf %18, %19 : vector<8x8xf32>
    %21 = arith.mulf %13, %13 : vector<8x8xf32>
    %22 = arith.addf %21, %14 : vector<8x8xf32>
    %23 = arith.truncf %22 : vector<8x8xf32> to vector<8x8xbf16>
    %24 = arith.truncf %12 : vector<8x8xf32> to vector<8x8xbf16>
    %25 = tpu.transpose %23, [1, 0] : vector<8x8xbf16> -> vector<8x8xbf16>
    %cst_9 = arith.constant dense<0.000000e+00> : vector<8x8xf32>
    %26 = tpu.matmul %24, %25, %cst_9 {dimension_numbers = #tpu.dot_dimension_numbers<[1], [0], [0], [1], [0, 0, 1, 1], [], []>} : vector<8x8xbf16>, vector<8x8xbf16>, vector<8x8xf32> -> vector<8x8xf32>
    %27 = arith.mulf %11, %11 : vector<8x8xf32>
    %28 = arith.truncf %27 : vector<8x8xf32> to vector<8x8xbf16>
    %29 = arith.truncf %14 : vector<8x8xf32> to vector<8x8xbf16>
    %30 = tpu.transpose %29, [1, 0] : vector<8x8xbf16> -> vector<8x8xbf16>
    %cst_10 = arith.constant dense<0.000000e+00> : vector<8x8xf32>
    %31 = tpu.matmul %28, %30, %cst_10 {dimension_numbers = #tpu.dot_dimension_numbers<[1], [0], [0], [1], [0, 0, 1, 1], [], []>} : vector<8x8xbf16>, vector<8x8xbf16>, vector<8x8xf32> -> vector<8x8xf32>
    %32 = arith.addf %26, %31 : vector<8x8xf32>
    %cst_11 = arith.constant 3.125000e-02 : f32
    %33 = vector.broadcast %cst_11 : f32 to vector<8x8xf32>
    %34 = arith.mulf %32, %33 : vector<8x8xf32>
    %cst_12 = arith.constant -1.000000e+30 : f32
    %35 = vector.broadcast %cst_12 : f32 to vector<8x8xf32>
    %36 = arith.select %10, %35, %20 : vector<8x8xi1>, vector<8x8xf32>
    %cst_13 = arith.constant dense<0xFF800000> : vector<8xf32>
    %37 = vector.multi_reduction <maximumf>, %36, %cst_13 [1] : vector<8x8xf32> to vector<8xf32>
    %38 = vector.shape_cast %37 : vector<8xf32> to vector<8x1xf32>
    %39 = vector.broadcast %38 : vector<8x1xf32> to vector<8x8xf32>
    %40 = arith.subf %36, %39 : vector<8x8xf32>
    %41 = math.exp %40 : vector<8x8xf32>
    %cst_14 = arith.constant dense<0.000000e+00> : vector<8xf32>
    %42 = vector.multi_reduction <add>, %41, %cst_14 [1] : vector<8x8xf32> to vector<8xf32>
    %43 = vector.shape_cast %42 : vector<8xf32> to vector<8x1xf32>
    %44 = tpu.reciprocal %43 {approx = true} : vector<8x1xf32> -> vector<8x1xf32>
    %45 = vector.broadcast %44 : vector<8x1xf32> to vector<8x8xf32>
    %46 = arith.mulf %41, %45 : vector<8x8xf32>
    %cst_15 = arith.constant 1.000000e+00 : f32
    %47 = vector.broadcast %cst_15 : f32 to vector<8x8xf32>
    %48 = arith.subf %47, %46 : vector<8x8xf32>
    %49 = arith.mulf %46, %48 : vector<8x8xf32>
    %50 = arith.mulf %49, %49 : vector<8x8xf32>
    %51 = arith.mulf %50, %34 : vector<8x8xf32>
    %cst_16 = arith.constant dense<0.000000e+00> : vector<8x8xf32>
    %52 = tpu.matmul %46, %15, %cst_16 {dimension_numbers = #tpu.dot_dimension_numbers<[1], [0], [0], [1], [0, 0, 1, 1], [], []>} : vector<8x8xf32>, vector<8x8xf32>, vector<8x8xf32> -> vector<8x8xf32>
    %53 = arith.mulf %15, %15 : vector<8x8xf32>
    %54 = arith.addf %53, %16 : vector<8x8xf32>
    %55 = arith.truncf %54 : vector<8x8xf32> to vector<8x8xbf16>
    %56 = arith.truncf %51 : vector<8x8xf32> to vector<8x8xbf16>
    %cst_17 = arith.constant dense<0.000000e+00> : vector<8x8xf32>
    %57 = tpu.matmul %56, %55, %cst_17 {dimension_numbers = #tpu.dot_dimension_numbers<[1], [0], [0], [1], [0, 0, 1, 1], [], []>} : vector<8x8xbf16>, vector<8x8xbf16>, vector<8x8xf32> -> vector<8x8xf32>
    %58 = arith.mulf %46, %46 : vector<8x8xf32>
    %59 = arith.truncf %58 : vector<8x8xf32> to vector<8x8xbf16>
    %60 = arith.truncf %16 : vector<8x8xf32> to vector<8x8xbf16>
    %cst_18 = arith.constant dense<0.000000e+00> : vector<8x8xf32>
    %61 = tpu.matmul %59, %60, %cst_18 {dimension_numbers = #tpu.dot_dimension_numbers<[1], [0], [0], [1], [0, 0, 1, 1], [], []>} : vector<8x8xbf16>, vector<8x8xbf16>, vector<8x8xf32> -> vector<8x8xf32>
    %62 = arith.addf %57, %61 : vector<8x8xf32>
    %63 = vector.extract_strided_slice %1 {offsets = [0, 0], sizes = [8, 8], strides = [1, 1]} : vector<8x32xf32> to vector<8x8xf32>
    %64 = arith.addf %63, %52 : vector<8x8xf32>
    %c0_19 = arith.constant 0 : index
    %c0_20 = arith.constant 0 : index
    %c0_21 = arith.constant 0 : index
    %65 = vector.load %arg4[%c0_19, %c0_20, %c0_21] : memref<1x8x32xf32, #tpu.memory_space<vmem>>, vector<1x8x8xf32>
    %66 = vector.shape_cast %65 : vector<1x8x8xf32> to vector<8x8xf32>
    %67 = vector.shape_cast %64 : vector<8x8xf32> to vector<1x8x8xf32>
    tpu.vector_store %arg4[%c0_19, %c0_20, %c0_21], %67 {strides = array<i32>} : memref<1x8x32xf32, #tpu.memory_space<vmem>>, vector<1x8x8xf32>,
    %c0_22 = arith.constant 0 : index
    %c0_23 = arith.constant 0 : index
    %c0_24 = arith.constant 0 : index
    %68 = vector.load %arg5[%c0_22, %c0_23, %c0_24] : memref<1x8x32xf32, #tpu.memory_space<vmem>>, vector<1x8x8xf32>
    %69 = vector.shape_cast %68 : vector<1x8x8xf32> to vector<8x8xf32>
    %70 = vector.shape_cast %62 : vector<8x8xf32> to vector<1x8x8xf32>
    tpu.vector_store %arg5[%c0_22, %c0_23, %c0_24], %70 {strides = array<i32>} : memref<1x8x32xf32, #tpu.memory_space<vmem>>, vector<1x8x8xf32>,
    %71 = vector.extract_strided_slice %3 {offsets = [0, 8], sizes = [8, 8], strides = [1, 1]} : vector<8x96xf32> to vector<8x8xf32>
    %72 = vector.extract_strided_slice %7 {offsets = [0, 8], sizes = [8, 8], strides = [1, 1]} : vector<8x96xf32> to vector<8x8xf32>
    %73 = vector.extract_strided_slice %3 {offsets = [0, 40], sizes = [8, 8], strides = [1, 1]} : vector<8x96xf32> to vector<8x8xf32>
    %74 = vector.extract_strided_slice %7 {offsets = [0, 40], sizes = [8, 8], strides = [1, 1]} : vector<8x96xf32> to vector<8x8xf32>
    %75 = vector.extract_strided_slice %3 {offsets = [0, 72], sizes = [8, 8], strides = [1, 1]} : vector<8x96xf32> to vector<8x8xf32>
    %76 = vector.extract_strided_slice %7 {offsets = [0, 72], sizes = [8, 8], strides = [1, 1]} : vector<8x96xf32> to vector<8x8xf32>
    %77 = tpu.transpose %73, [1, 0] : vector<8x8xf32> -> vector<8x8xf32>
    %cst_25 = arith.constant dense<0.000000e+00> : vector<8x8xf32>
    %78 = tpu.matmul %71, %77, %cst_25 {dimension_numbers = #tpu.dot_dimension_numbers<[1], [0], [0], [1], [0, 0, 1, 1], [], []>} : vector<8x8xf32>, vector<8x8xf32>, vector<8x8xf32> -> vector<8x8xf32>
    %cst_26 = arith.constant 0.176776692 : f32
    %79 = vector.broadcast %cst_26 : f32 to vector<8x8xf32>
    %80 = arith.mulf %78, %79 : vector<8x8xf32>
    %81 = arith.mulf %73, %73 : vector<8x8xf32>
    %82 = arith.addf %81, %74 : vector<8x8xf32>
    %83 = arith.truncf %82 : vector<8x8xf32> to vector<8x8xbf16>
    %84 = arith.truncf %72 : vector<8x8xf32> to vector<8x8xbf16>
    %85 = tpu.transpose %83, [1, 0] : vector<8x8xbf16> -> vector<8x8xbf16>
    %cst_27 = arith.constant dense<0.000000e+00> : vector<8x8xf32>
    %86 = tpu.matmul %84, %85, %cst_27 {dimension_numbers = #tpu.dot_dimension_numbers<[1], [0], [0], [1], [0, 0, 1, 1], [], []>} : vector<8x8xbf16>, vector<8x8xbf16>, vector<8x8xf32> -> vector<8x8xf32>
    %87 = arith.mulf %71, %71 : vector<8x8xf32>
    %88 = arith.truncf %87 : vector<8x8xf32> to vector<8x8xbf16>
    %89 = arith.truncf %74 : vector<8x8xf32> to vector<8x8xbf16>
    %90 = tpu.transpose %89, [1, 0] : vector<8x8xbf16> -> vector<8x8xbf16>
    %cst_28 = arith.constant dense<0.000000e+00> : vector<8x8xf32>
    %91 = tpu.matmul %88, %90, %cst_28 {dimension_numbers = #tpu.dot_dimension_numbers<[1], [0], [0], [1], [0, 0, 1, 1], [], []>} : vector<8x8xbf16>, vector<8x8xbf16>, vector<8x8xf32> -> vector<8x8xf32>
    %92 = arith.addf %86, %91 : vector<8x8xf32>
    %cst_29 = arith.constant 3.125000e-02 : f32
    %93 = vector.broadcast %cst_29 : f32 to vector<8x8xf32>
    %94 = arith.mulf %92, %93 : vector<8x8xf32>
    %cst_30 = arith.constant -1.000000e+30 : f32
    %95 = vector.broadcast %cst_30 : f32 to vector<8x8xf32>
    %96 = arith.select %10, %95, %80 : vector<8x8xi1>, vector<8x8xf32>
    %cst_31 = arith.constant dense<0xFF800000> : vector<8xf32>
    %97 = vector.multi_reduction <maximumf>, %96, %cst_31 [1] : vector<8x8xf32> to vector<8xf32>
    %98 = vector.shape_cast %97 : vector<8xf32> to vector<8x1xf32>
    %99 = vector.broadcast %98 : vector<8x1xf32> to vector<8x8xf32>
    %100 = arith.subf %96, %99 : vector<8x8xf32>
    %101 = math.exp %100 : vector<8x8xf32>
    %cst_32 = arith.constant dense<0.000000e+00> : vector<8xf32>
    %102 = vector.multi_reduction <add>, %101, %cst_32 [1] : vector<8x8xf32> to vector<8xf32>
    %103 = vector.shape_cast %102 : vector<8xf32> to vector<8x1xf32>
    %104 = tpu.reciprocal %103 {approx = true} : vector<8x1xf32> -> vector<8x1xf32>
    %105 = vector.broadcast %104 : vector<8x1xf32> to vector<8x8xf32>
    %106 = arith.mulf %101, %105 : vector<8x8xf32>
    %cst_33 = arith.constant 1.000000e+00 : f32
    %107 = vector.broadcast %cst_33 : f32 to vector<8x8xf32>
    %108 = arith.subf %107, %106 : vector<8x8xf32>
    %109 = arith.mulf %106, %108 : vector<8x8xf32>
    %110 = arith.mulf %109, %109 : vector<8x8xf32>
    %111 = arith.mulf %110, %94 : vector<8x8xf32>
    %cst_34 = arith.constant dense<0.000000e+00> : vector<8x8xf32>
    %112 = tpu.matmul %106, %75, %cst_34 {dimension_numbers = #tpu.dot_dimension_numbers<[1], [0], [0], [1], [0, 0, 1, 1], [], []>} : vector<8x8xf32>, vector<8x8xf32>, vector<8x8xf32> -> vector<8x8xf32>
    %113 = arith.mulf %75, %75 : vector<8x8xf32>
    %114 = arith.addf %113, %76 : vector<8x8xf32>
    %115 = arith.truncf %114 : vector<8x8xf32> to vector<8x8xbf16>
    %116 = arith.truncf %111 : vector<8x8xf32> to vector<8x8xbf16>
    %cst_35 = arith.constant dense<0.000000e+00> : vector<8x8xf32>
    %117 = tpu.matmul %116, %115, %cst_35 {dimension_numbers = #tpu.dot_dimension_numbers<[1], [0], [0], [1], [0, 0, 1, 1], [], []>} : vector<8x8xbf16>, vector<8x8xbf16>, vector<8x8xf32> -> vector<8x8xf32>
    %118 = arith.mulf %106, %106 : vector<8x8xf32>
    %119 = arith.truncf %118 : vector<8x8xf32> to vector<8x8xbf16>
    %120 = arith.truncf %76 : vector<8x8xf32> to vector<8x8xbf16>
    %cst_36 = arith.constant dense<0.000000e+00> : vector<8x8xf32>
    %121 = tpu.matmul %119, %120, %cst_36 {dimension_numbers = #tpu.dot_dimension_numbers<[1], [0], [0], [1], [0, 0, 1, 1], [], []>} : vector<8x8xbf16>, vector<8x8xbf16>, vector<8x8xf32> -> vector<8x8xf32>
    %122 = arith.addf %117, %121 : vector<8x8xf32>
    %123 = vector.extract_strided_slice %1 {offsets = [0, 8], sizes = [8, 8], strides = [1, 1]} : vector<8x32xf32> to vector<8x8xf32>
    %124 = arith.addf %123, %112 : vector<8x8xf32>
    %c0_37 = arith.constant 0 : index
    %c0_38 = arith.constant 0 : index
    %c8 = arith.constant 8 : index
    %125 = vector.load %arg4[%c0_37, %c0_38, %c8] : memref<1x8x32xf32, #tpu.memory_space<vmem>>, vector<1x8x8xf32>
    %126 = vector.shape_cast %125 : vector<1x8x8xf32> to vector<8x8xf32>
    %127 = vector.shape_cast %124 : vector<8x8xf32> to vector<1x8x8xf32>
    tpu.vector_store %arg4[%c0_37, %c0_38, %c8], %127 {strides = array<i32>} : memref<1x8x32xf32, #tpu.memory_space<vmem>>, vector<1x8x8xf32>,
    %c0_39 = arith.constant 0 : index
    %c0_40 = arith.constant 0 : index
    %c8_41 = arith.constant 8 : index
    %128 = vector.load %arg5[%c0_39, %c0_40, %c8_41] : memref<1x8x32xf32, #tpu.memory_space<vmem>>, vector<1x8x8xf32>
    %129 = vector.shape_cast %128 : vector<1x8x8xf32> to vector<8x8xf32>
    %130 = vector.shape_cast %122 : vector<8x8xf32> to vector<1x8x8xf32>
    tpu.vector_store %arg5[%c0_39, %c0_40, %c8_41], %130 {strides = array<i32>} : memref<1x8x32xf32, #tpu.memory_space<vmem>>, vector<1x8x8xf32>,
    %131 = vector.extract_strided_slice %3 {offsets = [0, 16], sizes = [8, 8], strides = [1, 1]} : vector<8x96xf32> to vector<8x8xf32>
    %132 = vector.extract_strided_slice %7 {offsets = [0, 16], sizes = [8, 8], strides = [1, 1]} : vector<8x96xf32> to vector<8x8xf32>
    %133 = vector.extract_strided_slice %3 {offsets = [0, 48], sizes = [8, 8], strides = [1, 1]} : vector<8x96xf32> to vector<8x8xf32>
    %134 = vector.extract_strided_slice %7 {offsets = [0, 48], sizes = [8, 8], strides = [1, 1]} : vector<8x96xf32> to vector<8x8xf32>
    %135 = vector.extract_strided_slice %3 {offsets = [0, 80], sizes = [8, 8], strides = [1, 1]} : vector<8x96xf32> to vector<8x8xf32>
    %136 = vector.extract_strided_slice %7 {offsets = [0, 80], sizes = [8, 8], strides = [1, 1]} : vector<8x96xf32> to vector<8x8xf32>
    %137 = tpu.transpose %133, [1, 0] : vector<8x8xf32> -> vector<8x8xf32>
    %cst_42 = arith.constant dense<0.000000e+00> : vector<8x8xf32>
    %138 = tpu.matmul %131, %137, %cst_42 {dimension_numbers = #tpu.dot_dimension_numbers<[1], [0], [0], [1], [0, 0, 1, 1], [], []>} : vector<8x8xf32>, vector<8x8xf32>, vector<8x8xf32> -> vector<8x8xf32>
    %cst_43 = arith.constant 0.176776692 : f32
    %139 = vector.broadcast %cst_43 : f32 to vector<8x8xf32>
    %140 = arith.mulf %138, %139 : vector<8x8xf32>
    %141 = arith.mulf %133, %133 : vector<8x8xf32>
    %142 = arith.addf %141, %134 : vector<8x8xf32>
    %143 = arith.truncf %142 : vector<8x8xf32> to vector<8x8xbf16>
    %144 = arith.truncf %132 : vector<8x8xf32> to vector<8x8xbf16>
    %145 = tpu.transpose %143, [1, 0] : vector<8x8xbf16> -> vector<8x8xbf16>
    %cst_44 = arith.constant dense<0.000000e+00> : vector<8x8xf32>
    %146 = tpu.matmul %144, %145, %cst_44 {dimension_numbers = #tpu.dot_dimension_numbers<[1], [0], [0], [1], [0, 0, 1, 1], [], []>} : vector<8x8xbf16>, vector<8x8xbf16>, vector<8x8xf32> -> vector<8x8xf32>
    %147 = arith.mulf %131, %131 : vector<8x8xf32>
    %148 = arith.truncf %147 : vector<8x8xf32> to vector<8x8xbf16>
    %149 = arith.truncf %134 : vector<8x8xf32> to vector<8x8xbf16>
    %150 = tpu.transpose %149, [1, 0] : vector<8x8xbf16> -> vector<8x8xbf16>
    %cst_45 = arith.constant dense<0.000000e+00> : vector<8x8xf32>
    %151 = tpu.matmul %148, %150, %cst_45 {dimension_numbers = #tpu.dot_dimension_numbers<[1], [0], [0], [1], [0, 0, 1, 1], [], []>} : vector<8x8xbf16>, vector<8x8xbf16>, vector<8x8xf32> -> vector<8x8xf32>
    %152 = arith.addf %146, %151 : vector<8x8xf32>
    %cst_46 = arith.constant 3.125000e-02 : f32
    %153 = vector.broadcast %cst_46 : f32 to vector<8x8xf32>
    %154 = arith.mulf %152, %153 : vector<8x8xf32>
    %cst_47 = arith.constant -1.000000e+30 : f32
    %155 = vector.broadcast %cst_47 : f32 to vector<8x8xf32>
    %156 = arith.select %10, %155, %140 : vector<8x8xi1>, vector<8x8xf32>
    %cst_48 = arith.constant dense<0xFF800000> : vector<8xf32>
    %157 = vector.multi_reduction <maximumf>, %156, %cst_48 [1] : vector<8x8xf32> to vector<8xf32>
    %158 = vector.shape_cast %157 : vector<8xf32> to vector<8x1xf32>
    %159 = vector.broadcast %158 : vector<8x1xf32> to vector<8x8xf32>
    %160 = arith.subf %156, %159 : vector<8x8xf32>
    %161 = math.exp %160 : vector<8x8xf32>
    %cst_49 = arith.constant dense<0.000000e+00> : vector<8xf32>
    %162 = vector.multi_reduction <add>, %161, %cst_49 [1] : vector<8x8xf32> to vector<8xf32>
    %163 = vector.shape_cast %162 : vector<8xf32> to vector<8x1xf32>
    %164 = tpu.reciprocal %163 {approx = true} : vector<8x1xf32> -> vector<8x1xf32>
    %165 = vector.broadcast %164 : vector<8x1xf32> to vector<8x8xf32>
    %166 = arith.mulf %161, %165 : vector<8x8xf32>
    %cst_50 = arith.constant 1.000000e+00 : f32
    %167 = vector.broadcast %cst_50 : f32 to vector<8x8xf32>
    %168 = arith.subf %167, %166 : vector<8x8xf32>
    %169 = arith.mulf %166, %168 : vector<8x8xf32>
    %170 = arith.mulf %169, %169 : vector<8x8xf32>
    %171 = arith.mulf %170, %154 : vector<8x8xf32>
    %cst_51 = arith.constant dense<0.000000e+00> : vector<8x8xf32>
    %172 = tpu.matmul %166, %135, %cst_51 {dimension_numbers = #tpu.dot_dimension_numbers<[1], [0], [0], [1], [0, 0, 1, 1], [], []>} : vector<8x8xf32>, vector<8x8xf32>, vector<8x8xf32> -> vector<8x8xf32>
    %173 = arith.mulf %135, %135 : vector<8x8xf32>
    %174 = arith.addf %173, %136 : vector<8x8xf32>
    %175 = arith.truncf %174 : vector<8x8xf32> to vector<8x8xbf16>
    %176 = arith.truncf %171 : vector<8x8xf32> to vector<8x8xbf16>
    %cst_52 = arith.constant dense<0.000000e+00> : vector<8x8xf32>
    %177 = tpu.matmul %176, %175, %cst_52 {dimension_numbers = #tpu.dot_dimension_numbers<[1], [0], [0], [1], [0, 0, 1, 1], [], []>} : vector<8x8xbf16>, vector<8x8xbf16>, vector<8x8xf32> -> vector<8x8xf32>
    %178 = arith.mulf %166, %166 : vector<8x8xf32>
    %179 = arith.truncf %178 : vector<8x8xf32> to vector<8x8xbf16>
    %180 = arith.truncf %136 : vector<8x8xf32> to vector<8x8xbf16>
    %cst_53 = arith.constant dense<0.000000e+00> : vector<8x8xf32>
    %181 = tpu.matmul %179, %180, %cst_53 {dimension_numbers = #tpu.dot_dimension_numbers<[1], [0], [0], [1], [0, 0, 1, 1], [], []>} : vector<8x8xbf16>, vector<8x8xbf16>, vector<8x8xf32> -> vector<8x8xf32>
    %182 = arith.addf %177, %181 : vector<8x8xf32>
    %183 = vector.extract_strided_slice %1 {offsets = [0, 16], sizes = [8, 8], strides = [1, 1]} : vector<8x32xf32> to vector<8x8xf32>
    %184 = arith.addf %183, %172 : vector<8x8xf32>
    %c0_54 = arith.constant 0 : index
    %c0_55 = arith.constant 0 : index
    %c16 = arith.constant 16 : index
    %185 = vector.load %arg4[%c0_54, %c0_55, %c16] : memref<1x8x32xf32, #tpu.memory_space<vmem>>, vector<1x8x8xf32>
    %186 = vector.shape_cast %185 : vector<1x8x8xf32> to vector<8x8xf32>
    %187 = vector.shape_cast %184 : vector<8x8xf32> to vector<1x8x8xf32>
    tpu.vector_store %arg4[%c0_54, %c0_55, %c16], %187 {strides = array<i32>} : memref<1x8x32xf32, #tpu.memory_space<vmem>>, vector<1x8x8xf32>,
    %c0_56 = arith.constant 0 : index
    %c0_57 = arith.constant 0 : index
    %c16_58 = arith.constant 16 : index
    %188 = vector.load %arg5[%c0_56, %c0_57, %c16_58] : memref<1x8x32xf32, #tpu.memory_space<vmem>>, vector<1x8x8xf32>
    %189 = vector.shape_cast %188 : vector<1x8x8xf32> to vector<8x8xf32>
    %190 = vector.shape_cast %182 : vector<8x8xf32> to vector<1x8x8xf32>
    tpu.vector_store %arg5[%c0_56, %c0_57, %c16_58], %190 {strides = array<i32>} : memref<1x8x32xf32, #tpu.memory_space<vmem>>, vector<1x8x8xf32>,
    %191 = vector.extract_strided_slice %3 {offsets = [0, 24], sizes = [8, 8], strides = [1, 1]} : vector<8x96xf32> to vector<8x8xf32>
    %192 = vector.extract_strided_slice %7 {offsets = [0, 24], sizes = [8, 8], strides = [1, 1]} : vector<8x96xf32> to vector<8x8xf32>
    %193 = vector.extract_strided_slice %3 {offsets = [0, 56], sizes = [8, 8], strides = [1, 1]} : vector<8x96xf32> to vector<8x8xf32>
    %194 = vector.extract_strided_slice %7 {offsets = [0, 56], sizes = [8, 8], strides = [1, 1]} : vector<8x96xf32> to vector<8x8xf32>
    %195 = vector.extract_strided_slice %3 {offsets = [0, 88], sizes = [8, 8], strides = [1, 1]} : vector<8x96xf32> to vector<8x8xf32>
    %196 = vector.extract_strided_slice %7 {offsets = [0, 88], sizes = [8, 8], strides = [1, 1]} : vector<8x96xf32> to vector<8x8xf32>
    %197 = tpu.transpose %193, [1, 0] : vector<8x8xf32> -> vector<8x8xf32>
    %cst_59 = arith.constant dense<0.000000e+00> : vector<8x8xf32>
    %198 = tpu.matmul %191, %197, %cst_59 {dimension_numbers = #tpu.dot_dimension_numbers<[1], [0], [0], [1], [0, 0, 1, 1], [], []>} : vector<8x8xf32>, vector<8x8xf32>, vector<8x8xf32> -> vector<8x8xf32>
    %cst_60 = arith.constant 0.176776692 : f32
    %199 = vector.broadcast %cst_60 : f32 to vector<8x8xf32>
    %200 = arith.mulf %198, %199 : vector<8x8xf32>
    %201 = arith.mulf %193, %193 : vector<8x8xf32>
    %202 = arith.addf %201, %194 : vector<8x8xf32>
    %203 = arith.truncf %202 : vector<8x8xf32> to vector<8x8xbf16>
    %204 = arith.truncf %192 : vector<8x8xf32> to vector<8x8xbf16>
    %205 = tpu.transpose %203, [1, 0] : vector<8x8xbf16> -> vector<8x8xbf16>
    %cst_61 = arith.constant dense<0.000000e+00> : vector<8x8xf32>
    %206 = tpu.matmul %204, %205, %cst_61 {dimension_numbers = #tpu.dot_dimension_numbers<[1], [0], [0], [1], [0, 0, 1, 1], [], []>} : vector<8x8xbf16>, vector<8x8xbf16>, vector<8x8xf32> -> vector<8x8xf32>
    %207 = arith.mulf %191, %191 : vector<8x8xf32>
    %208 = arith.truncf %207 : vector<8x8xf32> to vector<8x8xbf16>
    %209 = arith.truncf %194 : vector<8x8xf32> to vector<8x8xbf16>
    %210 = tpu.transpose %209, [1, 0] : vector<8x8xbf16> -> vector<8x8xbf16>
    %cst_62 = arith.constant dense<0.000000e+00> : vector<8x8xf32>
    %211 = tpu.matmul %208, %210, %cst_62 {dimension_numbers = #tpu.dot_dimension_numbers<[1], [0], [0], [1], [0, 0, 1, 1], [], []>} : vector<8x8xbf16>, vector<8x8xbf16>, vector<8x8xf32> -> vector<8x8xf32>
    %212 = arith.addf %206, %211 : vector<8x8xf32>
    %cst_63 = arith.constant 3.125000e-02 : f32
    %213 = vector.broadcast %cst_63 : f32 to vector<8x8xf32>
    %214 = arith.mulf %212, %213 : vector<8x8xf32>
    %cst_64 = arith.constant -1.000000e+30 : f32
    %215 = vector.broadcast %cst_64 : f32 to vector<8x8xf32>
    %216 = arith.select %10, %215, %200 : vector<8x8xi1>, vector<8x8xf32>
    %cst_65 = arith.constant dense<0xFF800000> : vector<8xf32>
    %217 = vector.multi_reduction <maximumf>, %216, %cst_65 [1] : vector<8x8xf32> to vector<8xf32>
    %218 = vector.shape_cast %217 : vector<8xf32> to vector<8x1xf32>
    %219 = vector.broadcast %218 : vector<8x1xf32> to vector<8x8xf32>
    %220 = arith.subf %216, %219 : vector<8x8xf32>
    %221 = math.exp %220 : vector<8x8xf32>
    %cst_66 = arith.constant dense<0.000000e+00> : vector<8xf32>
    %222 = vector.multi_reduction <add>, %221, %cst_66 [1] : vector<8x8xf32> to vector<8xf32>
    %223 = vector.shape_cast %222 : vector<8xf32> to vector<8x1xf32>
    %224 = tpu.reciprocal %223 {approx = true} : vector<8x1xf32> -> vector<8x1xf32>
    %225 = vector.broadcast %224 : vector<8x1xf32> to vector<8x8xf32>
    %226 = arith.mulf %221, %225 : vector<8x8xf32>
    %cst_67 = arith.constant 1.000000e+00 : f32
    %227 = vector.broadcast %cst_67 : f32 to vector<8x8xf32>
    %228 = arith.subf %227, %226 : vector<8x8xf32>
    %229 = arith.mulf %226, %228 : vector<8x8xf32>
    %230 = arith.mulf %229, %229 : vector<8x8xf32>
    %231 = arith.mulf %230, %214 : vector<8x8xf32>
    %cst_68 = arith.constant dense<0.000000e+00> : vector<8x8xf32>
    %232 = tpu.matmul %226, %195, %cst_68 {dimension_numbers = #tpu.dot_dimension_numbers<[1], [0], [0], [1], [0, 0, 1, 1], [], []>} : vector<8x8xf32>, vector<8x8xf32>, vector<8x8xf32> -> vector<8x8xf32>
    %233 = arith.mulf %195, %195 : vector<8x8xf32>
    %234 = arith.addf %233, %196 : vector<8x8xf32>
    %235 = arith.truncf %234 : vector<8x8xf32> to vector<8x8xbf16>
    %236 = arith.truncf %231 : vector<8x8xf32> to vector<8x8xbf16>
    %cst_69 = arith.constant dense<0.000000e+00> : vector<8x8xf32>
    %237 = tpu.matmul %236, %235, %cst_69 {dimension_numbers = #tpu.dot_dimension_numbers<[1], [0], [0], [1], [0, 0, 1, 1], [], []>} : vector<8x8xbf16>, vector<8x8xbf16>, vector<8x8xf32> -> vector<8x8xf32>
    %238 = arith.mulf %226, %226 : vector<8x8xf32>
    %239 = arith.truncf %238 : vector<8x8xf32> to vector<8x8xbf16>
    %240 = arith.truncf %196 : vector<8x8xf32> to vector<8x8xbf16>
    %cst_70 = arith.constant dense<0.000000e+00> : vector<8x8xf32>
    %241 = tpu.matmul %239, %240, %cst_70 {dimension_numbers = #tpu.dot_dimension_numbers<[1], [0], [0], [1], [0, 0, 1, 1], [], []>} : vector<8x8xbf16>, vector<8x8xbf16>, vector<8x8xf32> -> vector<8x8xf32>
    %242 = arith.addf %237, %241 : vector<8x8xf32>
    %243 = vector.extract_strided_slice %1 {offsets = [0, 24], sizes = [8, 8], strides = [1, 1]} : vector<8x32xf32> to vector<8x8xf32>
    %244 = arith.addf %243, %232 : vector<8x8xf32>
    %c0_71 = arith.constant 0 : index
    %c0_72 = arith.constant 0 : index
    %c24 = arith.constant 24 : index
    %245 = vector.load %arg4[%c0_71, %c0_72, %c24] : memref<1x8x32xf32, #tpu.memory_space<vmem>>, vector<1x8x8xf32>
    %246 = vector.shape_cast %245 : vector<1x8x8xf32> to vector<8x8xf32>
    %247 = vector.shape_cast %244 : vector<8x8xf32> to vector<1x8x8xf32>
    tpu.vector_store %arg4[%c0_71, %c0_72, %c24], %247 {strides = array<i32>} : memref<1x8x32xf32, #tpu.memory_space<vmem>>, vector<1x8x8xf32>,
    %c0_73 = arith.constant 0 : index
    %c0_74 = arith.constant 0 : index
    %c24_75 = arith.constant 24 : index
    %248 = vector.load %arg5[%c0_73, %c0_74, %c24_75] : memref<1x8x32xf32, #tpu.memory_space<vmem>>, vector<1x8x8xf32>
    %249 = vector.shape_cast %248 : vector<1x8x8xf32> to vector<8x8xf32>
    %250 = vector.shape_cast %242 : vector<8x8xf32> to vector<1x8x8xf32>
    tpu.vector_store %arg5[%c0_73, %c0_74, %c24_75], %250 {strides = array<i32>} : memref<1x8x32xf32, #tpu.memory_space<vmem>>, vector<1x8x8xf32>,
    return
  }
  func.func @transform_0(%arg0: i32) -> (i32, i32, i32) {
    %c0_i32 = arith.constant 0 : i32
    %c0_i32_0 = arith.constant 0 : i32
    %c0_i32_1 = arith.constant 0 : i32
    return %arg0, %c0_i32, %c0_i32_0 : i32, i32, i32
  }
  func.func @transform_1(%arg0: i32) -> (i32, i32) {
    %c0_i32 = arith.constant 0 : i32
    %c0_i32_0 = arith.constant 0 : i32
    %c0_i32_1 = arith.constant 0 : i32
    return %c0_i32, %c0_i32_0 : i32, i32
  }
  func.func @transform_2(%arg0: i32) -> (i32, i32) {
    %c0_i32 = arith.constant 0 : i32
    %c0_i32_0 = arith.constant 0 : i32
    %c0_i32_1 = arith.constant 0 : i32
    return %c0_i32, %c0_i32_0 : i32, i32
  }
  func.func @transform_3(%arg0: i32) -> (i32, i32, i32) {
    %c0_i32 = arith.constant 0 : i32
    %c0_i32_0 = arith.constant 0 : i32
    %c0_i32_1 = arith.constant 0 : i32
    return %arg0, %c0_i32, %c0_i32_0 : i32, i32, i32
  }
  func.func @transform_4(%arg0: i32) -> (i32, i32, i32) {
    %c0_i32 = arith.constant 0 : i32
    %c0_i32_0 = arith.constant 0 : i32
    %c0_i32_1 = arith.constant 0 : i32
    return %arg0, %c0_i32, %c0_i32_0 : i32, i32, i32
  }
}

module attributes {stable_mosaic.version = 11 : i64} {
  func.func @_ln_fc_relu_res_kernel(%arg0: i32, %arg1: memref<16x32xf32, #tpu.memory_space<vmem>>, %arg2: memref<16x32xf32, #tpu.memory_space<vmem>>, %arg3: memref<1x32xf32, #tpu.memory_space<vmem>>, %arg4: memref<1x32xf32, #tpu.memory_space<vmem>>, %arg5: memref<1x32xf32, #tpu.memory_space<vmem>>, %arg6: memref<1x32xf32, #tpu.memory_space<vmem>>, %arg7: memref<32x32xf32, #tpu.memory_space<vmem>>, %arg8: memref<64x32xbf16, #tpu.memory_space<vmem>>, %arg9: memref<1x32xf32, #tpu.memory_space<vmem>>, %arg10: memref<1x32xf32, #tpu.memory_space<vmem>>, %arg11: memref<16x32xf32, #tpu.memory_space<vmem>>, %arg12: memref<16x32xf32, #tpu.memory_space<vmem>>) attributes {dimension_semantics = [#tpu.dimension_semantics<parallel>], iteration_bounds = array<i64: 1>, scalar_prefetch = 0 : i64, scratch_operands = 0 : i64, tpu.core_type = #tpu.core_type<tc>, window_params = [{transform_indices = @transform_0, window_bounds = array<i64: 16, 32>}, {transform_indices = @transform_1, window_bounds = array<i64: 16, 32>}, {pipeline_mode = #tpu.pipeline_mode<synchronous>, transform_indices = @transform_2, window_bounds = array<i64: 1, 32>}, {pipeline_mode = #tpu.pipeline_mode<synchronous>, transform_indices = @transform_3, window_bounds = array<i64: 1, 32>}, {pipeline_mode = #tpu.pipeline_mode<synchronous>, transform_indices = @transform_4, window_bounds = array<i64: 1, 32>}, {pipeline_mode = #tpu.pipeline_mode<synchronous>, transform_indices = @transform_5, window_bounds = array<i64: 1, 32>}, {pipeline_mode = #tpu.pipeline_mode<synchronous>, transform_indices = @transform_6, window_bounds = array<i64: 32, 32>}, {pipeline_mode = #tpu.pipeline_mode<synchronous>, transform_indices = @transform_7, window_bounds = array<i64: 64, 32>}, {pipeline_mode = #tpu.pipeline_mode<synchronous>, transform_indices = @transform_8, window_bounds = array<i64: 1, 32>}, {pipeline_mode = #tpu.pipeline_mode<synchronous>, transform_indices = @transform_9, window_bounds = array<i64: 1, 32>}, {transform_indices = @transform_10, window_bounds = array<i64: 16, 32>}, {transform_indices = @transform_11, window_bounds = array<i64: 16, 32>}]} {
    %c0 = arith.constant 0 : index
    %c0_0 = arith.constant 0 : index
    %0 = vector.load %arg1[%c0, %c0_0] : memref<16x32xf32, #tpu.memory_space<vmem>>, vector<16x32xf32>
    %c0_1 = arith.constant 0 : index
    %c0_2 = arith.constant 0 : index
    %1 = vector.load %arg2[%c0_1, %c0_2] : memref<16x32xf32, #tpu.memory_space<vmem>>, vector<16x32xf32>
    %c0_3 = arith.constant 0 : index
    %c0_4 = arith.constant 0 : index
    %2 = vector.load %arg3[%c0_3, %c0_4] : memref<1x32xf32, #tpu.memory_space<vmem>>, vector<1x32xf32>
    %c0_5 = arith.constant 0 : index
    %c0_6 = arith.constant 0 : index
    %3 = vector.load %arg4[%c0_5, %c0_6] : memref<1x32xf32, #tpu.memory_space<vmem>>, vector<1x32xf32>
    %c0_7 = arith.constant 0 : index
    %c0_8 = arith.constant 0 : index
    %4 = vector.load %arg5[%c0_7, %c0_8] : memref<1x32xf32, #tpu.memory_space<vmem>>, vector<1x32xf32>
    %c0_9 = arith.constant 0 : index
    %c0_10 = arith.constant 0 : index
    %5 = vector.load %arg6[%c0_9, %c0_10] : memref<1x32xf32, #tpu.memory_space<vmem>>, vector<1x32xf32>
    %cst = arith.constant dense<0.000000e+00> : vector<16xf32>
    %6 = vector.multi_reduction <add>, %0, %cst [1] : vector<16x32xf32> to vector<16xf32>
    %7 = vector.shape_cast %6 : vector<16xf32> to vector<16x1xf32>
    %cst_11 = arith.constant 3.200000e+01 : f32
    %8 = vector.broadcast %cst_11 : f32 to vector<16x1xf32>
    %9 = arith.divf %7, %8 : vector<16x1xf32>
    %10 = arith.mulf %0, %0 : vector<16x32xf32>
    %cst_12 = arith.constant dense<0.000000e+00> : vector<16xf32>
    %11 = vector.multi_reduction <add>, %10, %cst_12 [1] : vector<16x32xf32> to vector<16xf32>
    %12 = vector.shape_cast %11 : vector<16xf32> to vector<16x1xf32>
    %cst_13 = arith.constant 3.200000e+01 : f32
    %13 = vector.broadcast %cst_13 : f32 to vector<16x1xf32>
    %14 = arith.divf %12, %13 : vector<16x1xf32>
    %15 = arith.mulf %9, %9 : vector<16x1xf32>
    %16 = arith.subf %14, %15 : vector<16x1xf32>
    %cst_14 = arith.constant 0.000000e+00 : f32
    %17 = vector.broadcast %cst_14 : f32 to vector<16x1xf32>
    %18 = arith.maximumf %16, %17 : vector<16x1xf32>
    %cst_15 = arith.constant 9.99999974E-6 : f32
    %19 = vector.broadcast %cst_15 : f32 to vector<16x1xf32>
    %20 = arith.addf %18, %19 : vector<16x1xf32>
    %21 = math.rsqrt %20 : vector<16x1xf32>
    %22 = vector.broadcast %9 : vector<16x1xf32> to vector<16x32xf32>
    %23 = arith.subf %0, %22 : vector<16x32xf32>
    %24 = vector.broadcast %21 : vector<16x1xf32> to vector<16x32xf32>
    %25 = arith.mulf %23, %24 : vector<16x32xf32>
    %26 = vector.broadcast %2 : vector<1x32xf32> to vector<16x32xf32>
    %27 = arith.mulf %26, %25 : vector<16x32xf32>
    %28 = vector.broadcast %4 : vector<1x32xf32> to vector<16x32xf32>
    %29 = arith.addf %27, %28 : vector<16x32xf32>
    %30 = arith.mulf %2, %2 : vector<1x32xf32>
    %31 = vector.broadcast %30 : vector<1x32xf32> to vector<16x32xf32>
    %32 = arith.mulf %31, %1 : vector<16x32xf32>
    %33 = arith.mulf %21, %21 : vector<16x1xf32>
    %34 = vector.broadcast %33 : vector<16x1xf32> to vector<16x32xf32>
    %35 = arith.mulf %32, %34 : vector<16x32xf32>
    %36 = arith.mulf %25, %25 : vector<16x32xf32>
    %37 = vector.broadcast %3 : vector<1x32xf32> to vector<16x32xf32>
    %38 = arith.mulf %37, %36 : vector<16x32xf32>
    %39 = arith.addf %35, %38 : vector<16x32xf32>
    %40 = vector.broadcast %5 : vector<1x32xf32> to vector<16x32xf32>
    %41 = arith.addf %39, %40 : vector<16x32xf32>
    %c0_16 = arith.constant 0 : index
    %c0_17 = arith.constant 0 : index
    %42 = vector.load %arg7[%c0_16, %c0_17] : memref<32x32xf32, #tpu.memory_space<vmem>>, vector<32x32xf32>
    %c0_18 = arith.constant 0 : index
    %c0_19 = arith.constant 0 : index
    %43 = vector.load %arg8[%c0_18, %c0_19] : memref<64x32xbf16, #tpu.memory_space<vmem>>, vector<64x32xbf16>
    %cst_20 = arith.constant dense<0.000000e+00> : vector<16x32xf32>
    %44 = tpu.matmul %29, %42, %cst_20 {dimension_numbers = #tpu.dot_dimension_numbers<[1], [0], [0], [1], [0, 0, 1, 1], [], []>} : vector<16x32xf32>, vector<32x32xf32>, vector<16x32xf32> -> vector<16x32xf32>
    %45 = arith.mulf %29, %29 : vector<16x32xf32>
    %46 = tpu.concatenate %41, %45 in 1 : vector<16x32xf32>, vector<16x32xf32> -> vector<16x64xf32>
    %47 = arith.truncf %46 : vector<16x64xf32> to vector<16x64xbf16>
    %cst_21 = arith.constant dense<0.000000e+00> : vector<16x32xf32>
    %48 = tpu.matmul %47, %43, %cst_21 {dimension_numbers = #tpu.dot_dimension_numbers<[1], [0], [0], [1], [0, 0, 1, 1], [], []>} : vector<16x64xbf16>, vector<64x32xbf16>, vector<16x32xf32> -> vector<16x32xf32>
    %c0_22 = arith.constant 0 : index
    %c0_23 = arith.constant 0 : index
    %49 = vector.load %arg9[%c0_22, %c0_23] : memref<1x32xf32, #tpu.memory_space<vmem>>, vector<1x32xf32>
    %50 = vector.broadcast %49 : vector<1x32xf32> to vector<16x32xf32>
    %51 = arith.addf %44, %50 : vector<16x32xf32>
    %c0_24 = arith.constant 0 : index
    %c0_25 = arith.constant 0 : index
    %52 = vector.load %arg10[%c0_24, %c0_25] : memref<1x32xf32, #tpu.memory_space<vmem>>, vector<1x32xf32>
    %53 = vector.broadcast %52 : vector<1x32xf32> to vector<16x32xf32>
    %54 = arith.addf %48, %53 : vector<16x32xf32>
    %cst_26 = arith.constant 0.000000e+00 : f32
    %55 = vector.broadcast %cst_26 : f32 to vector<16x32xf32>
    %56 = arith.cmpf ogt, %51, %55 : vector<16x32xf32>
    %57 = arith.extui %56 : vector<16x32xi1> to vector<16x32xi32>
    %58 = arith.sitofp %57 : vector<16x32xi32> to vector<16x32xf32>
    %59 = arith.mulf %51, %58 : vector<16x32xf32>
    %60 = arith.mulf %54, %58 : vector<16x32xf32>
    %61 = arith.addf %29, %59 : vector<16x32xf32>
    %62 = arith.addf %41, %60 : vector<16x32xf32>
    %c0_27 = arith.constant 0 : index
    %c0_28 = arith.constant 0 : index
    %63 = vector.load %arg11[%c0_27, %c0_28] : memref<16x32xf32, #tpu.memory_space<vmem>>, vector<16x32xf32>
    tpu.vector_store %arg11[%c0_27, %c0_28], %61 {strides = array<i32>} : memref<16x32xf32, #tpu.memory_space<vmem>>, vector<16x32xf32>,
    %c0_29 = arith.constant 0 : index
    %c0_30 = arith.constant 0 : index
    %64 = vector.load %arg12[%c0_29, %c0_30] : memref<16x32xf32, #tpu.memory_space<vmem>>, vector<16x32xf32>
    tpu.vector_store %arg12[%c0_29, %c0_30], %62 {strides = array<i32>} : memref<16x32xf32, #tpu.memory_space<vmem>>, vector<16x32xf32>,
    return
  }
  func.func @transform_0(%arg0: i32) -> (i32, i32) {
    %c0_i32 = arith.constant 0 : i32
    %c0_i32_0 = arith.constant 0 : i32
    return %arg0, %c0_i32 : i32, i32
  }
  func.func @transform_1(%arg0: i32) -> (i32, i32) {
    %c0_i32 = arith.constant 0 : i32
    %c0_i32_0 = arith.constant 0 : i32
    return %arg0, %c0_i32 : i32, i32
  }
  func.func @transform_2(%arg0: i32) -> (i32, i32) {
    %c0_i32 = arith.constant 0 : i32
    %c0_i32_0 = arith.constant 0 : i32
    %c0_i32_1 = arith.constant 0 : i32
    return %c0_i32, %c0_i32_0 : i32, i32
  }
  func.func @transform_3(%arg0: i32) -> (i32, i32) {
    %c0_i32 = arith.constant 0 : i32
    %c0_i32_0 = arith.constant 0 : i32
    %c0_i32_1 = arith.constant 0 : i32
    return %c0_i32, %c0_i32_0 : i32, i32
  }
  func.func @transform_4(%arg0: i32) -> (i32, i32) {
    %c0_i32 = arith.constant 0 : i32
    %c0_i32_0 = arith.constant 0 : i32
    %c0_i32_1 = arith.constant 0 : i32
    return %c0_i32, %c0_i32_0 : i32, i32
  }
  func.func @transform_5(%arg0: i32) -> (i32, i32) {
    %c0_i32 = arith.constant 0 : i32
    %c0_i32_0 = arith.constant 0 : i32
    %c0_i32_1 = arith.constant 0 : i32
    return %c0_i32, %c0_i32_0 : i32, i32
  }
  func.func @transform_6(%arg0: i32) -> (i32, i32) {
    %c0_i32 = arith.constant 0 : i32
    %c0_i32_0 = arith.constant 0 : i32
    %c0_i32_1 = arith.constant 0 : i32
    return %c0_i32, %c0_i32_0 : i32, i32
  }
  func.func @transform_7(%arg0: i32) -> (i32, i32) {
    %c0_i32 = arith.constant 0 : i32
    %c0_i32_0 = arith.constant 0 : i32
    %c0_i32_1 = arith.constant 0 : i32
    return %c0_i32, %c0_i32_0 : i32, i32
  }
  func.func @transform_8(%arg0: i32) -> (i32, i32) {
    %c0_i32 = arith.constant 0 : i32
    %c0_i32_0 = arith.constant 0 : i32
    %c0_i32_1 = arith.constant 0 : i32
    return %c0_i32, %c0_i32_0 : i32, i32
  }
  func.func @transform_9(%arg0: i32) -> (i32, i32) {
    %c0_i32 = arith.constant 0 : i32
    %c0_i32_0 = arith.constant 0 : i32
    %c0_i32_1 = arith.constant 0 : i32
    return %c0_i32, %c0_i32_0 : i32, i32
  }
  func.func @transform_10(%arg0: i32) -> (i32, i32) {
    %c0_i32 = arith.constant 0 : i32
    %c0_i32_0 = arith.constant 0 : i32
    return %arg0, %c0_i32 : i32, i32
  }
  func.func @transform_11(%arg0: i32) -> (i32, i32) {
    %c0_i32 = arith.constant 0 : i32
    %c0_i32_0 = arith.constant 0 : i32
    return %arg0, %c0_i32 : i32, i32
  }
}

module attributes {stable_mosaic.version = 11 : i64} {
  func.func @_cross_block_kernel(%arg0: i32, %arg1: memref<1x8x32xf32, #tpu.memory_space<vmem>>, %arg2: memref<1x8x32xf32, #tpu.memory_space<vmem>>, %arg3: memref<1x32xf32, #tpu.memory_space<vmem>>, %arg4: memref<1x32xf32, #tpu.memory_space<vmem>>, %arg5: memref<1x32xf32, #tpu.memory_space<vmem>>, %arg6: memref<1x32xf32, #tpu.memory_space<vmem>>, %arg7: memref<32x32xf32, #tpu.memory_space<vmem>>, %arg8: memref<64x32xbf16, #tpu.memory_space<vmem>>, %arg9: memref<1x4x8x8xf32, #tpu.memory_space<vmem>>, %arg10: memref<1x4x16x8xbf16, #tpu.memory_space<vmem>>, %arg11: memref<1x4x8x8xf32, #tpu.memory_space<vmem>>, %arg12: memref<1x4x16x8xbf16, #tpu.memory_space<vmem>>, %arg13: memref<1x8x32xf32, #tpu.memory_space<vmem>>, %arg14: memref<1x8x32xf32, #tpu.memory_space<vmem>>) attributes {dimension_semantics = [#tpu.dimension_semantics<parallel>], iteration_bounds = array<i64: 2>, scalar_prefetch = 0 : i64, scratch_operands = 0 : i64, tpu.core_type = #tpu.core_type<tc>, window_params = [{transform_indices = @transform_0, window_bounds = array<i64: 1, 8, 32>}, {transform_indices = @transform_1, window_bounds = array<i64: 1, 8, 32>}, {pipeline_mode = #tpu.pipeline_mode<synchronous>, transform_indices = @transform_2, window_bounds = array<i64: 1, 32>}, {pipeline_mode = #tpu.pipeline_mode<synchronous>, transform_indices = @transform_3, window_bounds = array<i64: 1, 32>}, {pipeline_mode = #tpu.pipeline_mode<synchronous>, transform_indices = @transform_4, window_bounds = array<i64: 1, 32>}, {pipeline_mode = #tpu.pipeline_mode<synchronous>, transform_indices = @transform_5, window_bounds = array<i64: 1, 32>}, {pipeline_mode = #tpu.pipeline_mode<synchronous>, transform_indices = @transform_6, window_bounds = array<i64: 32, 32>}, {pipeline_mode = #tpu.pipeline_mode<synchronous>, transform_indices = @transform_7, window_bounds = array<i64: 64, 32>}, {transform_indices = @transform_8, window_bounds = array<i64: 1, 4, 8, 8>}, {transform_indices = @transform_9, window_bounds = array<i64: 1, 4, 16, 8>}, {transform_indices = @transform_10, window_bounds = array<i64: 1, 4, 8, 8>}, {transform_indices = @transform_11, window_bounds = array<i64: 1, 4, 16, 8>}, {transform_indices = @transform_12, window_bounds = array<i64: 1, 8, 32>}, {transform_indices = @transform_13, window_bounds = array<i64: 1, 8, 32>}]} {
    %c0 = arith.constant 0 : index
    %c0_0 = arith.constant 0 : index
    %c0_1 = arith.constant 0 : index
    %0 = vector.load %arg1[%c0, %c0_0, %c0_1] : memref<1x8x32xf32, #tpu.memory_space<vmem>>, vector<1x8x32xf32>
    %1 = vector.shape_cast %0 : vector<1x8x32xf32> to vector<8x32xf32>
    %c0_2 = arith.constant 0 : index
    %c0_3 = arith.constant 0 : index
    %c0_4 = arith.constant 0 : index
    %2 = vector.load %arg2[%c0_2, %c0_3, %c0_4] : memref<1x8x32xf32, #tpu.memory_space<vmem>>, vector<1x8x32xf32>
    %3 = vector.shape_cast %2 : vector<1x8x32xf32> to vector<8x32xf32>
    %c0_5 = arith.constant 0 : index
    %c0_6 = arith.constant 0 : index
    %4 = vector.load %arg3[%c0_5, %c0_6] : memref<1x32xf32, #tpu.memory_space<vmem>>, vector<1x32xf32>
    %c0_7 = arith.constant 0 : index
    %c0_8 = arith.constant 0 : index
    %5 = vector.load %arg4[%c0_7, %c0_8] : memref<1x32xf32, #tpu.memory_space<vmem>>, vector<1x32xf32>
    %c0_9 = arith.constant 0 : index
    %c0_10 = arith.constant 0 : index
    %6 = vector.load %arg5[%c0_9, %c0_10] : memref<1x32xf32, #tpu.memory_space<vmem>>, vector<1x32xf32>
    %c0_11 = arith.constant 0 : index
    %c0_12 = arith.constant 0 : index
    %7 = vector.load %arg6[%c0_11, %c0_12] : memref<1x32xf32, #tpu.memory_space<vmem>>, vector<1x32xf32>
    %cst = arith.constant dense<0.000000e+00> : vector<8xf32>
    %8 = vector.multi_reduction <add>, %1, %cst [1] : vector<8x32xf32> to vector<8xf32>
    %9 = vector.shape_cast %8 : vector<8xf32> to vector<8x1xf32>
    %cst_13 = arith.constant 3.200000e+01 : f32
    %10 = vector.broadcast %cst_13 : f32 to vector<8x1xf32>
    %11 = arith.divf %9, %10 : vector<8x1xf32>
    %12 = arith.mulf %1, %1 : vector<8x32xf32>
    %cst_14 = arith.constant dense<0.000000e+00> : vector<8xf32>
    %13 = vector.multi_reduction <add>, %12, %cst_14 [1] : vector<8x32xf32> to vector<8xf32>
    %14 = vector.shape_cast %13 : vector<8xf32> to vector<8x1xf32>
    %cst_15 = arith.constant 3.200000e+01 : f32
    %15 = vector.broadcast %cst_15 : f32 to vector<8x1xf32>
    %16 = arith.divf %14, %15 : vector<8x1xf32>
    %17 = arith.mulf %11, %11 : vector<8x1xf32>
    %18 = arith.subf %16, %17 : vector<8x1xf32>
    %cst_16 = arith.constant 0.000000e+00 : f32
    %19 = vector.broadcast %cst_16 : f32 to vector<8x1xf32>
    %20 = arith.maximumf %18, %19 : vector<8x1xf32>
    %cst_17 = arith.constant 9.99999974E-6 : f32
    %21 = vector.broadcast %cst_17 : f32 to vector<8x1xf32>
    %22 = arith.addf %20, %21 : vector<8x1xf32>
    %23 = math.rsqrt %22 : vector<8x1xf32>
    %24 = vector.broadcast %11 : vector<8x1xf32> to vector<8x32xf32>
    %25 = arith.subf %1, %24 : vector<8x32xf32>
    %26 = vector.broadcast %23 : vector<8x1xf32> to vector<8x32xf32>
    %27 = arith.mulf %25, %26 : vector<8x32xf32>
    %28 = vector.broadcast %4 : vector<1x32xf32> to vector<8x32xf32>
    %29 = arith.mulf %28, %27 : vector<8x32xf32>
    %30 = vector.broadcast %6 : vector<1x32xf32> to vector<8x32xf32>
    %31 = arith.addf %29, %30 : vector<8x32xf32>
    %32 = arith.mulf %4, %4 : vector<1x32xf32>
    %33 = vector.broadcast %32 : vector<1x32xf32> to vector<8x32xf32>
    %34 = arith.mulf %33, %3 : vector<8x32xf32>
    %35 = arith.mulf %23, %23 : vector<8x1xf32>
    %36 = vector.broadcast %35 : vector<8x1xf32> to vector<8x32xf32>
    %37 = arith.mulf %34, %36 : vector<8x32xf32>
    %38 = arith.mulf %27, %27 : vector<8x32xf32>
    %39 = vector.broadcast %5 : vector<1x32xf32> to vector<8x32xf32>
    %40 = arith.mulf %39, %38 : vector<8x32xf32>
    %41 = arith.addf %37, %40 : vector<8x32xf32>
    %42 = vector.broadcast %7 : vector<1x32xf32> to vector<8x32xf32>
    %43 = arith.addf %41, %42 : vector<8x32xf32>
    %c0_18 = arith.constant 0 : index
    %c0_19 = arith.constant 0 : index
    %44 = vector.load %arg7[%c0_18, %c0_19] : memref<32x32xf32, #tpu.memory_space<vmem>>, vector<32x32xf32>
    %c0_20 = arith.constant 0 : index
    %c0_21 = arith.constant 0 : index
    %45 = vector.load %arg8[%c0_20, %c0_21] : memref<64x32xbf16, #tpu.memory_space<vmem>>, vector<64x32xbf16>
    %cst_22 = arith.constant dense<0.000000e+00> : vector<8x32xf32>
    %46 = tpu.matmul %31, %44, %cst_22 {dimension_numbers = #tpu.dot_dimension_numbers<[1], [0], [0], [1], [0, 0, 1, 1], [], []>} : vector<8x32xf32>, vector<32x32xf32>, vector<8x32xf32> -> vector<8x32xf32>
    %47 = arith.mulf %31, %31 : vector<8x32xf32>
    %48 = tpu.concatenate %43, %47 in 1 : vector<8x32xf32>, vector<8x32xf32> -> vector<8x64xf32>
    %49 = arith.truncf %48 : vector<8x64xf32> to vector<8x64xbf16>
    %cst_23 = arith.constant dense<0.000000e+00> : vector<8x32xf32>
    %50 = tpu.matmul %49, %45, %cst_23 {dimension_numbers = #tpu.dot_dimension_numbers<[1], [0], [0], [1], [0, 0, 1, 1], [], []>} : vector<8x64xbf16>, vector<64x32xbf16>, vector<8x32xf32> -> vector<8x32xf32>
    %51 = tpu.iota {dimensions = array<i32: 0>} : vector<8x8xi32>
    %52 = tpu.iota {dimensions = array<i32: 1>} : vector<8x8xi32>
    %53 = arith.cmpi sgt, %52, %51 : vector<8x8xi32>
    %54 = vector.extract_strided_slice %46 {offsets = [0, 0], sizes = [8, 8], strides = [1, 1]} : vector<8x32xf32> to vector<8x8xf32>
    %55 = vector.extract_strided_slice %50 {offsets = [0, 0], sizes = [8, 8], strides = [1, 1]} : vector<8x32xf32> to vector<8x8xf32>
    %c0_24 = arith.constant 0 : index
    %c0_25 = arith.constant 0 : index
    %c0_26 = arith.constant 0 : index
    %c0_27 = arith.constant 0 : index
    %56 = vector.load %arg9[%c0_24, %c0_25, %c0_26, %c0_27] : memref<1x4x8x8xf32, #tpu.memory_space<vmem>>, vector<1x1x8x8xf32>
    %57 = vector.shape_cast %56 : vector<1x1x8x8xf32> to vector<8x8xf32>
    %cst_28 = arith.constant dense<0.000000e+00> : vector<8x8xf32>
    %58 = tpu.matmul %54, %57, %cst_28 {dimension_numbers = #tpu.dot_dimension_numbers<[1], [0], [0], [1], [0, 0, 1, 1], [], []>} : vector<8x8xf32>, vector<8x8xf32>, vector<8x8xf32> -> vector<8x8xf32>
    %cst_29 = arith.constant 0.176776692 : f32
    %59 = vector.broadcast %cst_29 : f32 to vector<8x8xf32>
    %60 = arith.mulf %58, %59 : vector<8x8xf32>
    %61 = arith.mulf %54, %54 : vector<8x8xf32>
    %62 = tpu.concatenate %55, %61 in 1 : vector<8x8xf32>, vector<8x8xf32> -> vector<8x16xf32>
    %63 = arith.truncf %62 : vector<8x16xf32> to vector<8x16xbf16>
    %c0_30 = arith.constant 0 : index
    %c0_31 = arith.constant 0 : index
    %c0_32 = arith.constant 0 : index
    %c0_33 = arith.constant 0 : index
    %64 = vector.load %arg10[%c0_30, %c0_31, %c0_32, %c0_33] : memref<1x4x16x8xbf16, #tpu.memory_space<vmem>>, vector<1x1x16x8xbf16>
    %65 = vector.shape_cast %64 : vector<1x1x16x8xbf16> to vector<16x8xbf16>
    %cst_34 = arith.constant dense<0.000000e+00> : vector<8x8xf32>
    %66 = tpu.matmul %63, %65, %cst_34 {dimension_numbers = #tpu.dot_dimension_numbers<[1], [0], [0], [1], [0, 0, 1, 1], [], []>} : vector<8x16xbf16>, vector<16x8xbf16>, vector<8x8xf32> -> vector<8x8xf32>
    %cst_35 = arith.constant 3.125000e-02 : f32
    %67 = vector.broadcast %cst_35 : f32 to vector<8x8xf32>
    %68 = arith.mulf %66, %67 : vector<8x8xf32>
    %cst_36 = arith.constant -1.000000e+30 : f32
    %69 = vector.broadcast %cst_36 : f32 to vector<8x8xf32>
    %70 = arith.select %53, %69, %60 : vector<8x8xi1>, vector<8x8xf32>
    %cst_37 = arith.constant dense<0xFF800000> : vector<8xf32>
    %71 = vector.multi_reduction <maximumf>, %70, %cst_37 [1] : vector<8x8xf32> to vector<8xf32>
    %72 = vector.shape_cast %71 : vector<8xf32> to vector<8x1xf32>
    %73 = vector.broadcast %72 : vector<8x1xf32> to vector<8x8xf32>
    %74 = arith.subf %70, %73 : vector<8x8xf32>
    %75 = math.exp %74 : vector<8x8xf32>
    %cst_38 = arith.constant dense<0.000000e+00> : vector<8xf32>
    %76 = vector.multi_reduction <add>, %75, %cst_38 [1] : vector<8x8xf32> to vector<8xf32>
    %77 = vector.shape_cast %76 : vector<8xf32> to vector<8x1xf32>
    %78 = tpu.reciprocal %77 {approx = true} : vector<8x1xf32> -> vector<8x1xf32>
    %79 = vector.broadcast %78 : vector<8x1xf32> to vector<8x8xf32>
    %80 = arith.mulf %75, %79 : vector<8x8xf32>
    %cst_39 = arith.constant 1.000000e+00 : f32
    %81 = vector.broadcast %cst_39 : f32 to vector<8x8xf32>
    %82 = arith.subf %81, %80 : vector<8x8xf32>
    %83 = arith.mulf %80, %82 : vector<8x8xf32>
    %84 = arith.mulf %83, %83 : vector<8x8xf32>
    %85 = arith.mulf %84, %68 : vector<8x8xf32>
    %c0_40 = arith.constant 0 : index
    %c0_41 = arith.constant 0 : index
    %c0_42 = arith.constant 0 : index
    %c0_43 = arith.constant 0 : index
    %86 = vector.load %arg11[%c0_40, %c0_41, %c0_42, %c0_43] : memref<1x4x8x8xf32, #tpu.memory_space<vmem>>, vector<1x1x8x8xf32>
    %87 = vector.shape_cast %86 : vector<1x1x8x8xf32> to vector<8x8xf32>
    %cst_44 = arith.constant dense<0.000000e+00> : vector<8x8xf32>
    %88 = tpu.matmul %80, %87, %cst_44 {dimension_numbers = #tpu.dot_dimension_numbers<[1], [0], [0], [1], [0, 0, 1, 1], [], []>} : vector<8x8xf32>, vector<8x8xf32>, vector<8x8xf32> -> vector<8x8xf32>
    %89 = arith.mulf %80, %80 : vector<8x8xf32>
    %90 = tpu.concatenate %85, %89 in 1 : vector<8x8xf32>, vector<8x8xf32> -> vector<8x16xf32>
    %91 = arith.truncf %90 : vector<8x16xf32> to vector<8x16xbf16>
    %c0_45 = arith.constant 0 : index
    %c0_46 = arith.constant 0 : index
    %c0_47 = arith.constant 0 : index
    %c0_48 = arith.constant 0 : index
    %92 = vector.load %arg12[%c0_45, %c0_46, %c0_47, %c0_48] : memref<1x4x16x8xbf16, #tpu.memory_space<vmem>>, vector<1x1x16x8xbf16>
    %93 = vector.shape_cast %92 : vector<1x1x16x8xbf16> to vector<16x8xbf16>
    %cst_49 = arith.constant dense<0.000000e+00> : vector<8x8xf32>
    %94 = tpu.matmul %91, %93, %cst_49 {dimension_numbers = #tpu.dot_dimension_numbers<[1], [0], [0], [1], [0, 0, 1, 1], [], []>} : vector<8x16xbf16>, vector<16x8xbf16>, vector<8x8xf32> -> vector<8x8xf32>
    %95 = vector.extract_strided_slice %31 {offsets = [0, 0], sizes = [8, 8], strides = [1, 1]} : vector<8x32xf32> to vector<8x8xf32>
    %96 = arith.addf %95, %88 : vector<8x8xf32>
    %c0_50 = arith.constant 0 : index
    %c0_51 = arith.constant 0 : index
    %c0_52 = arith.constant 0 : index
    %97 = vector.load %arg13[%c0_50, %c0_51, %c0_52] : memref<1x8x32xf32, #tpu.memory_space<vmem>>, vector<1x8x8xf32>
    %98 = vector.shape_cast %97 : vector<1x8x8xf32> to vector<8x8xf32>
    %99 = vector.shape_cast %96 : vector<8x8xf32> to vector<1x8x8xf32>
    tpu.vector_store %arg13[%c0_50, %c0_51, %c0_52], %99 {strides = array<i32>} : memref<1x8x32xf32, #tpu.memory_space<vmem>>, vector<1x8x8xf32>,
    %100 = vector.extract_strided_slice %43 {offsets = [0, 0], sizes = [8, 8], strides = [1, 1]} : vector<8x32xf32> to vector<8x8xf32>
    %101 = arith.addf %100, %94 : vector<8x8xf32>
    %c0_53 = arith.constant 0 : index
    %c0_54 = arith.constant 0 : index
    %c0_55 = arith.constant 0 : index
    %102 = vector.load %arg14[%c0_53, %c0_54, %c0_55] : memref<1x8x32xf32, #tpu.memory_space<vmem>>, vector<1x8x8xf32>
    %103 = vector.shape_cast %102 : vector<1x8x8xf32> to vector<8x8xf32>
    %104 = vector.shape_cast %101 : vector<8x8xf32> to vector<1x8x8xf32>
    tpu.vector_store %arg14[%c0_53, %c0_54, %c0_55], %104 {strides = array<i32>} : memref<1x8x32xf32, #tpu.memory_space<vmem>>, vector<1x8x8xf32>,
    %105 = vector.extract_strided_slice %46 {offsets = [0, 8], sizes = [8, 8], strides = [1, 1]} : vector<8x32xf32> to vector<8x8xf32>
    %106 = vector.extract_strided_slice %50 {offsets = [0, 8], sizes = [8, 8], strides = [1, 1]} : vector<8x32xf32> to vector<8x8xf32>
    %c0_56 = arith.constant 0 : index
    %c1 = arith.constant 1 : index
    %c0_57 = arith.constant 0 : index
    %c0_58 = arith.constant 0 : index
    %107 = vector.load %arg9[%c0_56, %c1, %c0_57, %c0_58] : memref<1x4x8x8xf32, #tpu.memory_space<vmem>>, vector<1x1x8x8xf32>
    %108 = vector.shape_cast %107 : vector<1x1x8x8xf32> to vector<8x8xf32>
    %cst_59 = arith.constant dense<0.000000e+00> : vector<8x8xf32>
    %109 = tpu.matmul %105, %108, %cst_59 {dimension_numbers = #tpu.dot_dimension_numbers<[1], [0], [0], [1], [0, 0, 1, 1], [], []>} : vector<8x8xf32>, vector<8x8xf32>, vector<8x8xf32> -> vector<8x8xf32>
    %cst_60 = arith.constant 0.176776692 : f32
    %110 = vector.broadcast %cst_60 : f32 to vector<8x8xf32>
    %111 = arith.mulf %109, %110 : vector<8x8xf32>
    %112 = arith.mulf %105, %105 : vector<8x8xf32>
    %113 = tpu.concatenate %106, %112 in 1 : vector<8x8xf32>, vector<8x8xf32> -> vector<8x16xf32>
    %114 = arith.truncf %113 : vector<8x16xf32> to vector<8x16xbf16>
    %c0_61 = arith.constant 0 : index
    %c1_62 = arith.constant 1 : index
    %c0_63 = arith.constant 0 : index
    %c0_64 = arith.constant 0 : index
    %115 = vector.load %arg10[%c0_61, %c1_62, %c0_63, %c0_64] : memref<1x4x16x8xbf16, #tpu.memory_space<vmem>>, vector<1x1x16x8xbf16>
    %116 = vector.shape_cast %115 : vector<1x1x16x8xbf16> to vector<16x8xbf16>
    %cst_65 = arith.constant dense<0.000000e+00> : vector<8x8xf32>
    %117 = tpu.matmul %114, %116, %cst_65 {dimension_numbers = #tpu.dot_dimension_numbers<[1], [0], [0], [1], [0, 0, 1, 1], [], []>} : vector<8x16xbf16>, vector<16x8xbf16>, vector<8x8xf32> -> vector<8x8xf32>
    %cst_66 = arith.constant 3.125000e-02 : f32
    %118 = vector.broadcast %cst_66 : f32 to vector<8x8xf32>
    %119 = arith.mulf %117, %118 : vector<8x8xf32>
    %cst_67 = arith.constant -1.000000e+30 : f32
    %120 = vector.broadcast %cst_67 : f32 to vector<8x8xf32>
    %121 = arith.select %53, %120, %111 : vector<8x8xi1>, vector<8x8xf32>
    %cst_68 = arith.constant dense<0xFF800000> : vector<8xf32>
    %122 = vector.multi_reduction <maximumf>, %121, %cst_68 [1] : vector<8x8xf32> to vector<8xf32>
    %123 = vector.shape_cast %122 : vector<8xf32> to vector<8x1xf32>
    %124 = vector.broadcast %123 : vector<8x1xf32> to vector<8x8xf32>
    %125 = arith.subf %121, %124 : vector<8x8xf32>
    %126 = math.exp %125 : vector<8x8xf32>
    %cst_69 = arith.constant dense<0.000000e+00> : vector<8xf32>
    %127 = vector.multi_reduction <add>, %126, %cst_69 [1] : vector<8x8xf32> to vector<8xf32>
    %128 = vector.shape_cast %127 : vector<8xf32> to vector<8x1xf32>
    %129 = tpu.reciprocal %128 {approx = true} : vector<8x1xf32> -> vector<8x1xf32>
    %130 = vector.broadcast %129 : vector<8x1xf32> to vector<8x8xf32>
    %131 = arith.mulf %126, %130 : vector<8x8xf32>
    %cst_70 = arith.constant 1.000000e+00 : f32
    %132 = vector.broadcast %cst_70 : f32 to vector<8x8xf32>
    %133 = arith.subf %132, %131 : vector<8x8xf32>
    %134 = arith.mulf %131, %133 : vector<8x8xf32>
    %135 = arith.mulf %134, %134 : vector<8x8xf32>
    %136 = arith.mulf %135, %119 : vector<8x8xf32>
    %c0_71 = arith.constant 0 : index
    %c1_72 = arith.constant 1 : index
    %c0_73 = arith.constant 0 : index
    %c0_74 = arith.constant 0 : index
    %137 = vector.load %arg11[%c0_71, %c1_72, %c0_73, %c0_74] : memref<1x4x8x8xf32, #tpu.memory_space<vmem>>, vector<1x1x8x8xf32>
    %138 = vector.shape_cast %137 : vector<1x1x8x8xf32> to vector<8x8xf32>
    %cst_75 = arith.constant dense<0.000000e+00> : vector<8x8xf32>
    %139 = tpu.matmul %131, %138, %cst_75 {dimension_numbers = #tpu.dot_dimension_numbers<[1], [0], [0], [1], [0, 0, 1, 1], [], []>} : vector<8x8xf32>, vector<8x8xf32>, vector<8x8xf32> -> vector<8x8xf32>
    %140 = arith.mulf %131, %131 : vector<8x8xf32>
    %141 = tpu.concatenate %136, %140 in 1 : vector<8x8xf32>, vector<8x8xf32> -> vector<8x16xf32>
    %142 = arith.truncf %141 : vector<8x16xf32> to vector<8x16xbf16>
    %c0_76 = arith.constant 0 : index
    %c1_77 = arith.constant 1 : index
    %c0_78 = arith.constant 0 : index
    %c0_79 = arith.constant 0 : index
    %143 = vector.load %arg12[%c0_76, %c1_77, %c0_78, %c0_79] : memref<1x4x16x8xbf16, #tpu.memory_space<vmem>>, vector<1x1x16x8xbf16>
    %144 = vector.shape_cast %143 : vector<1x1x16x8xbf16> to vector<16x8xbf16>
    %cst_80 = arith.constant dense<0.000000e+00> : vector<8x8xf32>
    %145 = tpu.matmul %142, %144, %cst_80 {dimension_numbers = #tpu.dot_dimension_numbers<[1], [0], [0], [1], [0, 0, 1, 1], [], []>} : vector<8x16xbf16>, vector<16x8xbf16>, vector<8x8xf32> -> vector<8x8xf32>
    %146 = vector.extract_strided_slice %31 {offsets = [0, 8], sizes = [8, 8], strides = [1, 1]} : vector<8x32xf32> to vector<8x8xf32>
    %147 = arith.addf %146, %139 : vector<8x8xf32>
    %c0_81 = arith.constant 0 : index
    %c0_82 = arith.constant 0 : index
    %c8 = arith.constant 8 : index
    %148 = vector.load %arg13[%c0_81, %c0_82, %c8] : memref<1x8x32xf32, #tpu.memory_space<vmem>>, vector<1x8x8xf32>
    %149 = vector.shape_cast %148 : vector<1x8x8xf32> to vector<8x8xf32>
    %150 = vector.shape_cast %147 : vector<8x8xf32> to vector<1x8x8xf32>
    tpu.vector_store %arg13[%c0_81, %c0_82, %c8], %150 {strides = array<i32>} : memref<1x8x32xf32, #tpu.memory_space<vmem>>, vector<1x8x8xf32>,
    %151 = vector.extract_strided_slice %43 {offsets = [0, 8], sizes = [8, 8], strides = [1, 1]} : vector<8x32xf32> to vector<8x8xf32>
    %152 = arith.addf %151, %145 : vector<8x8xf32>
    %c0_83 = arith.constant 0 : index
    %c0_84 = arith.constant 0 : index
    %c8_85 = arith.constant 8 : index
    %153 = vector.load %arg14[%c0_83, %c0_84, %c8_85] : memref<1x8x32xf32, #tpu.memory_space<vmem>>, vector<1x8x8xf32>
    %154 = vector.shape_cast %153 : vector<1x8x8xf32> to vector<8x8xf32>
    %155 = vector.shape_cast %152 : vector<8x8xf32> to vector<1x8x8xf32>
    tpu.vector_store %arg14[%c0_83, %c0_84, %c8_85], %155 {strides = array<i32>} : memref<1x8x32xf32, #tpu.memory_space<vmem>>, vector<1x8x8xf32>,
    %156 = vector.extract_strided_slice %46 {offsets = [0, 16], sizes = [8, 8], strides = [1, 1]} : vector<8x32xf32> to vector<8x8xf32>
    %157 = vector.extract_strided_slice %50 {offsets = [0, 16], sizes = [8, 8], strides = [1, 1]} : vector<8x32xf32> to vector<8x8xf32>
    %c0_86 = arith.constant 0 : index
    %c2 = arith.constant 2 : index
    %c0_87 = arith.constant 0 : index
    %c0_88 = arith.constant 0 : index
    %158 = vector.load %arg9[%c0_86, %c2, %c0_87, %c0_88] : memref<1x4x8x8xf32, #tpu.memory_space<vmem>>, vector<1x1x8x8xf32>
    %159 = vector.shape_cast %158 : vector<1x1x8x8xf32> to vector<8x8xf32>
    %cst_89 = arith.constant dense<0.000000e+00> : vector<8x8xf32>
    %160 = tpu.matmul %156, %159, %cst_89 {dimension_numbers = #tpu.dot_dimension_numbers<[1], [0], [0], [1], [0, 0, 1, 1], [], []>} : vector<8x8xf32>, vector<8x8xf32>, vector<8x8xf32> -> vector<8x8xf32>
    %cst_90 = arith.constant 0.176776692 : f32
    %161 = vector.broadcast %cst_90 : f32 to vector<8x8xf32>
    %162 = arith.mulf %160, %161 : vector<8x8xf32>
    %163 = arith.mulf %156, %156 : vector<8x8xf32>
    %164 = tpu.concatenate %157, %163 in 1 : vector<8x8xf32>, vector<8x8xf32> -> vector<8x16xf32>
    %165 = arith.truncf %164 : vector<8x16xf32> to vector<8x16xbf16>
    %c0_91 = arith.constant 0 : index
    %c2_92 = arith.constant 2 : index
    %c0_93 = arith.constant 0 : index
    %c0_94 = arith.constant 0 : index
    %166 = vector.load %arg10[%c0_91, %c2_92, %c0_93, %c0_94] : memref<1x4x16x8xbf16, #tpu.memory_space<vmem>>, vector<1x1x16x8xbf16>
    %167 = vector.shape_cast %166 : vector<1x1x16x8xbf16> to vector<16x8xbf16>
    %cst_95 = arith.constant dense<0.000000e+00> : vector<8x8xf32>
    %168 = tpu.matmul %165, %167, %cst_95 {dimension_numbers = #tpu.dot_dimension_numbers<[1], [0], [0], [1], [0, 0, 1, 1], [], []>} : vector<8x16xbf16>, vector<16x8xbf16>, vector<8x8xf32> -> vector<8x8xf32>
    %cst_96 = arith.constant 3.125000e-02 : f32
    %169 = vector.broadcast %cst_96 : f32 to vector<8x8xf32>
    %170 = arith.mulf %168, %169 : vector<8x8xf32>
    %cst_97 = arith.constant -1.000000e+30 : f32
    %171 = vector.broadcast %cst_97 : f32 to vector<8x8xf32>
    %172 = arith.select %53, %171, %162 : vector<8x8xi1>, vector<8x8xf32>
    %cst_98 = arith.constant dense<0xFF800000> : vector<8xf32>
    %173 = vector.multi_reduction <maximumf>, %172, %cst_98 [1] : vector<8x8xf32> to vector<8xf32>
    %174 = vector.shape_cast %173 : vector<8xf32> to vector<8x1xf32>
    %175 = vector.broadcast %174 : vector<8x1xf32> to vector<8x8xf32>
    %176 = arith.subf %172, %175 : vector<8x8xf32>
    %177 = math.exp %176 : vector<8x8xf32>
    %cst_99 = arith.constant dense<0.000000e+00> : vector<8xf32>
    %178 = vector.multi_reduction <add>, %177, %cst_99 [1] : vector<8x8xf32> to vector<8xf32>
    %179 = vector.shape_cast %178 : vector<8xf32> to vector<8x1xf32>
    %180 = tpu.reciprocal %179 {approx = true} : vector<8x1xf32> -> vector<8x1xf32>
    %181 = vector.broadcast %180 : vector<8x1xf32> to vector<8x8xf32>
    %182 = arith.mulf %177, %181 : vector<8x8xf32>
    %cst_100 = arith.constant 1.000000e+00 : f32
    %183 = vector.broadcast %cst_100 : f32 to vector<8x8xf32>
    %184 = arith.subf %183, %182 : vector<8x8xf32>
    %185 = arith.mulf %182, %184 : vector<8x8xf32>
    %186 = arith.mulf %185, %185 : vector<8x8xf32>
    %187 = arith.mulf %186, %170 : vector<8x8xf32>
    %c0_101 = arith.constant 0 : index
    %c2_102 = arith.constant 2 : index
    %c0_103 = arith.constant 0 : index
    %c0_104 = arith.constant 0 : index
    %188 = vector.load %arg11[%c0_101, %c2_102, %c0_103, %c0_104] : memref<1x4x8x8xf32, #tpu.memory_space<vmem>>, vector<1x1x8x8xf32>
    %189 = vector.shape_cast %188 : vector<1x1x8x8xf32> to vector<8x8xf32>
    %cst_105 = arith.constant dense<0.000000e+00> : vector<8x8xf32>
    %190 = tpu.matmul %182, %189, %cst_105 {dimension_numbers = #tpu.dot_dimension_numbers<[1], [0], [0], [1], [0, 0, 1, 1], [], []>} : vector<8x8xf32>, vector<8x8xf32>, vector<8x8xf32> -> vector<8x8xf32>
    %191 = arith.mulf %182, %182 : vector<8x8xf32>
    %192 = tpu.concatenate %187, %191 in 1 : vector<8x8xf32>, vector<8x8xf32> -> vector<8x16xf32>
    %193 = arith.truncf %192 : vector<8x16xf32> to vector<8x16xbf16>
    %c0_106 = arith.constant 0 : index
    %c2_107 = arith.constant 2 : index
    %c0_108 = arith.constant 0 : index
    %c0_109 = arith.constant 0 : index
    %194 = vector.load %arg12[%c0_106, %c2_107, %c0_108, %c0_109] : memref<1x4x16x8xbf16, #tpu.memory_space<vmem>>, vector<1x1x16x8xbf16>
    %195 = vector.shape_cast %194 : vector<1x1x16x8xbf16> to vector<16x8xbf16>
    %cst_110 = arith.constant dense<0.000000e+00> : vector<8x8xf32>
    %196 = tpu.matmul %193, %195, %cst_110 {dimension_numbers = #tpu.dot_dimension_numbers<[1], [0], [0], [1], [0, 0, 1, 1], [], []>} : vector<8x16xbf16>, vector<16x8xbf16>, vector<8x8xf32> -> vector<8x8xf32>
    %197 = vector.extract_strided_slice %31 {offsets = [0, 16], sizes = [8, 8], strides = [1, 1]} : vector<8x32xf32> to vector<8x8xf32>
    %198 = arith.addf %197, %190 : vector<8x8xf32>
    %c0_111 = arith.constant 0 : index
    %c0_112 = arith.constant 0 : index
    %c16 = arith.constant 16 : index
    %199 = vector.load %arg13[%c0_111, %c0_112, %c16] : memref<1x8x32xf32, #tpu.memory_space<vmem>>, vector<1x8x8xf32>
    %200 = vector.shape_cast %199 : vector<1x8x8xf32> to vector<8x8xf32>
    %201 = vector.shape_cast %198 : vector<8x8xf32> to vector<1x8x8xf32>
    tpu.vector_store %arg13[%c0_111, %c0_112, %c16], %201 {strides = array<i32>} : memref<1x8x32xf32, #tpu.memory_space<vmem>>, vector<1x8x8xf32>,
    %202 = vector.extract_strided_slice %43 {offsets = [0, 16], sizes = [8, 8], strides = [1, 1]} : vector<8x32xf32> to vector<8x8xf32>
    %203 = arith.addf %202, %196 : vector<8x8xf32>
    %c0_113 = arith.constant 0 : index
    %c0_114 = arith.constant 0 : index
    %c16_115 = arith.constant 16 : index
    %204 = vector.load %arg14[%c0_113, %c0_114, %c16_115] : memref<1x8x32xf32, #tpu.memory_space<vmem>>, vector<1x8x8xf32>
    %205 = vector.shape_cast %204 : vector<1x8x8xf32> to vector<8x8xf32>
    %206 = vector.shape_cast %203 : vector<8x8xf32> to vector<1x8x8xf32>
    tpu.vector_store %arg14[%c0_113, %c0_114, %c16_115], %206 {strides = array<i32>} : memref<1x8x32xf32, #tpu.memory_space<vmem>>, vector<1x8x8xf32>,
    %207 = vector.extract_strided_slice %46 {offsets = [0, 24], sizes = [8, 8], strides = [1, 1]} : vector<8x32xf32> to vector<8x8xf32>
    %208 = vector.extract_strided_slice %50 {offsets = [0, 24], sizes = [8, 8], strides = [1, 1]} : vector<8x32xf32> to vector<8x8xf32>
    %c0_116 = arith.constant 0 : index
    %c3 = arith.constant 3 : index
    %c0_117 = arith.constant 0 : index
    %c0_118 = arith.constant 0 : index
    %209 = vector.load %arg9[%c0_116, %c3, %c0_117, %c0_118] : memref<1x4x8x8xf32, #tpu.memory_space<vmem>>, vector<1x1x8x8xf32>
    %210 = vector.shape_cast %209 : vector<1x1x8x8xf32> to vector<8x8xf32>
    %cst_119 = arith.constant dense<0.000000e+00> : vector<8x8xf32>
    %211 = tpu.matmul %207, %210, %cst_119 {dimension_numbers = #tpu.dot_dimension_numbers<[1], [0], [0], [1], [0, 0, 1, 1], [], []>} : vector<8x8xf32>, vector<8x8xf32>, vector<8x8xf32> -> vector<8x8xf32>
    %cst_120 = arith.constant 0.176776692 : f32
    %212 = vector.broadcast %cst_120 : f32 to vector<8x8xf32>
    %213 = arith.mulf %211, %212 : vector<8x8xf32>
    %214 = arith.mulf %207, %207 : vector<8x8xf32>
    %215 = tpu.concatenate %208, %214 in 1 : vector<8x8xf32>, vector<8x8xf32> -> vector<8x16xf32>
    %216 = arith.truncf %215 : vector<8x16xf32> to vector<8x16xbf16>
    %c0_121 = arith.constant 0 : index
    %c3_122 = arith.constant 3 : index
    %c0_123 = arith.constant 0 : index
    %c0_124 = arith.constant 0 : index
    %217 = vector.load %arg10[%c0_121, %c3_122, %c0_123, %c0_124] : memref<1x4x16x8xbf16, #tpu.memory_space<vmem>>, vector<1x1x16x8xbf16>
    %218 = vector.shape_cast %217 : vector<1x1x16x8xbf16> to vector<16x8xbf16>
    %cst_125 = arith.constant dense<0.000000e+00> : vector<8x8xf32>
    %219 = tpu.matmul %216, %218, %cst_125 {dimension_numbers = #tpu.dot_dimension_numbers<[1], [0], [0], [1], [0, 0, 1, 1], [], []>} : vector<8x16xbf16>, vector<16x8xbf16>, vector<8x8xf32> -> vector<8x8xf32>
    %cst_126 = arith.constant 3.125000e-02 : f32
    %220 = vector.broadcast %cst_126 : f32 to vector<8x8xf32>
    %221 = arith.mulf %219, %220 : vector<8x8xf32>
    %cst_127 = arith.constant -1.000000e+30 : f32
    %222 = vector.broadcast %cst_127 : f32 to vector<8x8xf32>
    %223 = arith.select %53, %222, %213 : vector<8x8xi1>, vector<8x8xf32>
    %cst_128 = arith.constant dense<0xFF800000> : vector<8xf32>
    %224 = vector.multi_reduction <maximumf>, %223, %cst_128 [1] : vector<8x8xf32> to vector<8xf32>
    %225 = vector.shape_cast %224 : vector<8xf32> to vector<8x1xf32>
    %226 = vector.broadcast %225 : vector<8x1xf32> to vector<8x8xf32>
    %227 = arith.subf %223, %226 : vector<8x8xf32>
    %228 = math.exp %227 : vector<8x8xf32>
    %cst_129 = arith.constant dense<0.000000e+00> : vector<8xf32>
    %229 = vector.multi_reduction <add>, %228, %cst_129 [1] : vector<8x8xf32> to vector<8xf32>
    %230 = vector.shape_cast %229 : vector<8xf32> to vector<8x1xf32>
    %231 = tpu.reciprocal %230 {approx = true} : vector<8x1xf32> -> vector<8x1xf32>
    %232 = vector.broadcast %231 : vector<8x1xf32> to vector<8x8xf32>
    %233 = arith.mulf %228, %232 : vector<8x8xf32>
    %cst_130 = arith.constant 1.000000e+00 : f32
    %234 = vector.broadcast %cst_130 : f32 to vector<8x8xf32>
    %235 = arith.subf %234, %233 : vector<8x8xf32>
    %236 = arith.mulf %233, %235 : vector<8x8xf32>
    %237 = arith.mulf %236, %236 : vector<8x8xf32>
    %238 = arith.mulf %237, %221 : vector<8x8xf32>
    %c0_131 = arith.constant 0 : index
    %c3_132 = arith.constant 3 : index
    %c0_133 = arith.constant 0 : index
    %c0_134 = arith.constant 0 : index
    %239 = vector.load %arg11[%c0_131, %c3_132, %c0_133, %c0_134] : memref<1x4x8x8xf32, #tpu.memory_space<vmem>>, vector<1x1x8x8xf32>
    %240 = vector.shape_cast %239 : vector<1x1x8x8xf32> to vector<8x8xf32>
    %cst_135 = arith.constant dense<0.000000e+00> : vector<8x8xf32>
    %241 = tpu.matmul %233, %240, %cst_135 {dimension_numbers = #tpu.dot_dimension_numbers<[1], [0], [0], [1], [0, 0, 1, 1], [], []>} : vector<8x8xf32>, vector<8x8xf32>, vector<8x8xf32> -> vector<8x8xf32>
    %242 = arith.mulf %233, %233 : vector<8x8xf32>
    %243 = tpu.concatenate %238, %242 in 1 : vector<8x8xf32>, vector<8x8xf32> -> vector<8x16xf32>
    %244 = arith.truncf %243 : vector<8x16xf32> to vector<8x16xbf16>
    %c0_136 = arith.constant 0 : index
    %c3_137 = arith.constant 3 : index
    %c0_138 = arith.constant 0 : index
    %c0_139 = arith.constant 0 : index
    %245 = vector.load %arg12[%c0_136, %c3_137, %c0_138, %c0_139] : memref<1x4x16x8xbf16, #tpu.memory_space<vmem>>, vector<1x1x16x8xbf16>
    %246 = vector.shape_cast %245 : vector<1x1x16x8xbf16> to vector<16x8xbf16>
    %cst_140 = arith.constant dense<0.000000e+00> : vector<8x8xf32>
    %247 = tpu.matmul %244, %246, %cst_140 {dimension_numbers = #tpu.dot_dimension_numbers<[1], [0], [0], [1], [0, 0, 1, 1], [], []>} : vector<8x16xbf16>, vector<16x8xbf16>, vector<8x8xf32> -> vector<8x8xf32>
    %248 = vector.extract_strided_slice %31 {offsets = [0, 24], sizes = [8, 8], strides = [1, 1]} : vector<8x32xf32> to vector<8x8xf32>
    %249 = arith.addf %248, %241 : vector<8x8xf32>
    %c0_141 = arith.constant 0 : index
    %c0_142 = arith.constant 0 : index
    %c24 = arith.constant 24 : index
    %250 = vector.load %arg13[%c0_141, %c0_142, %c24] : memref<1x8x32xf32, #tpu.memory_space<vmem>>, vector<1x8x8xf32>
    %251 = vector.shape_cast %250 : vector<1x8x8xf32> to vector<8x8xf32>
    %252 = vector.shape_cast %249 : vector<8x8xf32> to vector<1x8x8xf32>
    tpu.vector_store %arg13[%c0_141, %c0_142, %c24], %252 {strides = array<i32>} : memref<1x8x32xf32, #tpu.memory_space<vmem>>, vector<1x8x8xf32>,
    %253 = vector.extract_strided_slice %43 {offsets = [0, 24], sizes = [8, 8], strides = [1, 1]} : vector<8x32xf32> to vector<8x8xf32>
    %254 = arith.addf %253, %247 : vector<8x8xf32>
    %c0_143 = arith.constant 0 : index
    %c0_144 = arith.constant 0 : index
    %c24_145 = arith.constant 24 : index
    %255 = vector.load %arg14[%c0_143, %c0_144, %c24_145] : memref<1x8x32xf32, #tpu.memory_space<vmem>>, vector<1x8x8xf32>
    %256 = vector.shape_cast %255 : vector<1x8x8xf32> to vector<8x8xf32>
    %257 = vector.shape_cast %254 : vector<8x8xf32> to vector<1x8x8xf32>
    tpu.vector_store %arg14[%c0_143, %c0_144, %c24_145], %257 {strides = array<i32>} : memref<1x8x32xf32, #tpu.memory_space<vmem>>, vector<1x8x8xf32>,
    return
  }
  func.func @transform_0(%arg0: i32) -> (i32, i32, i32) {
    %c0_i32 = arith.constant 0 : i32
    %c0_i32_0 = arith.constant 0 : i32
    %c0_i32_1 = arith.constant 0 : i32
    return %arg0, %c0_i32, %c0_i32_0 : i32, i32, i32
  }
  func.func @transform_1(%arg0: i32) -> (i32, i32, i32) {
    %c0_i32 = arith.constant 0 : i32
    %c0_i32_0 = arith.constant 0 : i32
    %c0_i32_1 = arith.constant 0 : i32
    return %arg0, %c0_i32, %c0_i32_0 : i32, i32, i32
  }
  func.func @transform_2(%arg0: i32) -> (i32, i32) {
    %c0_i32 = arith.constant 0 : i32
    %c0_i32_0 = arith.constant 0 : i32
    %c0_i32_1 = arith.constant 0 : i32
    return %c0_i32, %c0_i32_0 : i32, i32
  }
  func.func @transform_3(%arg0: i32) -> (i32, i32) {
    %c0_i32 = arith.constant 0 : i32
    %c0_i32_0 = arith.constant 0 : i32
    %c0_i32_1 = arith.constant 0 : i32
    return %c0_i32, %c0_i32_0 : i32, i32
  }
  func.func @transform_4(%arg0: i32) -> (i32, i32) {
    %c0_i32 = arith.constant 0 : i32
    %c0_i32_0 = arith.constant 0 : i32
    %c0_i32_1 = arith.constant 0 : i32
    return %c0_i32, %c0_i32_0 : i32, i32
  }
  func.func @transform_5(%arg0: i32) -> (i32, i32) {
    %c0_i32 = arith.constant 0 : i32
    %c0_i32_0 = arith.constant 0 : i32
    %c0_i32_1 = arith.constant 0 : i32
    return %c0_i32, %c0_i32_0 : i32, i32
  }
  func.func @transform_6(%arg0: i32) -> (i32, i32) {
    %c0_i32 = arith.constant 0 : i32
    %c0_i32_0 = arith.constant 0 : i32
    %c0_i32_1 = arith.constant 0 : i32
    return %c0_i32, %c0_i32_0 : i32, i32
  }
  func.func @transform_7(%arg0: i32) -> (i32, i32) {
    %c0_i32 = arith.constant 0 : i32
    %c0_i32_0 = arith.constant 0 : i32
    %c0_i32_1 = arith.constant 0 : i32
    return %c0_i32, %c0_i32_0 : i32, i32
  }
  func.func @transform_8(%arg0: i32) -> (i32, i32, i32, i32) {
    %c0_i32 = arith.constant 0 : i32
    %c0_i32_0 = arith.constant 0 : i32
    %c0_i32_1 = arith.constant 0 : i32
    %c0_i32_2 = arith.constant 0 : i32
    return %arg0, %c0_i32, %c0_i32_0, %c0_i32_1 : i32, i32, i32, i32
  }
  func.func @transform_9(%arg0: i32) -> (i32, i32, i32, i32) {
    %c0_i32 = arith.constant 0 : i32
    %c0_i32_0 = arith.constant 0 : i32
    %c0_i32_1 = arith.constant 0 : i32
    %c0_i32_2 = arith.constant 0 : i32
    return %arg0, %c0_i32, %c0_i32_0, %c0_i32_1 : i32, i32, i32, i32
  }
  func.func @transform_10(%arg0: i32) -> (i32, i32, i32, i32) {
    %c0_i32 = arith.constant 0 : i32
    %c0_i32_0 = arith.constant 0 : i32
    %c0_i32_1 = arith.constant 0 : i32
    %c0_i32_2 = arith.constant 0 : i32
    return %arg0, %c0_i32, %c0_i32_0, %c0_i32_1 : i32, i32, i32, i32
  }
  func.func @transform_11(%arg0: i32) -> (i32, i32, i32, i32) {
    %c0_i32 = arith.constant 0 : i32
    %c0_i32_0 = arith.constant 0 : i32
    %c0_i32_1 = arith.constant 0 : i32
    %c0_i32_2 = arith.constant 0 : i32
    return %arg0, %c0_i32, %c0_i32_0, %c0_i32_1 : i32, i32, i32, i32
  }
  func.func @transform_12(%arg0: i32) -> (i32, i32, i32) {
    %c0_i32 = arith.constant 0 : i32
    %c0_i32_0 = arith.constant 0 : i32
    %c0_i32_1 = arith.constant 0 : i32
    return %arg0, %c0_i32, %c0_i32_0 : i32, i32, i32
  }
  func.func @transform_13(%arg0: i32) -> (i32, i32, i32) {
    %c0_i32 = arith.constant 0 : i32
    %c0_i32_0 = arith.constant 0 : i32
    %c0_i32_1 = arith.constant 0 : i32
    return %arg0, %c0_i32, %c0_i32_0 : i32, i32, i32
  }
}

module attributes {stable_mosaic.version = 11 : i64} {
  func.func @_self_block_kernel(%arg0: i32, %arg1: memref<1x8x32xf32, #tpu.memory_space<vmem>>, %arg2: memref<1x8x32xf32, #tpu.memory_space<vmem>>, %arg3: memref<1x32xf32, #tpu.memory_space<vmem>>, %arg4: memref<1x32xf32, #tpu.memory_space<vmem>>, %arg5: memref<1x32xf32, #tpu.memory_space<vmem>>, %arg6: memref<1x32xf32, #tpu.memory_space<vmem>>, %arg7: memref<32x96xf32, #tpu.memory_space<vmem>>, %arg8: memref<64x96xbf16, #tpu.memory_space<vmem>>, %arg9: memref<1x8x32xf32, #tpu.memory_space<vmem>>, %arg10: memref<1x8x32xf32, #tpu.memory_space<vmem>>) attributes {dimension_semantics = [#tpu.dimension_semantics<parallel>], iteration_bounds = array<i64: 2>, scalar_prefetch = 0 : i64, scratch_operands = 0 : i64, tpu.core_type = #tpu.core_type<tc>, window_params = [{transform_indices = @transform_0, window_bounds = array<i64: 1, 8, 32>}, {transform_indices = @transform_1, window_bounds = array<i64: 1, 8, 32>}, {pipeline_mode = #tpu.pipeline_mode<synchronous>, transform_indices = @transform_2, window_bounds = array<i64: 1, 32>}, {pipeline_mode = #tpu.pipeline_mode<synchronous>, transform_indices = @transform_3, window_bounds = array<i64: 1, 32>}, {pipeline_mode = #tpu.pipeline_mode<synchronous>, transform_indices = @transform_4, window_bounds = array<i64: 1, 32>}, {pipeline_mode = #tpu.pipeline_mode<synchronous>, transform_indices = @transform_5, window_bounds = array<i64: 1, 32>}, {pipeline_mode = #tpu.pipeline_mode<synchronous>, transform_indices = @transform_6, window_bounds = array<i64: 32, 96>}, {pipeline_mode = #tpu.pipeline_mode<synchronous>, transform_indices = @transform_7, window_bounds = array<i64: 64, 96>}, {transform_indices = @transform_8, window_bounds = array<i64: 1, 8, 32>}, {transform_indices = @transform_9, window_bounds = array<i64: 1, 8, 32>}]} {
    %c0 = arith.constant 0 : index
    %c0_0 = arith.constant 0 : index
    %c0_1 = arith.constant 0 : index
    %0 = vector.load %arg1[%c0, %c0_0, %c0_1] : memref<1x8x32xf32, #tpu.memory_space<vmem>>, vector<1x8x32xf32>
    %1 = vector.shape_cast %0 : vector<1x8x32xf32> to vector<8x32xf32>
    %c0_2 = arith.constant 0 : index
    %c0_3 = arith.constant 0 : index
    %c0_4 = arith.constant 0 : index
    %2 = vector.load %arg2[%c0_2, %c0_3, %c0_4] : memref<1x8x32xf32, #tpu.memory_space<vmem>>, vector<1x8x32xf32>
    %3 = vector.shape_cast %2 : vector<1x8x32xf32> to vector<8x32xf32>
    %c0_5 = arith.constant 0 : index
    %c0_6 = arith.constant 0 : index
    %4 = vector.load %arg3[%c0_5, %c0_6] : memref<1x32xf32, #tpu.memory_space<vmem>>, vector<1x32xf32>
    %c0_7 = arith.constant 0 : index
    %c0_8 = arith.constant 0 : index
    %5 = vector.load %arg4[%c0_7, %c0_8] : memref<1x32xf32, #tpu.memory_space<vmem>>, vector<1x32xf32>
    %c0_9 = arith.constant 0 : index
    %c0_10 = arith.constant 0 : index
    %6 = vector.load %arg5[%c0_9, %c0_10] : memref<1x32xf32, #tpu.memory_space<vmem>>, vector<1x32xf32>
    %c0_11 = arith.constant 0 : index
    %c0_12 = arith.constant 0 : index
    %7 = vector.load %arg6[%c0_11, %c0_12] : memref<1x32xf32, #tpu.memory_space<vmem>>, vector<1x32xf32>
    %cst = arith.constant dense<0.000000e+00> : vector<8xf32>
    %8 = vector.multi_reduction <add>, %1, %cst [1] : vector<8x32xf32> to vector<8xf32>
    %9 = vector.shape_cast %8 : vector<8xf32> to vector<8x1xf32>
    %cst_13 = arith.constant 3.200000e+01 : f32
    %10 = vector.broadcast %cst_13 : f32 to vector<8x1xf32>
    %11 = arith.divf %9, %10 : vector<8x1xf32>
    %12 = arith.mulf %1, %1 : vector<8x32xf32>
    %cst_14 = arith.constant dense<0.000000e+00> : vector<8xf32>
    %13 = vector.multi_reduction <add>, %12, %cst_14 [1] : vector<8x32xf32> to vector<8xf32>
    %14 = vector.shape_cast %13 : vector<8xf32> to vector<8x1xf32>
    %cst_15 = arith.constant 3.200000e+01 : f32
    %15 = vector.broadcast %cst_15 : f32 to vector<8x1xf32>
    %16 = arith.divf %14, %15 : vector<8x1xf32>
    %17 = arith.mulf %11, %11 : vector<8x1xf32>
    %18 = arith.subf %16, %17 : vector<8x1xf32>
    %cst_16 = arith.constant 0.000000e+00 : f32
    %19 = vector.broadcast %cst_16 : f32 to vector<8x1xf32>
    %20 = arith.maximumf %18, %19 : vector<8x1xf32>
    %cst_17 = arith.constant 9.99999974E-6 : f32
    %21 = vector.broadcast %cst_17 : f32 to vector<8x1xf32>
    %22 = arith.addf %20, %21 : vector<8x1xf32>
    %23 = math.rsqrt %22 : vector<8x1xf32>
    %24 = vector.broadcast %11 : vector<8x1xf32> to vector<8x32xf32>
    %25 = arith.subf %1, %24 : vector<8x32xf32>
    %26 = vector.broadcast %23 : vector<8x1xf32> to vector<8x32xf32>
    %27 = arith.mulf %25, %26 : vector<8x32xf32>
    %28 = vector.broadcast %4 : vector<1x32xf32> to vector<8x32xf32>
    %29 = arith.mulf %28, %27 : vector<8x32xf32>
    %30 = vector.broadcast %6 : vector<1x32xf32> to vector<8x32xf32>
    %31 = arith.addf %29, %30 : vector<8x32xf32>
    %32 = arith.mulf %4, %4 : vector<1x32xf32>
    %33 = vector.broadcast %32 : vector<1x32xf32> to vector<8x32xf32>
    %34 = arith.mulf %33, %3 : vector<8x32xf32>
    %35 = arith.mulf %23, %23 : vector<8x1xf32>
    %36 = vector.broadcast %35 : vector<8x1xf32> to vector<8x32xf32>
    %37 = arith.mulf %34, %36 : vector<8x32xf32>
    %38 = arith.mulf %27, %27 : vector<8x32xf32>
    %39 = vector.broadcast %5 : vector<1x32xf32> to vector<8x32xf32>
    %40 = arith.mulf %39, %38 : vector<8x32xf32>
    %41 = arith.addf %37, %40 : vector<8x32xf32>
    %42 = vector.broadcast %7 : vector<1x32xf32> to vector<8x32xf32>
    %43 = arith.addf %41, %42 : vector<8x32xf32>
    %c0_18 = arith.constant 0 : index
    %c0_19 = arith.constant 0 : index
    %44 = vector.load %arg7[%c0_18, %c0_19] : memref<32x96xf32, #tpu.memory_space<vmem>>, vector<32x96xf32>
    %c0_20 = arith.constant 0 : index
    %c0_21 = arith.constant 0 : index
    %45 = vector.load %arg8[%c0_20, %c0_21] : memref<64x96xbf16, #tpu.memory_space<vmem>>, vector<64x96xbf16>
    %cst_22 = arith.constant dense<0.000000e+00> : vector<8x96xf32>
    %46 = tpu.matmul %31, %44, %cst_22 {dimension_numbers = #tpu.dot_dimension_numbers<[1], [0], [0], [1], [0, 0, 1, 1], [], []>} : vector<8x32xf32>, vector<32x96xf32>, vector<8x96xf32> -> vector<8x96xf32>
    %47 = arith.mulf %31, %31 : vector<8x32xf32>
    %48 = tpu.concatenate %43, %47 in 1 : vector<8x32xf32>, vector<8x32xf32> -> vector<8x64xf32>
    %49 = arith.truncf %48 : vector<8x64xf32> to vector<8x64xbf16>
    %cst_23 = arith.constant dense<0.000000e+00> : vector<8x96xf32>
    %50 = tpu.matmul %49, %45, %cst_23 {dimension_numbers = #tpu.dot_dimension_numbers<[1], [0], [0], [1], [0, 0, 1, 1], [], []>} : vector<8x64xbf16>, vector<64x96xbf16>, vector<8x96xf32> -> vector<8x96xf32>
    %51 = tpu.iota {dimensions = array<i32: 0>} : vector<8x8xi32>
    %52 = tpu.iota {dimensions = array<i32: 1>} : vector<8x8xi32>
    %53 = arith.cmpi sgt, %52, %51 : vector<8x8xi32>
    %54 = vector.extract_strided_slice %46 {offsets = [0, 0], sizes = [8, 8], strides = [1, 1]} : vector<8x96xf32> to vector<8x8xf32>
    %55 = vector.extract_strided_slice %50 {offsets = [0, 0], sizes = [8, 8], strides = [1, 1]} : vector<8x96xf32> to vector<8x8xf32>
    %56 = vector.extract_strided_slice %46 {offsets = [0, 32], sizes = [8, 8], strides = [1, 1]} : vector<8x96xf32> to vector<8x8xf32>
    %57 = vector.extract_strided_slice %50 {offsets = [0, 32], sizes = [8, 8], strides = [1, 1]} : vector<8x96xf32> to vector<8x8xf32>
    %58 = vector.extract_strided_slice %46 {offsets = [0, 64], sizes = [8, 8], strides = [1, 1]} : vector<8x96xf32> to vector<8x8xf32>
    %59 = vector.extract_strided_slice %50 {offsets = [0, 64], sizes = [8, 8], strides = [1, 1]} : vector<8x96xf32> to vector<8x8xf32>
    %60 = tpu.transpose %56, [1, 0] : vector<8x8xf32> -> vector<8x8xf32>
    %cst_24 = arith.constant dense<0.000000e+00> : vector<8x8xf32>
    %61 = tpu.matmul %54, %60, %cst_24 {dimension_numbers = #tpu.dot_dimension_numbers<[1], [0], [0], [1], [0, 0, 1, 1], [], []>} : vector<8x8xf32>, vector<8x8xf32>, vector<8x8xf32> -> vector<8x8xf32>
    %cst_25 = arith.constant 0.176776692 : f32
    %62 = vector.broadcast %cst_25 : f32 to vector<8x8xf32>
    %63 = arith.mulf %61, %62 : vector<8x8xf32>
    %64 = arith.mulf %56, %56 : vector<8x8xf32>
    %65 = arith.addf %64, %57 : vector<8x8xf32>
    %66 = arith.truncf %65 : vector<8x8xf32> to vector<8x8xbf16>
    %67 = arith.truncf %55 : vector<8x8xf32> to vector<8x8xbf16>
    %68 = tpu.transpose %66, [1, 0] : vector<8x8xbf16> -> vector<8x8xbf16>
    %cst_26 = arith.constant dense<0.000000e+00> : vector<8x8xf32>
    %69 = tpu.matmul %67, %68, %cst_26 {dimension_numbers = #tpu.dot_dimension_numbers<[1], [0], [0], [1], [0, 0, 1, 1], [], []>} : vector<8x8xbf16>, vector<8x8xbf16>, vector<8x8xf32> -> vector<8x8xf32>
    %70 = arith.mulf %54, %54 : vector<8x8xf32>
    %71 = arith.truncf %70 : vector<8x8xf32> to vector<8x8xbf16>
    %72 = arith.truncf %57 : vector<8x8xf32> to vector<8x8xbf16>
    %73 = tpu.transpose %72, [1, 0] : vector<8x8xbf16> -> vector<8x8xbf16>
    %cst_27 = arith.constant dense<0.000000e+00> : vector<8x8xf32>
    %74 = tpu.matmul %71, %73, %cst_27 {dimension_numbers = #tpu.dot_dimension_numbers<[1], [0], [0], [1], [0, 0, 1, 1], [], []>} : vector<8x8xbf16>, vector<8x8xbf16>, vector<8x8xf32> -> vector<8x8xf32>
    %75 = arith.addf %69, %74 : vector<8x8xf32>
    %cst_28 = arith.constant 3.125000e-02 : f32
    %76 = vector.broadcast %cst_28 : f32 to vector<8x8xf32>
    %77 = arith.mulf %75, %76 : vector<8x8xf32>
    %cst_29 = arith.constant -1.000000e+30 : f32
    %78 = vector.broadcast %cst_29 : f32 to vector<8x8xf32>
    %79 = arith.select %53, %78, %63 : vector<8x8xi1>, vector<8x8xf32>
    %cst_30 = arith.constant dense<0xFF800000> : vector<8xf32>
    %80 = vector.multi_reduction <maximumf>, %79, %cst_30 [1] : vector<8x8xf32> to vector<8xf32>
    %81 = vector.shape_cast %80 : vector<8xf32> to vector<8x1xf32>
    %82 = vector.broadcast %81 : vector<8x1xf32> to vector<8x8xf32>
    %83 = arith.subf %79, %82 : vector<8x8xf32>
    %84 = math.exp %83 : vector<8x8xf32>
    %cst_31 = arith.constant dense<0.000000e+00> : vector<8xf32>
    %85 = vector.multi_reduction <add>, %84, %cst_31 [1] : vector<8x8xf32> to vector<8xf32>
    %86 = vector.shape_cast %85 : vector<8xf32> to vector<8x1xf32>
    %87 = tpu.reciprocal %86 {approx = true} : vector<8x1xf32> -> vector<8x1xf32>
    %88 = vector.broadcast %87 : vector<8x1xf32> to vector<8x8xf32>
    %89 = arith.mulf %84, %88 : vector<8x8xf32>
    %cst_32 = arith.constant 1.000000e+00 : f32
    %90 = vector.broadcast %cst_32 : f32 to vector<8x8xf32>
    %91 = arith.subf %90, %89 : vector<8x8xf32>
    %92 = arith.mulf %89, %91 : vector<8x8xf32>
    %93 = arith.mulf %92, %92 : vector<8x8xf32>
    %94 = arith.mulf %93, %77 : vector<8x8xf32>
    %cst_33 = arith.constant dense<0.000000e+00> : vector<8x8xf32>
    %95 = tpu.matmul %89, %58, %cst_33 {dimension_numbers = #tpu.dot_dimension_numbers<[1], [0], [0], [1], [0, 0, 1, 1], [], []>} : vector<8x8xf32>, vector<8x8xf32>, vector<8x8xf32> -> vector<8x8xf32>
    %96 = arith.mulf %58, %58 : vector<8x8xf32>
    %97 = arith.addf %96, %59 : vector<8x8xf32>
    %98 = arith.truncf %97 : vector<8x8xf32> to vector<8x8xbf16>
    %99 = arith.truncf %94 : vector<8x8xf32> to vector<8x8xbf16>
    %cst_34 = arith.constant dense<0.000000e+00> : vector<8x8xf32>
    %100 = tpu.matmul %99, %98, %cst_34 {dimension_numbers = #tpu.dot_dimension_numbers<[1], [0], [0], [1], [0, 0, 1, 1], [], []>} : vector<8x8xbf16>, vector<8x8xbf16>, vector<8x8xf32> -> vector<8x8xf32>
    %101 = arith.mulf %89, %89 : vector<8x8xf32>
    %102 = arith.truncf %101 : vector<8x8xf32> to vector<8x8xbf16>
    %103 = arith.truncf %59 : vector<8x8xf32> to vector<8x8xbf16>
    %cst_35 = arith.constant dense<0.000000e+00> : vector<8x8xf32>
    %104 = tpu.matmul %102, %103, %cst_35 {dimension_numbers = #tpu.dot_dimension_numbers<[1], [0], [0], [1], [0, 0, 1, 1], [], []>} : vector<8x8xbf16>, vector<8x8xbf16>, vector<8x8xf32> -> vector<8x8xf32>
    %105 = arith.addf %100, %104 : vector<8x8xf32>
    %106 = vector.extract_strided_slice %31 {offsets = [0, 0], sizes = [8, 8], strides = [1, 1]} : vector<8x32xf32> to vector<8x8xf32>
    %107 = arith.addf %106, %95 : vector<8x8xf32>
    %c0_36 = arith.constant 0 : index
    %c0_37 = arith.constant 0 : index
    %c0_38 = arith.constant 0 : index
    %108 = vector.load %arg9[%c0_36, %c0_37, %c0_38] : memref<1x8x32xf32, #tpu.memory_space<vmem>>, vector<1x8x8xf32>
    %109 = vector.shape_cast %108 : vector<1x8x8xf32> to vector<8x8xf32>
    %110 = vector.shape_cast %107 : vector<8x8xf32> to vector<1x8x8xf32>
    tpu.vector_store %arg9[%c0_36, %c0_37, %c0_38], %110 {strides = array<i32>} : memref<1x8x32xf32, #tpu.memory_space<vmem>>, vector<1x8x8xf32>,
    %111 = vector.extract_strided_slice %43 {offsets = [0, 0], sizes = [8, 8], strides = [1, 1]} : vector<8x32xf32> to vector<8x8xf32>
    %112 = arith.addf %111, %105 : vector<8x8xf32>
    %c0_39 = arith.constant 0 : index
    %c0_40 = arith.constant 0 : index
    %c0_41 = arith.constant 0 : index
    %113 = vector.load %arg10[%c0_39, %c0_40, %c0_41] : memref<1x8x32xf32, #tpu.memory_space<vmem>>, vector<1x8x8xf32>
    %114 = vector.shape_cast %113 : vector<1x8x8xf32> to vector<8x8xf32>
    %115 = vector.shape_cast %112 : vector<8x8xf32> to vector<1x8x8xf32>
    tpu.vector_store %arg10[%c0_39, %c0_40, %c0_41], %115 {strides = array<i32>} : memref<1x8x32xf32, #tpu.memory_space<vmem>>, vector<1x8x8xf32>,
    %116 = vector.extract_strided_slice %46 {offsets = [0, 8], sizes = [8, 8], strides = [1, 1]} : vector<8x96xf32> to vector<8x8xf32>
    %117 = vector.extract_strided_slice %50 {offsets = [0, 8], sizes = [8, 8], strides = [1, 1]} : vector<8x96xf32> to vector<8x8xf32>
    %118 = vector.extract_strided_slice %46 {offsets = [0, 40], sizes = [8, 8], strides = [1, 1]} : vector<8x96xf32> to vector<8x8xf32>
    %119 = vector.extract_strided_slice %50 {offsets = [0, 40], sizes = [8, 8], strides = [1, 1]} : vector<8x96xf32> to vector<8x8xf32>
    %120 = vector.extract_strided_slice %46 {offsets = [0, 72], sizes = [8, 8], strides = [1, 1]} : vector<8x96xf32> to vector<8x8xf32>
    %121 = vector.extract_strided_slice %50 {offsets = [0, 72], sizes = [8, 8], strides = [1, 1]} : vector<8x96xf32> to vector<8x8xf32>
    %122 = tpu.transpose %118, [1, 0] : vector<8x8xf32> -> vector<8x8xf32>
    %cst_42 = arith.constant dense<0.000000e+00> : vector<8x8xf32>
    %123 = tpu.matmul %116, %122, %cst_42 {dimension_numbers = #tpu.dot_dimension_numbers<[1], [0], [0], [1], [0, 0, 1, 1], [], []>} : vector<8x8xf32>, vector<8x8xf32>, vector<8x8xf32> -> vector<8x8xf32>
    %cst_43 = arith.constant 0.176776692 : f32
    %124 = vector.broadcast %cst_43 : f32 to vector<8x8xf32>
    %125 = arith.mulf %123, %124 : vector<8x8xf32>
    %126 = arith.mulf %118, %118 : vector<8x8xf32>
    %127 = arith.addf %126, %119 : vector<8x8xf32>
    %128 = arith.truncf %127 : vector<8x8xf32> to vector<8x8xbf16>
    %129 = arith.truncf %117 : vector<8x8xf32> to vector<8x8xbf16>
    %130 = tpu.transpose %128, [1, 0] : vector<8x8xbf16> -> vector<8x8xbf16>
    %cst_44 = arith.constant dense<0.000000e+00> : vector<8x8xf32>
    %131 = tpu.matmul %129, %130, %cst_44 {dimension_numbers = #tpu.dot_dimension_numbers<[1], [0], [0], [1], [0, 0, 1, 1], [], []>} : vector<8x8xbf16>, vector<8x8xbf16>, vector<8x8xf32> -> vector<8x8xf32>
    %132 = arith.mulf %116, %116 : vector<8x8xf32>
    %133 = arith.truncf %132 : vector<8x8xf32> to vector<8x8xbf16>
    %134 = arith.truncf %119 : vector<8x8xf32> to vector<8x8xbf16>
    %135 = tpu.transpose %134, [1, 0] : vector<8x8xbf16> -> vector<8x8xbf16>
    %cst_45 = arith.constant dense<0.000000e+00> : vector<8x8xf32>
    %136 = tpu.matmul %133, %135, %cst_45 {dimension_numbers = #tpu.dot_dimension_numbers<[1], [0], [0], [1], [0, 0, 1, 1], [], []>} : vector<8x8xbf16>, vector<8x8xbf16>, vector<8x8xf32> -> vector<8x8xf32>
    %137 = arith.addf %131, %136 : vector<8x8xf32>
    %cst_46 = arith.constant 3.125000e-02 : f32
    %138 = vector.broadcast %cst_46 : f32 to vector<8x8xf32>
    %139 = arith.mulf %137, %138 : vector<8x8xf32>
    %cst_47 = arith.constant -1.000000e+30 : f32
    %140 = vector.broadcast %cst_47 : f32 to vector<8x8xf32>
    %141 = arith.select %53, %140, %125 : vector<8x8xi1>, vector<8x8xf32>
    %cst_48 = arith.constant dense<0xFF800000> : vector<8xf32>
    %142 = vector.multi_reduction <maximumf>, %141, %cst_48 [1] : vector<8x8xf32> to vector<8xf32>
    %143 = vector.shape_cast %142 : vector<8xf32> to vector<8x1xf32>
    %144 = vector.broadcast %143 : vector<8x1xf32> to vector<8x8xf32>
    %145 = arith.subf %141, %144 : vector<8x8xf32>
    %146 = math.exp %145 : vector<8x8xf32>
    %cst_49 = arith.constant dense<0.000000e+00> : vector<8xf32>
    %147 = vector.multi_reduction <add>, %146, %cst_49 [1] : vector<8x8xf32> to vector<8xf32>
    %148 = vector.shape_cast %147 : vector<8xf32> to vector<8x1xf32>
    %149 = tpu.reciprocal %148 {approx = true} : vector<8x1xf32> -> vector<8x1xf32>
    %150 = vector.broadcast %149 : vector<8x1xf32> to vector<8x8xf32>
    %151 = arith.mulf %146, %150 : vector<8x8xf32>
    %cst_50 = arith.constant 1.000000e+00 : f32
    %152 = vector.broadcast %cst_50 : f32 to vector<8x8xf32>
    %153 = arith.subf %152, %151 : vector<8x8xf32>
    %154 = arith.mulf %151, %153 : vector<8x8xf32>
    %155 = arith.mulf %154, %154 : vector<8x8xf32>
    %156 = arith.mulf %155, %139 : vector<8x8xf32>
    %cst_51 = arith.constant dense<0.000000e+00> : vector<8x8xf32>
    %157 = tpu.matmul %151, %120, %cst_51 {dimension_numbers = #tpu.dot_dimension_numbers<[1], [0], [0], [1], [0, 0, 1, 1], [], []>} : vector<8x8xf32>, vector<8x8xf32>, vector<8x8xf32> -> vector<8x8xf32>
    %158 = arith.mulf %120, %120 : vector<8x8xf32>
    %159 = arith.addf %158, %121 : vector<8x8xf32>
    %160 = arith.truncf %159 : vector<8x8xf32> to vector<8x8xbf16>
    %161 = arith.truncf %156 : vector<8x8xf32> to vector<8x8xbf16>
    %cst_52 = arith.constant dense<0.000000e+00> : vector<8x8xf32>
    %162 = tpu.matmul %161, %160, %cst_52 {dimension_numbers = #tpu.dot_dimension_numbers<[1], [0], [0], [1], [0, 0, 1, 1], [], []>} : vector<8x8xbf16>, vector<8x8xbf16>, vector<8x8xf32> -> vector<8x8xf32>
    %163 = arith.mulf %151, %151 : vector<8x8xf32>
    %164 = arith.truncf %163 : vector<8x8xf32> to vector<8x8xbf16>
    %165 = arith.truncf %121 : vector<8x8xf32> to vector<8x8xbf16>
    %cst_53 = arith.constant dense<0.000000e+00> : vector<8x8xf32>
    %166 = tpu.matmul %164, %165, %cst_53 {dimension_numbers = #tpu.dot_dimension_numbers<[1], [0], [0], [1], [0, 0, 1, 1], [], []>} : vector<8x8xbf16>, vector<8x8xbf16>, vector<8x8xf32> -> vector<8x8xf32>
    %167 = arith.addf %162, %166 : vector<8x8xf32>
    %168 = vector.extract_strided_slice %31 {offsets = [0, 8], sizes = [8, 8], strides = [1, 1]} : vector<8x32xf32> to vector<8x8xf32>
    %169 = arith.addf %168, %157 : vector<8x8xf32>
    %c0_54 = arith.constant 0 : index
    %c0_55 = arith.constant 0 : index
    %c8 = arith.constant 8 : index
    %170 = vector.load %arg9[%c0_54, %c0_55, %c8] : memref<1x8x32xf32, #tpu.memory_space<vmem>>, vector<1x8x8xf32>
    %171 = vector.shape_cast %170 : vector<1x8x8xf32> to vector<8x8xf32>
    %172 = vector.shape_cast %169 : vector<8x8xf32> to vector<1x8x8xf32>
    tpu.vector_store %arg9[%c0_54, %c0_55, %c8], %172 {strides = array<i32>} : memref<1x8x32xf32, #tpu.memory_space<vmem>>, vector<1x8x8xf32>,
    %173 = vector.extract_strided_slice %43 {offsets = [0, 8], sizes = [8, 8], strides = [1, 1]} : vector<8x32xf32> to vector<8x8xf32>
    %174 = arith.addf %173, %167 : vector<8x8xf32>
    %c0_56 = arith.constant 0 : index
    %c0_57 = arith.constant 0 : index
    %c8_58 = arith.constant 8 : index
    %175 = vector.load %arg10[%c0_56, %c0_57, %c8_58] : memref<1x8x32xf32, #tpu.memory_space<vmem>>, vector<1x8x8xf32>
    %176 = vector.shape_cast %175 : vector<1x8x8xf32> to vector<8x8xf32>
    %177 = vector.shape_cast %174 : vector<8x8xf32> to vector<1x8x8xf32>
    tpu.vector_store %arg10[%c0_56, %c0_57, %c8_58], %177 {strides = array<i32>} : memref<1x8x32xf32, #tpu.memory_space<vmem>>, vector<1x8x8xf32>,
    %178 = vector.extract_strided_slice %46 {offsets = [0, 16], sizes = [8, 8], strides = [1, 1]} : vector<8x96xf32> to vector<8x8xf32>
    %179 = vector.extract_strided_slice %50 {offsets = [0, 16], sizes = [8, 8], strides = [1, 1]} : vector<8x96xf32> to vector<8x8xf32>
    %180 = vector.extract_strided_slice %46 {offsets = [0, 48], sizes = [8, 8], strides = [1, 1]} : vector<8x96xf32> to vector<8x8xf32>
    %181 = vector.extract_strided_slice %50 {offsets = [0, 48], sizes = [8, 8], strides = [1, 1]} : vector<8x96xf32> to vector<8x8xf32>
    %182 = vector.extract_strided_slice %46 {offsets = [0, 80], sizes = [8, 8], strides = [1, 1]} : vector<8x96xf32> to vector<8x8xf32>
    %183 = vector.extract_strided_slice %50 {offsets = [0, 80], sizes = [8, 8], strides = [1, 1]} : vector<8x96xf32> to vector<8x8xf32>
    %184 = tpu.transpose %180, [1, 0] : vector<8x8xf32> -> vector<8x8xf32>
    %cst_59 = arith.constant dense<0.000000e+00> : vector<8x8xf32>
    %185 = tpu.matmul %178, %184, %cst_59 {dimension_numbers = #tpu.dot_dimension_numbers<[1], [0], [0], [1], [0, 0, 1, 1], [], []>} : vector<8x8xf32>, vector<8x8xf32>, vector<8x8xf32> -> vector<8x8xf32>
    %cst_60 = arith.constant 0.176776692 : f32
    %186 = vector.broadcast %cst_60 : f32 to vector<8x8xf32>
    %187 = arith.mulf %185, %186 : vector<8x8xf32>
    %188 = arith.mulf %180, %180 : vector<8x8xf32>
    %189 = arith.addf %188, %181 : vector<8x8xf32>
    %190 = arith.truncf %189 : vector<8x8xf32> to vector<8x8xbf16>
    %191 = arith.truncf %179 : vector<8x8xf32> to vector<8x8xbf16>
    %192 = tpu.transpose %190, [1, 0] : vector<8x8xbf16> -> vector<8x8xbf16>
    %cst_61 = arith.constant dense<0.000000e+00> : vector<8x8xf32>
    %193 = tpu.matmul %191, %192, %cst_61 {dimension_numbers = #tpu.dot_dimension_numbers<[1], [0], [0], [1], [0, 0, 1, 1], [], []>} : vector<8x8xbf16>, vector<8x8xbf16>, vector<8x8xf32> -> vector<8x8xf32>
    %194 = arith.mulf %178, %178 : vector<8x8xf32>
    %195 = arith.truncf %194 : vector<8x8xf32> to vector<8x8xbf16>
    %196 = arith.truncf %181 : vector<8x8xf32> to vector<8x8xbf16>
    %197 = tpu.transpose %196, [1, 0] : vector<8x8xbf16> -> vector<8x8xbf16>
    %cst_62 = arith.constant dense<0.000000e+00> : vector<8x8xf32>
    %198 = tpu.matmul %195, %197, %cst_62 {dimension_numbers = #tpu.dot_dimension_numbers<[1], [0], [0], [1], [0, 0, 1, 1], [], []>} : vector<8x8xbf16>, vector<8x8xbf16>, vector<8x8xf32> -> vector<8x8xf32>
    %199 = arith.addf %193, %198 : vector<8x8xf32>
    %cst_63 = arith.constant 3.125000e-02 : f32
    %200 = vector.broadcast %cst_63 : f32 to vector<8x8xf32>
    %201 = arith.mulf %199, %200 : vector<8x8xf32>
    %cst_64 = arith.constant -1.000000e+30 : f32
    %202 = vector.broadcast %cst_64 : f32 to vector<8x8xf32>
    %203 = arith.select %53, %202, %187 : vector<8x8xi1>, vector<8x8xf32>
    %cst_65 = arith.constant dense<0xFF800000> : vector<8xf32>
    %204 = vector.multi_reduction <maximumf>, %203, %cst_65 [1] : vector<8x8xf32> to vector<8xf32>
    %205 = vector.shape_cast %204 : vector<8xf32> to vector<8x1xf32>
    %206 = vector.broadcast %205 : vector<8x1xf32> to vector<8x8xf32>
    %207 = arith.subf %203, %206 : vector<8x8xf32>
    %208 = math.exp %207 : vector<8x8xf32>
    %cst_66 = arith.constant dense<0.000000e+00> : vector<8xf32>
    %209 = vector.multi_reduction <add>, %208, %cst_66 [1] : vector<8x8xf32> to vector<8xf32>
    %210 = vector.shape_cast %209 : vector<8xf32> to vector<8x1xf32>
    %211 = tpu.reciprocal %210 {approx = true} : vector<8x1xf32> -> vector<8x1xf32>
    %212 = vector.broadcast %211 : vector<8x1xf32> to vector<8x8xf32>
    %213 = arith.mulf %208, %212 : vector<8x8xf32>
    %cst_67 = arith.constant 1.000000e+00 : f32
    %214 = vector.broadcast %cst_67 : f32 to vector<8x8xf32>
    %215 = arith.subf %214, %213 : vector<8x8xf32>
    %216 = arith.mulf %213, %215 : vector<8x8xf32>
    %217 = arith.mulf %216, %216 : vector<8x8xf32>
    %218 = arith.mulf %217, %201 : vector<8x8xf32>
    %cst_68 = arith.constant dense<0.000000e+00> : vector<8x8xf32>
    %219 = tpu.matmul %213, %182, %cst_68 {dimension_numbers = #tpu.dot_dimension_numbers<[1], [0], [0], [1], [0, 0, 1, 1], [], []>} : vector<8x8xf32>, vector<8x8xf32>, vector<8x8xf32> -> vector<8x8xf32>
    %220 = arith.mulf %182, %182 : vector<8x8xf32>
    %221 = arith.addf %220, %183 : vector<8x8xf32>
    %222 = arith.truncf %221 : vector<8x8xf32> to vector<8x8xbf16>
    %223 = arith.truncf %218 : vector<8x8xf32> to vector<8x8xbf16>
    %cst_69 = arith.constant dense<0.000000e+00> : vector<8x8xf32>
    %224 = tpu.matmul %223, %222, %cst_69 {dimension_numbers = #tpu.dot_dimension_numbers<[1], [0], [0], [1], [0, 0, 1, 1], [], []>} : vector<8x8xbf16>, vector<8x8xbf16>, vector<8x8xf32> -> vector<8x8xf32>
    %225 = arith.mulf %213, %213 : vector<8x8xf32>
    %226 = arith.truncf %225 : vector<8x8xf32> to vector<8x8xbf16>
    %227 = arith.truncf %183 : vector<8x8xf32> to vector<8x8xbf16>
    %cst_70 = arith.constant dense<0.000000e+00> : vector<8x8xf32>
    %228 = tpu.matmul %226, %227, %cst_70 {dimension_numbers = #tpu.dot_dimension_numbers<[1], [0], [0], [1], [0, 0, 1, 1], [], []>} : vector<8x8xbf16>, vector<8x8xbf16>, vector<8x8xf32> -> vector<8x8xf32>
    %229 = arith.addf %224, %228 : vector<8x8xf32>
    %230 = vector.extract_strided_slice %31 {offsets = [0, 16], sizes = [8, 8], strides = [1, 1]} : vector<8x32xf32> to vector<8x8xf32>
    %231 = arith.addf %230, %219 : vector<8x8xf32>
    %c0_71 = arith.constant 0 : index
    %c0_72 = arith.constant 0 : index
    %c16 = arith.constant 16 : index
    %232 = vector.load %arg9[%c0_71, %c0_72, %c16] : memref<1x8x32xf32, #tpu.memory_space<vmem>>, vector<1x8x8xf32>
    %233 = vector.shape_cast %232 : vector<1x8x8xf32> to vector<8x8xf32>
    %234 = vector.shape_cast %231 : vector<8x8xf32> to vector<1x8x8xf32>
    tpu.vector_store %arg9[%c0_71, %c0_72, %c16], %234 {strides = array<i32>} : memref<1x8x32xf32, #tpu.memory_space<vmem>>, vector<1x8x8xf32>,
    %235 = vector.extract_strided_slice %43 {offsets = [0, 16], sizes = [8, 8], strides = [1, 1]} : vector<8x32xf32> to vector<8x8xf32>
    %236 = arith.addf %235, %229 : vector<8x8xf32>
    %c0_73 = arith.constant 0 : index
    %c0_74 = arith.constant 0 : index
    %c16_75 = arith.constant 16 : index
    %237 = vector.load %arg10[%c0_73, %c0_74, %c16_75] : memref<1x8x32xf32, #tpu.memory_space<vmem>>, vector<1x8x8xf32>
    %238 = vector.shape_cast %237 : vector<1x8x8xf32> to vector<8x8xf32>
    %239 = vector.shape_cast %236 : vector<8x8xf32> to vector<1x8x8xf32>
    tpu.vector_store %arg10[%c0_73, %c0_74, %c16_75], %239 {strides = array<i32>} : memref<1x8x32xf32, #tpu.memory_space<vmem>>, vector<1x8x8xf32>,
    %240 = vector.extract_strided_slice %46 {offsets = [0, 24], sizes = [8, 8], strides = [1, 1]} : vector<8x96xf32> to vector<8x8xf32>
    %241 = vector.extract_strided_slice %50 {offsets = [0, 24], sizes = [8, 8], strides = [1, 1]} : vector<8x96xf32> to vector<8x8xf32>
    %242 = vector.extract_strided_slice %46 {offsets = [0, 56], sizes = [8, 8], strides = [1, 1]} : vector<8x96xf32> to vector<8x8xf32>
    %243 = vector.extract_strided_slice %50 {offsets = [0, 56], sizes = [8, 8], strides = [1, 1]} : vector<8x96xf32> to vector<8x8xf32>
    %244 = vector.extract_strided_slice %46 {offsets = [0, 88], sizes = [8, 8], strides = [1, 1]} : vector<8x96xf32> to vector<8x8xf32>
    %245 = vector.extract_strided_slice %50 {offsets = [0, 88], sizes = [8, 8], strides = [1, 1]} : vector<8x96xf32> to vector<8x8xf32>
    %246 = tpu.transpose %242, [1, 0] : vector<8x8xf32> -> vector<8x8xf32>
    %cst_76 = arith.constant dense<0.000000e+00> : vector<8x8xf32>
    %247 = tpu.matmul %240, %246, %cst_76 {dimension_numbers = #tpu.dot_dimension_numbers<[1], [0], [0], [1], [0, 0, 1, 1], [], []>} : vector<8x8xf32>, vector<8x8xf32>, vector<8x8xf32> -> vector<8x8xf32>
    %cst_77 = arith.constant 0.176776692 : f32
    %248 = vector.broadcast %cst_77 : f32 to vector<8x8xf32>
    %249 = arith.mulf %247, %248 : vector<8x8xf32>
    %250 = arith.mulf %242, %242 : vector<8x8xf32>
    %251 = arith.addf %250, %243 : vector<8x8xf32>
    %252 = arith.truncf %251 : vector<8x8xf32> to vector<8x8xbf16>
    %253 = arith.truncf %241 : vector<8x8xf32> to vector<8x8xbf16>
    %254 = tpu.transpose %252, [1, 0] : vector<8x8xbf16> -> vector<8x8xbf16>
    %cst_78 = arith.constant dense<0.000000e+00> : vector<8x8xf32>
    %255 = tpu.matmul %253, %254, %cst_78 {dimension_numbers = #tpu.dot_dimension_numbers<[1], [0], [0], [1], [0, 0, 1, 1], [], []>} : vector<8x8xbf16>, vector<8x8xbf16>, vector<8x8xf32> -> vector<8x8xf32>
    %256 = arith.mulf %240, %240 : vector<8x8xf32>
    %257 = arith.truncf %256 : vector<8x8xf32> to vector<8x8xbf16>
    %258 = arith.truncf %243 : vector<8x8xf32> to vector<8x8xbf16>
    %259 = tpu.transpose %258, [1, 0] : vector<8x8xbf16> -> vector<8x8xbf16>
    %cst_79 = arith.constant dense<0.000000e+00> : vector<8x8xf32>
    %260 = tpu.matmul %257, %259, %cst_79 {dimension_numbers = #tpu.dot_dimension_numbers<[1], [0], [0], [1], [0, 0, 1, 1], [], []>} : vector<8x8xbf16>, vector<8x8xbf16>, vector<8x8xf32> -> vector<8x8xf32>
    %261 = arith.addf %255, %260 : vector<8x8xf32>
    %cst_80 = arith.constant 3.125000e-02 : f32
    %262 = vector.broadcast %cst_80 : f32 to vector<8x8xf32>
    %263 = arith.mulf %261, %262 : vector<8x8xf32>
    %cst_81 = arith.constant -1.000000e+30 : f32
    %264 = vector.broadcast %cst_81 : f32 to vector<8x8xf32>
    %265 = arith.select %53, %264, %249 : vector<8x8xi1>, vector<8x8xf32>
    %cst_82 = arith.constant dense<0xFF800000> : vector<8xf32>
    %266 = vector.multi_reduction <maximumf>, %265, %cst_82 [1] : vector<8x8xf32> to vector<8xf32>
    %267 = vector.shape_cast %266 : vector<8xf32> to vector<8x1xf32>
    %268 = vector.broadcast %267 : vector<8x1xf32> to vector<8x8xf32>
    %269 = arith.subf %265, %268 : vector<8x8xf32>
    %270 = math.exp %269 : vector<8x8xf32>
    %cst_83 = arith.constant dense<0.000000e+00> : vector<8xf32>
    %271 = vector.multi_reduction <add>, %270, %cst_83 [1] : vector<8x8xf32> to vector<8xf32>
    %272 = vector.shape_cast %271 : vector<8xf32> to vector<8x1xf32>
    %273 = tpu.reciprocal %272 {approx = true} : vector<8x1xf32> -> vector<8x1xf32>
    %274 = vector.broadcast %273 : vector<8x1xf32> to vector<8x8xf32>
    %275 = arith.mulf %270, %274 : vector<8x8xf32>
    %cst_84 = arith.constant 1.000000e+00 : f32
    %276 = vector.broadcast %cst_84 : f32 to vector<8x8xf32>
    %277 = arith.subf %276, %275 : vector<8x8xf32>
    %278 = arith.mulf %275, %277 : vector<8x8xf32>
    %279 = arith.mulf %278, %278 : vector<8x8xf32>
    %280 = arith.mulf %279, %263 : vector<8x8xf32>
    %cst_85 = arith.constant dense<0.000000e+00> : vector<8x8xf32>
    %281 = tpu.matmul %275, %244, %cst_85 {dimension_numbers = #tpu.dot_dimension_numbers<[1], [0], [0], [1], [0, 0, 1, 1], [], []>} : vector<8x8xf32>, vector<8x8xf32>, vector<8x8xf32> -> vector<8x8xf32>
    %282 = arith.mulf %244, %244 : vector<8x8xf32>
    %283 = arith.addf %282, %245 : vector<8x8xf32>
    %284 = arith.truncf %283 : vector<8x8xf32> to vector<8x8xbf16>
    %285 = arith.truncf %280 : vector<8x8xf32> to vector<8x8xbf16>
    %cst_86 = arith.constant dense<0.000000e+00> : vector<8x8xf32>
    %286 = tpu.matmul %285, %284, %cst_86 {dimension_numbers = #tpu.dot_dimension_numbers<[1], [0], [0], [1], [0, 0, 1, 1], [], []>} : vector<8x8xbf16>, vector<8x8xbf16>, vector<8x8xf32> -> vector<8x8xf32>
    %287 = arith.mulf %275, %275 : vector<8x8xf32>
    %288 = arith.truncf %287 : vector<8x8xf32> to vector<8x8xbf16>
    %289 = arith.truncf %245 : vector<8x8xf32> to vector<8x8xbf16>
    %cst_87 = arith.constant dense<0.000000e+00> : vector<8x8xf32>
    %290 = tpu.matmul %288, %289, %cst_87 {dimension_numbers = #tpu.dot_dimension_numbers<[1], [0], [0], [1], [0, 0, 1, 1], [], []>} : vector<8x8xbf16>, vector<8x8xbf16>, vector<8x8xf32> -> vector<8x8xf32>
    %291 = arith.addf %286, %290 : vector<8x8xf32>
    %292 = vector.extract_strided_slice %31 {offsets = [0, 24], sizes = [8, 8], strides = [1, 1]} : vector<8x32xf32> to vector<8x8xf32>
    %293 = arith.addf %292, %281 : vector<8x8xf32>
    %c0_88 = arith.constant 0 : index
    %c0_89 = arith.constant 0 : index
    %c24 = arith.constant 24 : index
    %294 = vector.load %arg9[%c0_88, %c0_89, %c24] : memref<1x8x32xf32, #tpu.memory_space<vmem>>, vector<1x8x8xf32>
    %295 = vector.shape_cast %294 : vector<1x8x8xf32> to vector<8x8xf32>
    %296 = vector.shape_cast %293 : vector<8x8xf32> to vector<1x8x8xf32>
    tpu.vector_store %arg9[%c0_88, %c0_89, %c24], %296 {strides = array<i32>} : memref<1x8x32xf32, #tpu.memory_space<vmem>>, vector<1x8x8xf32>,
    %297 = vector.extract_strided_slice %43 {offsets = [0, 24], sizes = [8, 8], strides = [1, 1]} : vector<8x32xf32> to vector<8x8xf32>
    %298 = arith.addf %297, %291 : vector<8x8xf32>
    %c0_90 = arith.constant 0 : index
    %c0_91 = arith.constant 0 : index
    %c24_92 = arith.constant 24 : index
    %299 = vector.load %arg10[%c0_90, %c0_91, %c24_92] : memref<1x8x32xf32, #tpu.memory_space<vmem>>, vector<1x8x8xf32>
    %300 = vector.shape_cast %299 : vector<1x8x8xf32> to vector<8x8xf32>
    %301 = vector.shape_cast %298 : vector<8x8xf32> to vector<1x8x8xf32>
    tpu.vector_store %arg10[%c0_90, %c0_91, %c24_92], %301 {strides = array<i32>} : memref<1x8x32xf32, #tpu.memory_space<vmem>>, vector<1x8x8xf32>,
    return
  }
  func.func @transform_0(%arg0: i32) -> (i32, i32, i32) {
    %c0_i32 = arith.constant 0 : i32
    %c0_i32_0 = arith.constant 0 : i32
    %c0_i32_1 = arith.constant 0 : i32
    return %arg0, %c0_i32, %c0_i32_0 : i32, i32, i32
  }
  func.func @transform_1(%arg0: i32) -> (i32, i32, i32) {
    %c0_i32 = arith.constant 0 : i32
    %c0_i32_0 = arith.constant 0 : i32
    %c0_i32_1 = arith.constant 0 : i32
    return %arg0, %c0_i32, %c0_i32_0 : i32, i32, i32
  }
  func.func @transform_2(%arg0: i32) -> (i32, i32) {
    %c0_i32 = arith.constant 0 : i32
    %c0_i32_0 = arith.constant 0 : i32
    %c0_i32_1 = arith.constant 0 : i32
    return %c0_i32, %c0_i32_0 : i32, i32
  }
  func.func @transform_3(%arg0: i32) -> (i32, i32) {
    %c0_i32 = arith.constant 0 : i32
    %c0_i32_0 = arith.constant 0 : i32
    %c0_i32_1 = arith.constant 0 : i32
    return %c0_i32, %c0_i32_0 : i32, i32
  }
  func.func @transform_4(%arg0: i32) -> (i32, i32) {
    %c0_i32 = arith.constant 0 : i32
    %c0_i32_0 = arith.constant 0 : i32
    %c0_i32_1 = arith.constant 0 : i32
    return %c0_i32, %c0_i32_0 : i32, i32
  }
  func.func @transform_5(%arg0: i32) -> (i32, i32) {
    %c0_i32 = arith.constant 0 : i32
    %c0_i32_0 = arith.constant 0 : i32
    %c0_i32_1 = arith.constant 0 : i32
    return %c0_i32, %c0_i32_0 : i32, i32
  }
  func.func @transform_6(%arg0: i32) -> (i32, i32) {
    %c0_i32 = arith.constant 0 : i32
    %c0_i32_0 = arith.constant 0 : i32
    %c0_i32_1 = arith.constant 0 : i32
    return %c0_i32, %c0_i32_0 : i32, i32
  }
  func.func @transform_7(%arg0: i32) -> (i32, i32) {
    %c0_i32 = arith.constant 0 : i32
    %c0_i32_0 = arith.constant 0 : i32
    %c0_i32_1 = arith.constant 0 : i32
    return %c0_i32, %c0_i32_0 : i32, i32
  }
  func.func @transform_8(%arg0: i32) -> (i32, i32, i32) {
    %c0_i32 = arith.constant 0 : i32
    %c0_i32_0 = arith.constant 0 : i32
    %c0_i32_1 = arith.constant 0 : i32
    return %arg0, %c0_i32, %c0_i32_0 : i32, i32, i32
  }
  func.func @transform_9(%arg0: i32) -> (i32, i32, i32) {
    %c0_i32 = arith.constant 0 : i32
    %c0_i32_0 = arith.constant 0 : i32
    %c0_i32_1 = arith.constant 0 : i32
    return %arg0, %c0_i32, %c0_i32_0 : i32, i32, i32
  }
}

module attributes {stable_mosaic.version = 11 : i64} {
  func.func @_ln_fc_relu_res_kernel(%arg0: i32, %arg1: memref<16x32xf32, #tpu.memory_space<vmem>>, %arg2: memref<16x32xf32, #tpu.memory_space<vmem>>, %arg3: memref<1x32xf32, #tpu.memory_space<vmem>>, %arg4: memref<1x32xf32, #tpu.memory_space<vmem>>, %arg5: memref<1x32xf32, #tpu.memory_space<vmem>>, %arg6: memref<1x32xf32, #tpu.memory_space<vmem>>, %arg7: memref<32x32xf32, #tpu.memory_space<vmem>>, %arg8: memref<64x32xbf16, #tpu.memory_space<vmem>>, %arg9: memref<1x32xf32, #tpu.memory_space<vmem>>, %arg10: memref<1x32xf32, #tpu.memory_space<vmem>>, %arg11: memref<16x32xf32, #tpu.memory_space<vmem>>, %arg12: memref<16x32xf32, #tpu.memory_space<vmem>>) attributes {dimension_semantics = [#tpu.dimension_semantics<parallel>], iteration_bounds = array<i64: 1>, scalar_prefetch = 0 : i64, scratch_operands = 0 : i64, tpu.core_type = #tpu.core_type<tc>, window_params = [{transform_indices = @transform_0, window_bounds = array<i64: 16, 32>}, {transform_indices = @transform_1, window_bounds = array<i64: 16, 32>}, {pipeline_mode = #tpu.pipeline_mode<synchronous>, transform_indices = @transform_2, window_bounds = array<i64: 1, 32>}, {pipeline_mode = #tpu.pipeline_mode<synchronous>, transform_indices = @transform_3, window_bounds = array<i64: 1, 32>}, {pipeline_mode = #tpu.pipeline_mode<synchronous>, transform_indices = @transform_4, window_bounds = array<i64: 1, 32>}, {pipeline_mode = #tpu.pipeline_mode<synchronous>, transform_indices = @transform_5, window_bounds = array<i64: 1, 32>}, {pipeline_mode = #tpu.pipeline_mode<synchronous>, transform_indices = @transform_6, window_bounds = array<i64: 32, 32>}, {pipeline_mode = #tpu.pipeline_mode<synchronous>, transform_indices = @transform_7, window_bounds = array<i64: 64, 32>}, {pipeline_mode = #tpu.pipeline_mode<synchronous>, transform_indices = @transform_8, window_bounds = array<i64: 1, 32>}, {pipeline_mode = #tpu.pipeline_mode<synchronous>, transform_indices = @transform_9, window_bounds = array<i64: 1, 32>}, {transform_indices = @transform_10, window_bounds = array<i64: 16, 32>}, {transform_indices = @transform_11, window_bounds = array<i64: 16, 32>}]} {
    %c0 = arith.constant 0 : index
    %c0_0 = arith.constant 0 : index
    %0 = vector.load %arg1[%c0, %c0_0] : memref<16x32xf32, #tpu.memory_space<vmem>>, vector<16x32xf32>
    %c0_1 = arith.constant 0 : index
    %c0_2 = arith.constant 0 : index
    %1 = vector.load %arg2[%c0_1, %c0_2] : memref<16x32xf32, #tpu.memory_space<vmem>>, vector<16x32xf32>
    %c0_3 = arith.constant 0 : index
    %c0_4 = arith.constant 0 : index
    %2 = vector.load %arg3[%c0_3, %c0_4] : memref<1x32xf32, #tpu.memory_space<vmem>>, vector<1x32xf32>
    %c0_5 = arith.constant 0 : index
    %c0_6 = arith.constant 0 : index
    %3 = vector.load %arg4[%c0_5, %c0_6] : memref<1x32xf32, #tpu.memory_space<vmem>>, vector<1x32xf32>
    %c0_7 = arith.constant 0 : index
    %c0_8 = arith.constant 0 : index
    %4 = vector.load %arg5[%c0_7, %c0_8] : memref<1x32xf32, #tpu.memory_space<vmem>>, vector<1x32xf32>
    %c0_9 = arith.constant 0 : index
    %c0_10 = arith.constant 0 : index
    %5 = vector.load %arg6[%c0_9, %c0_10] : memref<1x32xf32, #tpu.memory_space<vmem>>, vector<1x32xf32>
    %cst = arith.constant dense<0.000000e+00> : vector<16xf32>
    %6 = vector.multi_reduction <add>, %0, %cst [1] : vector<16x32xf32> to vector<16xf32>
    %7 = vector.shape_cast %6 : vector<16xf32> to vector<16x1xf32>
    %cst_11 = arith.constant 3.200000e+01 : f32
    %8 = vector.broadcast %cst_11 : f32 to vector<16x1xf32>
    %9 = arith.divf %7, %8 : vector<16x1xf32>
    %10 = arith.mulf %0, %0 : vector<16x32xf32>
    %cst_12 = arith.constant dense<0.000000e+00> : vector<16xf32>
    %11 = vector.multi_reduction <add>, %10, %cst_12 [1] : vector<16x32xf32> to vector<16xf32>
    %12 = vector.shape_cast %11 : vector<16xf32> to vector<16x1xf32>
    %cst_13 = arith.constant 3.200000e+01 : f32
    %13 = vector.broadcast %cst_13 : f32 to vector<16x1xf32>
    %14 = arith.divf %12, %13 : vector<16x1xf32>
    %15 = arith.mulf %9, %9 : vector<16x1xf32>
    %16 = arith.subf %14, %15 : vector<16x1xf32>
    %cst_14 = arith.constant 0.000000e+00 : f32
    %17 = vector.broadcast %cst_14 : f32 to vector<16x1xf32>
    %18 = arith.maximumf %16, %17 : vector<16x1xf32>
    %cst_15 = arith.constant 9.99999974E-6 : f32
    %19 = vector.broadcast %cst_15 : f32 to vector<16x1xf32>
    %20 = arith.addf %18, %19 : vector<16x1xf32>
    %21 = math.rsqrt %20 : vector<16x1xf32>
    %22 = vector.broadcast %9 : vector<16x1xf32> to vector<16x32xf32>
    %23 = arith.subf %0, %22 : vector<16x32xf32>
    %24 = vector.broadcast %21 : vector<16x1xf32> to vector<16x32xf32>
    %25 = arith.mulf %23, %24 : vector<16x32xf32>
    %26 = vector.broadcast %2 : vector<1x32xf32> to vector<16x32xf32>
    %27 = arith.mulf %26, %25 : vector<16x32xf32>
    %28 = vector.broadcast %4 : vector<1x32xf32> to vector<16x32xf32>
    %29 = arith.addf %27, %28 : vector<16x32xf32>
    %30 = arith.mulf %2, %2 : vector<1x32xf32>
    %31 = vector.broadcast %30 : vector<1x32xf32> to vector<16x32xf32>
    %32 = arith.mulf %31, %1 : vector<16x32xf32>
    %33 = arith.mulf %21, %21 : vector<16x1xf32>
    %34 = vector.broadcast %33 : vector<16x1xf32> to vector<16x32xf32>
    %35 = arith.mulf %32, %34 : vector<16x32xf32>
    %36 = arith.mulf %25, %25 : vector<16x32xf32>
    %37 = vector.broadcast %3 : vector<1x32xf32> to vector<16x32xf32>
    %38 = arith.mulf %37, %36 : vector<16x32xf32>
    %39 = arith.addf %35, %38 : vector<16x32xf32>
    %40 = vector.broadcast %5 : vector<1x32xf32> to vector<16x32xf32>
    %41 = arith.addf %39, %40 : vector<16x32xf32>
    %c0_16 = arith.constant 0 : index
    %c0_17 = arith.constant 0 : index
    %42 = vector.load %arg7[%c0_16, %c0_17] : memref<32x32xf32, #tpu.memory_space<vmem>>, vector<32x32xf32>
    %c0_18 = arith.constant 0 : index
    %c0_19 = arith.constant 0 : index
    %43 = vector.load %arg8[%c0_18, %c0_19] : memref<64x32xbf16, #tpu.memory_space<vmem>>, vector<64x32xbf16>
    %cst_20 = arith.constant dense<0.000000e+00> : vector<16x32xf32>
    %44 = tpu.matmul %29, %42, %cst_20 {dimension_numbers = #tpu.dot_dimension_numbers<[1], [0], [0], [1], [0, 0, 1, 1], [], []>} : vector<16x32xf32>, vector<32x32xf32>, vector<16x32xf32> -> vector<16x32xf32>
    %45 = arith.mulf %29, %29 : vector<16x32xf32>
    %46 = tpu.concatenate %41, %45 in 1 : vector<16x32xf32>, vector<16x32xf32> -> vector<16x64xf32>
    %47 = arith.truncf %46 : vector<16x64xf32> to vector<16x64xbf16>
    %cst_21 = arith.constant dense<0.000000e+00> : vector<16x32xf32>
    %48 = tpu.matmul %47, %43, %cst_21 {dimension_numbers = #tpu.dot_dimension_numbers<[1], [0], [0], [1], [0, 0, 1, 1], [], []>} : vector<16x64xbf16>, vector<64x32xbf16>, vector<16x32xf32> -> vector<16x32xf32>
    %c0_22 = arith.constant 0 : index
    %c0_23 = arith.constant 0 : index
    %49 = vector.load %arg9[%c0_22, %c0_23] : memref<1x32xf32, #tpu.memory_space<vmem>>, vector<1x32xf32>
    %50 = vector.broadcast %49 : vector<1x32xf32> to vector<16x32xf32>
    %51 = arith.addf %44, %50 : vector<16x32xf32>
    %c0_24 = arith.constant 0 : index
    %c0_25 = arith.constant 0 : index
    %52 = vector.load %arg10[%c0_24, %c0_25] : memref<1x32xf32, #tpu.memory_space<vmem>>, vector<1x32xf32>
    %53 = vector.broadcast %52 : vector<1x32xf32> to vector<16x32xf32>
    %54 = arith.addf %48, %53 : vector<16x32xf32>
    %cst_26 = arith.constant 0.000000e+00 : f32
    %55 = vector.broadcast %cst_26 : f32 to vector<16x32xf32>
    %56 = arith.cmpf ogt, %51, %55 : vector<16x32xf32>
    %57 = arith.extui %56 : vector<16x32xi1> to vector<16x32xi32>
    %58 = arith.sitofp %57 : vector<16x32xi32> to vector<16x32xf32>
    %59 = arith.mulf %51, %58 : vector<16x32xf32>
    %60 = arith.mulf %54, %58 : vector<16x32xf32>
    %61 = arith.addf %29, %59 : vector<16x32xf32>
    %62 = arith.addf %41, %60 : vector<16x32xf32>
    %63 = arith.negf %61 : vector<16x32xf32>
    %64 = math.exp %63 : vector<16x32xf32>
    %cst_27 = arith.constant 1.000000e+00 : f32
    %65 = vector.broadcast %cst_27 : f32 to vector<16x32xf32>
    %66 = arith.addf %65, %64 : vector<16x32xf32>
    %67 = arith.divf %65, %66 : vector<16x32xf32>
    %cst_28 = arith.constant 1.000000e+00 : f32
    %68 = vector.broadcast %cst_28 : f32 to vector<16x32xf32>
    %69 = arith.subf %68, %67 : vector<16x32xf32>
    %70 = arith.mulf %67, %69 : vector<16x32xf32>
    %71 = arith.mulf %70, %70 : vector<16x32xf32>
    %72 = arith.mulf %71, %62 : vector<16x32xf32>
    %c0_29 = arith.constant 0 : index
    %c0_30 = arith.constant 0 : index
    %73 = vector.load %arg11[%c0_29, %c0_30] : memref<16x32xf32, #tpu.memory_space<vmem>>, vector<16x32xf32>
    tpu.vector_store %arg11[%c0_29, %c0_30], %67 {strides = array<i32>} : memref<16x32xf32, #tpu.memory_space<vmem>>, vector<16x32xf32>,
    %c0_31 = arith.constant 0 : index
    %c0_32 = arith.constant 0 : index
    %74 = vector.load %arg12[%c0_31, %c0_32] : memref<16x32xf32, #tpu.memory_space<vmem>>, vector<16x32xf32>
    tpu.vector_store %arg12[%c0_31, %c0_32], %72 {strides = array<i32>} : memref<16x32xf32, #tpu.memory_space<vmem>>, vector<16x32xf32>,
    return
  }
  func.func @transform_0(%arg0: i32) -> (i32, i32) {
    %c0_i32 = arith.constant 0 : i32
    %c0_i32_0 = arith.constant 0 : i32
    return %arg0, %c0_i32 : i32, i32
  }
  func.func @transform_1(%arg0: i32) -> (i32, i32) {
    %c0_i32 = arith.constant 0 : i32
    %c0_i32_0 = arith.constant 0 : i32
    return %arg0, %c0_i32 : i32, i32
  }
  func.func @transform_2(%arg0: i32) -> (i32, i32) {
    %c0_i32 = arith.constant 0 : i32
    %c0_i32_0 = arith.constant 0 : i32
    %c0_i32_1 = arith.constant 0 : i32
    return %c0_i32, %c0_i32_0 : i32, i32
  }
  func.func @transform_3(%arg0: i32) -> (i32, i32) {
    %c0_i32 = arith.constant 0 : i32
    %c0_i32_0 = arith.constant 0 : i32
    %c0_i32_1 = arith.constant 0 : i32
    return %c0_i32, %c0_i32_0 : i32, i32
  }
  func.func @transform_4(%arg0: i32) -> (i32, i32) {
    %c0_i32 = arith.constant 0 : i32
    %c0_i32_0 = arith.constant 0 : i32
    %c0_i32_1 = arith.constant 0 : i32
    return %c0_i32, %c0_i32_0 : i32, i32
  }
  func.func @transform_5(%arg0: i32) -> (i32, i32) {
    %c0_i32 = arith.constant 0 : i32
    %c0_i32_0 = arith.constant 0 : i32
    %c0_i32_1 = arith.constant 0 : i32
    return %c0_i32, %c0_i32_0 : i32, i32
  }
  func.func @transform_6(%arg0: i32) -> (i32, i32) {
    %c0_i32 = arith.constant 0 : i32
    %c0_i32_0 = arith.constant 0 : i32
    %c0_i32_1 = arith.constant 0 : i32
    return %c0_i32, %c0_i32_0 : i32, i32
  }
  func.func @transform_7(%arg0: i32) -> (i32, i32) {
    %c0_i32 = arith.constant 0 : i32
    %c0_i32_0 = arith.constant 0 : i32
    %c0_i32_1 = arith.constant 0 : i32
    return %c0_i32, %c0_i32_0 : i32, i32
  }
  func.func @transform_8(%arg0: i32) -> (i32, i32) {
    %c0_i32 = arith.constant 0 : i32
    %c0_i32_0 = arith.constant 0 : i32
    %c0_i32_1 = arith.constant 0 : i32
    return %c0_i32, %c0_i32_0 : i32, i32
  }
  func.func @transform_9(%arg0: i32) -> (i32, i32) {
    %c0_i32 = arith.constant 0 : i32
    %c0_i32_0 = arith.constant 0 : i32
    %c0_i32_1 = arith.constant 0 : i32
    return %c0_i32, %c0_i32_0 : i32, i32
  }
  func.func @transform_10(%arg0: i32) -> (i32, i32) {
    %c0_i32 = arith.constant 0 : i32
    %c0_i32_0 = arith.constant 0 : i32
    return %arg0, %c0_i32 : i32, i32
  }
  func.func @transform_11(%arg0: i32) -> (i32, i32) {
    %c0_i32 = arith.constant 0 : i32
    %c0_i32_0 = arith.constant 0 : i32
    return %arg0, %c0_i32 : i32, i32
  }
}

</mosaic_0001>

<bundles_post_ra>
// kernel: decoder_vmp_forward.8
= control target key start
LH: loop header
LB: loop body
LE: loop exit
PB: predicated region body
PF: predicated region fallthrough
CT: control target
= control target key end

     0   :  { %vm46_vm0 = vcmask 261120   ;;  %v81_v8 = vlaneseq  ;;  %v416_v20 = vmov 0.0   ;;  %vm417_vm1 = vmmov 0   ;;  %s576_s0 = inlined_call_operand.vmem [shape: f32[16,32], index: 0, kind: input, shape index: {}]   ;;  %s577_s2 = inlined_call_operand.vmem [shape: f32[1,32], index: 2, kind: input, shape index: {}]   ;;  %s578_s6 = inlined_call_operand.vmem [shape: f32[32,32], index: 6, kind: input, shape index: {}]   ;;  %s579_s7 = inlined_call_operand.vmem [shape: bf16[64,32], index: 7, kind: input, shape index: {}]   ;;  %s580_s1 = inlined_call_operand.vmem [shape: f32[16,32], index: 1, kind: input, shape index: {}]   ;;  %s581_s3 = inlined_call_operand.vmem [shape: f32[1,32], index: 3, kind: input, shape index: {}]   ;;  %s582_s4 = inlined_call_operand.vmem [shape: f32[1,32], index: 4, kind: input, shape index: {}]   ;;  %s583_s5 = inlined_call_operand.vmem [shape: f32[1,32], index: 5, kind: input, shape index: {}]   ;;  %s584_s8 = inlined_call_operand.vmem [shape: f32[1,32], index: 8, kind: input, shape index: {}]   ;;  %s585_s10 = inlined_call_operand.vmem [shape: f32[16,32], index: 10, kind: output, shape index: {0}]   ;;  %s586_s9 = inlined_call_operand.vmem [shape: f32[1,32], index: 9, kind: input, shape index: {}]   ;;  %s587_s11 = inlined_call_operand.vmem [shape: f32[16,32], index: 11, kind: output, shape index: {1}]  }
   0x1   :  { %v482_v0 = vld [vmem:[%s576_s0] sm:$0xff]  ;;  %v487_v1 = vld [vmem:[%s576_s0 + $0x8] sm:$0xff]  ;;  %v131_v17 = vld [vmem:[%s578_s6 + $0x10] sm:$0xff]  ;;  %380 = vmatprep.subr.bf16.mxu1 %v416_v20  ;;  %388 = vmatprep.mubr.msk.bf16.mxu1 %vm417_vm1, %v416_v20  ;;  %vm273_vm2 = vcmask 523264  }
   0x2   :  { %v47_v2 = vsel %vm46_vm0, %v482_v0, 0.0  ;;  %v56_v3 = vmul.f32 %v482_v0, %v482_v0  ;;  %v57_v4 = vmul.f32 %v487_v1, %v487_v1  ;;  %v50_v6 = vsel %vm46_vm0, %v487_v1, 0.0  ;;  %v42_v10 = vld [vmem:[%s577_s2] sm:$0x1]  ;;  %v130_v15 = vld [vmem:[%s578_s6 + $0x8] sm:$0xff]  ;;  %v132_v18 = vld [vmem:[%s578_s6 + $0x18] sm:$0xff] }
   0x3   :  { %48 = vadd.xlane.f32.xlu0 %v47_v2  ;;  %v82_v9 = vshrl.u32 %v81_v8, 7  ;;  %v96_v12 = vmul.f32 %v42_v10, %v42_v10  ;;  %v129_v14 = vld [vmem:[%s578_s6] sm:$0xff]  ;;  %v396_v19 = vpack.c.bf16 %v132_v18, %v131_v17  ;;  %v409_v22 = vld [vmem:[%s579_s7 + $0x8] sm:$0xff]   ;;  %v410_v23 = vld [vmem:[%s579_s7 + $0x10] sm:$0xff]  }
   0x4   :  { %v58_v5 = vsel %vm46_vm0, %v56_v3, 0.0  ;;  %v61_v7 = vsel %vm46_vm0, %v57_v4, 0.0  ;;  %v392_v16 = vpack.c.bf16 %v130_v15, %v129_v14  ;;  %v408_v21 = vld [vmem:[%s579_s7] sm:$0xff]   ;;  %v41_v42 = vld [vmem:[%s580_s1 + $0x8] sm:$0xff]  ;;  %v411_v55 = vld [vmem:[%s579_s7 + $0x18] sm:$0xff]  }
   0x5   :  { %59 = vadd.xlane.f32.xlu1 %v58_v5  ;;  %v83_v11 = vsub.s32 0, %v82_v9  ;;  %381 = vmatpush3.bf16.msra.mxu1 %v408_v21  ;;  %v40_v40 = vld [vmem:[%s580_s1] sm:$0xff] }
   0x6   :  { %393 = vmatprep.subr.bf16.mxu0 %v392_v16  ;;  %382 = vmatprep.subr.bf16.mxu1 %v416_v20  ;;  %v345_v48 = vld [vmem:[%s581_s3] ss:$0 sm:$0xff]  ;;  %s418_s3 = smov 32  }
   0x7   :  { %51 = vadd.xlane.f32.xlu0 %v50_v6  ;;  %v101_v13 = vrot.slane %v96_v12, %v83_v11  ;;  %395 = vmatpush3.bf16.msra.mxu0 %v392_v16  ;;  %v84_v43 = vrot.slane %v42_v10, %v83_v11  ;;  %v344_v49 = vld [vmem:[%s582_s4] ss:$0 sm:$0xff] }
   0x8   :  { %397 = vmatprep.subr.bf16.mxu0 %v396_v19  ;;  %v347_v16 = vld [vmem:[%s584_s8] ss:$0 sm:$0xff] }
   0x9   :  { %62 = vadd.xlane.f32.xlu1 %v61_v7  ;;  %383 = vmatpush3.bf16.msra.mxu1 %v409_v22  ;;  %v103_v44 = vmul.f32 %v101_v13, %v40_v40  ;;  %v104_v50 = vmul.f32 %v101_v13, %v41_v42  ;;  %v346_v7 = vld [vmem:[%s583_s5] ss:$0 sm:$0xff] }
   0xa   :  { %384 = vmatprep.subr.bf16.mxu1 %v416_v20 }
   0xb   :  { %399 = vmatpush3.bf16.msra.mxu0 %v396_v19 }
   0xd   :  { %385 = vmatpush3.bf16.msra.mxu1 %v410_v23 }
   0xe   :  { %386 = vmatprep.subr.bf16.mxu1 %v416_v20 }
  0x11   :  { %387 = vmatpush3.bf16.msra.mxu1 %v411_v55 }
  0x90   :  { %v49_v24 = vpop.xlane.xlu0 %48 }
  0x91   :  { %v54_v25 = vmul.f32 0.03125, %v49_v24 }
  0x92   :  { %v60_v26 = vpop.xlane.xlu1 %59 }
  0x93   :  { %v66_v27 = vmul.f32 %v54_v25, %v54_v25  ;;  %v64_v28 = vmul.f32 0.03125, %v60_v26  ;;  %v76_v41 = vsub.f32 %v482_v0, %v54_v25 }
  0x94   :  { %v52_v29 = vpop.xlane.xlu0 %51 }
  0x95   :  { %v68_v30 = vsub.f32 %v64_v28, %v66_v27  ;;  %v55_v31 = vmul.f32 0.03125, %v52_v29  ;;  %v350_v28 = vld [vmem:[%s586_s9] ss:$0 sm:$0xff] }
  0x96   :  { %v63_v32 = vpop.xlane.xlu1 %62 }
  0x97   :  { %v70_v33 = vmax.f32 %v68_v30, 0.0  ;;  %v67_v34 = vmul.f32 %v55_v31, %v55_v31  ;;  %v65_v35 = vmul.f32 0.03125, %v63_v32  ;;  %v77_v51 = vsub.f32 %v487_v1, %v55_v31 }
  0x99   :  { %v72_v36 = vadd.f32 1e-05, %v70_v33  ;;  %v69_v37 = vsub.f32 %v65_v35, %v67_v34 }
  0x9b   :  { %412 = vrsqrt.f32 %v72_v36  ;;  %v71_v38 = vmax.f32 %v69_v37, 0.0 }
  0x9d   :  { %v73_v39 = vadd.f32 1e-05, %v71_v38 }
  0x9f   :  { %414 = vrsqrt.f32 %v73_v39 }
  0xa5   :  { %v413_v45 = vpop.eup %412 }
  0xa6   :  { %v105_v46 = vmul.f32 %v413_v45, %v413_v45  ;;  %v78_v47 = vmul.f32 %v413_v45, %v76_v41 }
  0xa8   :  { %v86_v52 = vmul.f32 %v84_v43, %v78_v47  ;;  %v109_v53 = vmul.f32 %v78_v47, %v78_v47  ;;  %v107_v54 = vmul.f32 %v105_v46, %v103_v44 }
  0xa9   :  { %v415_v56 = vpop.eup %414 }
  0xaa   :  { %v106_v57 = vmul.f32 %v415_v56, %v415_v56  ;;  %v79_v58 = vmul.f32 %v415_v56, %v77_v51  ;;  %v94_v59 = vadd.f32 %v344_v49, %v86_v52  ;;  %v117_v60 = vmul.f32 %v345_v48, %v109_v53 }
  0xac   :  { %v87_v61 = vmul.f32 %v84_v43, %v79_v58  ;;  %v110_v62 = vmul.f32 %v79_v58, %v79_v58  ;;  %377 = vmatprep.mubr.msk.f32.mxu0 %vm46_vm0, %v94_v59  ;;  %v108_v63 = vmul.f32 %v106_v57, %v104_v50  ;;  %v119_v0 = vadd.f32 %v117_v60, %v107_v54 }
  0xad   :  { %v141_v3 = vmul.f32 %v94_v59, %v94_v59 }
  0xae   :  { %v95_v1 = vadd.f32 %v344_v49, %v87_v61  ;;  %v118_v2 = vmul.f32 %v345_v48, %v110_v62  ;;  %v127_v9 = vadd.f32 %v346_v7, %v119_v0 }
  0xb0   :  { %378 = vmatmul.mubr.msk.f32.vlgmr.msra.gmra.mrb[0].mxu0 %vm46_vm0, %v95_v1  ;;  %v142_v4 = vmul.f32 %v95_v1, %v95_v1  ;;  %v120_v5 = vadd.f32 %v118_v2, %v108_v63 }
  0xb2   :  { %v403_v6 = vpack.i.bf16 %v142_v4, %v141_v3  ;;  %v128_v10 = vadd.f32 %v346_v7, %v120_v5 }
  0xb4   :  { %404 = vrot.lane.b32.xlu0 %v403_v6, %s418_s3 }
 0x126   :  { %v405_v8 = vpop.permute.xlu0 %404 }
 0x127   :  { %v407_v11 = vunpack.i.h.bf16 %v405_v8  ;;  %v406_v12 = vunpack.i.l.bf16 %v405_v8 }
 0x129   :  { %v152_v13 = vsel %vm46_vm0, %v128_v10, %v407_v11  ;;  %v151_v14 = vsel %vm46_vm0, %v127_v9, %v406_v12 }
 0x12a   :  { %v153_v15 = vpack.c.bf16 %v152_v13, %v151_v14 }
 0x12c   :  { %389 = vmatmul.mubr.msk.bf16.vlgmr.msra.gmra.mrb[0].mxu1 %vm273_vm2, %v153_v15 }
 0x183   :  { %v379_v17 = vpop.f32.mrb[0].mxu0 }
 0x184   :  { %v239_v18 = vadd.f32 %v379_v17, %v347_v16  ;;  %v233_v19 = vpop.f32.mrb[1].mxu0 }
 0x185   :  { %v234_v21 = vadd.f32 %v347_v16, %v233_v19 }
 0x186   :  { %vm319_vm3 = vcmp.gt.f32.partialorder %v239_v18, 0.0 }
 0x187   :  { %v357_v22 = vsel %vm319_vm3, 1.0, %v416_v20  ;;  %vm318_vm4 = vcmp.gt.f32.partialorder %v234_v21, 0.0 }
 0x188   :  { %v325_v23 = vmul.f32 %v357_v22, %v239_v18  ;;  %v356_v24 = vsel %vm318_vm4, 1.0, %v416_v20 }
 0x189   :  { %v324_v25 = vmul.f32 %v356_v24, %v234_v21 }
 0x18a   :  { %v329_v26 = vadd.f32 %v325_v23, %v95_v1 }
 0x18b   :  { %v328_v27 = vadd.f32 %v324_v25, %v94_v59 }
 0x18c   :  { %333 = vst.msk [vmem:[%s585_s10 + $0x8] sm:$0xff] %vm46_vm0, %v329_v26 }
 0x18d   :  { %332 = vst.msk [vmem:[%s585_s10] sm:$0xff] %vm46_vm0, %v328_v27 }
 0x1ff   :  { %v311_v29 = vpop.f32.mrb[0].mxu1 }
 0x200   :  { %v312_v30 = vadd.f32 %v350_v28, %v311_v29  ;;  %v390_v20 = vpop.f32.mrb[1].mxu1 }
 0x201   :  { %v314_v31 = vpop.f32.mrb[2].mxu1 }
 0x202   :  { %v326_v32 = vmul.f32 %v356_v24, %v312_v30  ;;  %v315_v33 = vadd.f32 %v350_v28, %v314_v31  ;;  %v391_v34 = vpop.f32.mrb[3].mxu1 }
 0x204   :  { %v330_v35 = vadd.f32 %v326_v32, %v127_v9  ;;  %v327_v36 = vmul.f32 %v357_v22, %v315_v33 }
 0x206   :  { %334 = vst.msk [vmem:[%s587_s11] sm:$0xff] %vm46_vm0, %v330_v35  ;;  %v331_v37 = vadd.f32 %v327_v36, %v128_v10 }
 0x208   :  { %335 = vst.msk [vmem:[%s587_s11 + $0x8] sm:$0xff] %vm46_vm0, %v331_v37 }

// kernel: decoder_vmp_forward.6
= control target key start
LH: loop header
LB: loop body
LE: loop exit
PB: predicated region body
PF: predicated region fallthrough
CT: control target
= control target key end

     0   :  { %s2346_s15 = smov 0   ;;  %s2633_s0 = inlined_call_operand.vmem [shape: f32[2,8,32], index: 0, kind: input, shape index: {}]   ;;  %s2634_s1 = inlined_call_operand.vmem [shape: f32[32,96], index: 1, kind: input, shape index: {}]   ;;  %s2635_s2 = inlined_call_operand.vmem [shape: bf16[32,96], index: 2, kind: input, shape index: {}]   ;;  %s2636_s3 = inlined_call_operand.vmem [shape: f32[2,8,32], index: 3, kind: output, shape index: {0}]   ;;  %s2637_s4 = inlined_call_operand.vmem [shape: f32[2,8,32], index: 4, kind: output, shape index: {1}]  }
   0x1 LB: > { %s1962_s16 = sadd.s32 4294967295, %s2302_s15   ;;  %p1966_p0 = scmp.ge.s32.totalorder %s2302_s15, 1  ;;  %s2302_s15 = sphi %s2346_s15, %s15_s15  }
   0x2   : > { %p164_p1 = scmp.lt.s32.totalorder %s2302_s15, 3 }
   0x4   : > { %p165_p2 = pnand %p1966_p0, %p164_p1 }
   0x5   : > { %v206_v0 = vld [vmem:[%s2634_s1] sm:$0xff] (!%p165_p2)  ;;  %v207_v1 = vld [vmem:[%s2634_s1 + $0x8] sm:$0xff] (!%p165_p2)  ;;  %v2304_v2 = vmov (!%p165_p2), 0.0|0.0   ;;  %v2305_v4 = vmov (!%p165_p2), 0.0   ;;  %v208_v6 = vld [vmem:[%s2634_s1 + $0x10] sm:$0xff] (!%p165_p2)  ;;  %p192_p3 = scmp.lt.s32.totalorder (!%p165_p2), %s1962_s16, 1  ;;  %v345_v31 = vlaneseq (!%p165_p2) }
   0x6   : > { %168 = sbr.rel (%p165_p2) target bundleno = 2031 (0x7ef), region = 32  ;;  %2215 = vmatprep.subr.bf16.mxu0 (!%p165_p2), %v2304_v2  ;;  %v2216_v3 = vpack.c.bf16 (!%p165_p2), %v207_v1, %v206_v0  ;;  %2071 = vmatprep.subr.bf16.mxu1 (!%p165_p2), %v2305_v4  ;;  %v2278_v5 = vld [vmem:[%s2635_s2] sm:$0xff] (!%p165_p2)   ;;  %v209_v7 = vld [vmem:[%s2634_s1 + $0x18] sm:$0xff] (!%p165_p2)  ;;  %vm2306_vm0 = vmmov (!%p165_p2), 0   ;;  %v2279_v9 = vld [vmem:[%s2635_s2 + $0x8] sm:$0xff] (!%p165_p2)   ;;  %vm210_vm1 = vcmask (!%p165_p2), 261120  }
   0x7   : > { %2068 = vmatprep.mubr.msk.f32.mxu0 (!%p165_p2), %vm2306_vm0, %v2305_v4  ;;  %2075 = vmatprep.mubr.msk.bf16.mxu1 (!%p165_p2), %vm2306_vm0, %v2305_v4  ;;  %v2219_v8 = vpack.c.bf16 (!%p165_p2), %v209_v7, %v208_v6  ;;  %s2307_s7 = smov (!%p165_p2), 96   ;;  %s2308_s8 = smov (!%p165_p2), 120   ;;  %vm353_vm2 = vcmask (!%p165_p2), 64512   ;;  %v2435_v32 = vshrl.u32 (!%p165_p2), %v345_v31, 7  ;;  %v2437_v33 = vand.u32 (!%p165_p2), 127, %v345_v31 }
   0x8   : > { %2217 = vmatpush3.bf16.msra.mxu0 (!%p165_p2), %v2216_v3  ;;  %2072 = vmatpush3.bf16.msra.mxu1 (!%p165_p2), %v2278_v5  ;;  %s2309_s9 = smov (!%p165_p2), 88   ;;  %s2310_s10 = smov (!%p165_p2), 64   ;;  %vm633_vm4 = vcmask (!%p165_p2), 1043456   ;;  %vm1105_vm5 = vcmask (!%p165_p2), 130112   ;;  %vm1488_vm6 = vcmask (!%p165_p2), 195712   ;;  %vm1871_vm7 = vcmask (!%p165_p2), 261312  }
   0x9   : > { %2218 = vmatprep.subr.bf16.mxu0 (!%p165_p2), %v2304_v2  ;;  %2073 = vmatprep.subr.bf16.mxu1 (!%p165_p2), %v2305_v4  ;;  %vm349_vm3 = vcmp.gt.s32.totalorder (!%p165_p2), %v2437_v33, %v2435_v32  ;;  %s2311_s11 = smov (!%p165_p2), 112   ;;  %s2312_s12 = smov (!%p165_p2), 80  }
   0xa   : > { %s2313_s13 = smov (!%p165_p2), 56   ;;  %s2314_s14 = smov (!%p165_p2), 104  }
   0xb   : > { %s2316_s23 = smov (!%p165_p2), 48   ;;  %s2317_s24 = smov (!%p165_p2), 40  }
   0xc   : > { %2220 = vmatpush3.bf16.msra.mxu0 (!%p165_p2), %v2219_v8  ;;  %2074 = vmatpush3.bf16.msra.mxu1 (!%p165_p2), %v2279_v9  ;;  %s2318_s25 = smov (!%p165_p2), 8   ;;  %s2319_s26 = smov (!%p165_p2), 16  }
   0xd   : > { %s2639_s16 = smov (!%p192_p3, %s1962_s16), 1  ;;  %2079 = vmatprep.subr.mxu0 %v2305_v4  ;;  %2084 = vmatprep.subr.bf16.mxu1 %v2305_v4  ;;  %s2320_s27 = smov 24  }
   0xe   : > { %s2378_s29 = sshll.u32 %s2639_s16, 3  ;;  %s2315_s16 = smov 72  }
   0xf   : > { %s195_s6 = scalar_lea.vmem %s2633_s0, %s2378_s29  ;;  %s2515_s19 = scalar_lea.vmem %s2636_s3, %s2378_s29 }
  0x10   : > { %v2384_v10 = vld [vmem:[%s195_s6] sm:$0xff]  ;;  %s2529_s22 = scalar_lea.vmem %s2637_s4, %s2378_s29 }
  0x11   : > { %v284_v11 = vmul.f32 %v2384_v10, %v2384_v10  ;;  %2069 = vmatmul.mubr.msk.f32.vlgmr.msra.gmra.mrb[0].mxu0 %vm210_vm1, %v2384_v10 }
  0x12   : > { %2081 = vmatprep.mubr.msk.f32.mxu0 %vm2306_vm0, %v2305_v4 }
  0x13   : > { %v285_v12 = vpack.c.bf16 %v284_v11, %v284_v11 }
  0x15   : > { %2076 = vmatmul.mubr.msk.bf16.vlgmr.msra.gmra.mrb[0].mxu1 %vm210_vm1, %v285_v12 }
  0x16   : > { %2086 = vmatprep.mubr.msk.bf16.mxu1 %vm2306_vm0, %v2305_v4 }
  0xe4   : > { %v2395_v13 = vpop.f32.mrb[0].mxu0 }
  0xe5   : > { %351 = vrot.lane.b32.xlu0 %v2395_v13, %s2307_s7  ;;  %v2070_v14 = vpop.f32.mrb[1].mxu0  ;;  %v429_v15 = vmul.f32 %v2395_v13, %v2395_v13 }
  0xe7   : > { %v2418_v27 = vpack.c.bf16 %v429_v15, %v429_v15 }
  0xe8   : > { %v339_v16 = vpop.f32.mrb[0].mxu1 }
  0xe9   : > { %v430_v17 = vadd.f32 %v429_v15, %v339_v16  ;;  %v2400_v18 = vpack.c.bf16 %v339_v16, %v339_v16  ;;  %v2077_v19 = vpop.f32.mrb[1].mxu1 }
  0xea   : > { %v342_v20 = vpop.f32.mrb[2].mxu1 }
  0xeb   : > { %v2402_v21 = vpack.c.bf16 %v430_v17, %v430_v17  ;;  %435 = vrot.lane.b32.xlu0 %v2400_v18, %s2307_s7  ;;  %v2078_v22 = vpop.f32.mrb[3].mxu1 }
  0xed   : > { %484 = vrot.lane.b32.xlu1 %v2402_v21, %s2307_s7 }
  0xef   : > { %728 = vrot.lane.b32.xlu0 %v2395_v13, %s2308_s8 }
  0xf1   : > { %730 = vrot.lane.b32.xlu1 %v2395_v13, %s2309_s9 }
 0x157   : > { %v352_v23 = vpop.permute.xlu0 %351 }
 0x158   : > { %2080 = vmatpush3.xpose.msk.msra.mxu0 %vm353_vm2, %v352_v23 }
 0x159   : > { %2096 = vmatprep.subr.mxu0 %v2305_v4 }
 0x15b   : > { %2082 = vmatmul.mubr.msk.f32.vlgmr.msra.gmra.mrb[2].mxu0 %vm353_vm2, %v2395_v13 }
 0x15c   : > { %2098 = vmatprep.mubr.msk.f32.mxu0 %vm2306_vm0, %v2305_v4 }
 0x15d   : > { %v436_v24 = vpop.permute.xlu0 %435 }
 0x15e   : > { %v441_v25 = vsel %vm353_vm2, %v436_v24, 0 }
 0x15f   : > { %2085 = vmatpush3.bf16.xpose.msra.mxu1 %v441_v25  ;;  %v485_v26 = vpop.permute.xlu1 %484 }
 0x160   : > { %2090 = vmatprep.subr.bf16.mxu1 %v2305_v4  ;;  %v490_v28 = vsel %vm353_vm2, %v485_v26, 0 }
 0x161   : > { %v729_v30 = vpop.permute.xlu0 %728 }
 0x163   : > { %v731_v29 = vpop.permute.xlu1 %730 }
 0x166   : > { %2087 = vmatmul.mubr.msk.bf16.vlgmr.msra.gmra.mrb[4].mxu1 %vm353_vm2, %v2418_v27 }
 0x167   : > { %2091 = vmatpush3.bf16.xpose.msra.mxu1 %v490_v28  ;;  %2092 = vmatprep.mubr.msk.bf16.mxu1 %vm2306_vm0, %v2305_v4 }
 0x168   : > { %2113 = vmatprep.subr.mxu1 %v2305_v4 }
 0x172   : > { %2093 = vmatmul.mubr.msk.bf16.vlgmr.msra.gmra.mrb[4].mxu1 %vm353_vm2, %v2400_v18 }
 0x173   : > { %2114 = vmatpush3.xpose.msk.msra.mxu1 %vm353_vm2, %v731_v29  ;;  %2115 = vmatprep.mubr.msk.f32.mxu1 %vm2306_vm0, %v2305_v4 }
 0x174   : > { %2130 = vmatprep.subr.mxu1 %v2305_v4 }
 0x17a   : > { %2116 = vmatmul.mubr.msk.f32.vlgmr.msra.gmra.mrb[8].mxu1 %vm353_vm2, %v729_v30 }
 0x17b   : > { %2132 = vmatprep.mubr.msk.f32.mxu1 %vm2306_vm0, %v2305_v4 }
 0x22e   : > { %v424_v34 = vpop.f32.mrb[2].mxu0 }
 0x22f   : > { %v428_v35 = vmul.f32 0.17677669, %v424_v34  ;;  %v2083_v36 = vpop.f32.mrb[3].mxu0 }
 0x231   : > { %v533_v37 = vsel %vm349_vm3, -1e+30, %v428_v35 }
 0x232   : > { %v534_v38 = vsel %vm353_vm2, %v533_v37, -inf }
 0x233   : > { %535 = vmax.xlane.f32.xlu1 %v534_v38 }
 0x244   : > { %628 = vrot.lane.b32.xlu1 %v2400_v18, %s2310_s10 }
 0x245   : > { %v526_v39 = vpop.f32.mrb[4].mxu1 }
 0x246   : > { %v2094_v40 = vpop.f32.mrb[5].mxu1  ;;  %v532_v2 = vmul.f32 0.03125, %v526_v39 }
 0x247   : > { %v529_v41 = vpop.f32.mrb[6].mxu1 }
 0x248   : > { %v2095_v42 = vpop.f32.mrb[7].mxu1  ;;  %677 = vrot.lane.b32.xlu1 %v2402_v21, %s2310_s10 }
 0x24c   : > { %808 = vrot.lane.b32.xlu1 %v2418_v27, %s2308_s8 }
 0x24d   : > { %v802_v43 = vpop.f32.mrb[8].mxu1 }
 0x24e   : > { %v2117_v44 = vpop.f32.mrb[9].mxu1  ;;  %v806_v50 = vmul.f32 0.17677669, %v802_v43 }
 0x250   : > { %858 = vrot.lane.b32.xlu1 %v2400_v18, %s2308_s8  ;;  %v909_v51 = vsel %vm349_vm3, -1e+30, %v806_v50 }
 0x251   : > { %v910_v52 = vsel %vm353_vm2, %v909_v51, -inf }
 0x254   : > { %1112 = vrot.lane.b32.xlu1 %v2395_v13, %s2311_s11 }
 0x2c0   : > { %v536_v45 = vpop.xlane.xlu1 %535 }
 0x2c1   : > { %v537_v46 = vsub.f32 %v533_v37, %v536_v45 }
 0x2c3   : > { %v538_v47 = vmul.f32 1.442695, %v537_v46 }
 0x2c4   : > { %v629_v55 = vpop.permute.xlu1 %628 }
 0x2c5   : > { %2280 = vpow2.f32 %v538_v47  ;;  %v635_v58 = vsel %vm633_vm4, %v629_v55, 0 }
 0x2c8   : > { %v678_v61 = vpop.permute.xlu1 %677 }
 0x2c9   : > { %v683_v0 = vsel %vm633_vm4, %v678_v61, 0 }
 0x2cc   : > { %v809_v9 = vpop.permute.xlu1 %808 }
 0x2cf   : > { %v2281_v48 = vpop.eup %2280 }
 0x2d0   : > { %v540_v49 = vsel %vm353_vm2, %v2281_v48, 0.0  ;;  %v859_v12 = vpop.permute.xlu1 %858 }
 0x2d1   : > { %541 = vadd.xlane.f32.xlu0 %v540_v49 }
 0x2d4   : > { %v1113_v15 = vpop.permute.xlu1 %1112 }
 0x2e7   : > { %549 = vrot.lane.b32.xlu0 %v2395_v13, %s2310_s10 }
 0x2eb   : > { %810 = vrot.lane.b32.xlu0 %v2400_v18, %s2309_s9 }
 0x2ef   : > { %860 = vrot.lane.b32.xlu0 %v2402_v21, %s2309_s9 }
 0x2f3   : > { %1114 = vrot.lane.b32.xlu0 %v2395_v13, %s2312_s12 }
 0x312   : > { %911 = vmax.xlane.f32.xlu0 %v910_v52 }
 0x328   : > { %925 = vrot.lane.b32.xlu0 %v2395_v13, %s2313_s13 }
 0x32c   : > { %1052 = vrot.lane.b32.xlu0 %v2402_v21, %s2313_s13 }
 0x330   : > { %1191 = vrot.lane.b32.xlu0 %v2418_v27, %s2311_s11 }
 0x334   : > { %1241 = vrot.lane.b32.xlu0 %v2400_v18, %s2311_s11 }
 0x338   : > { %1495 = vrot.lane.b32.xlu0 %v2395_v13, %s2314_s14 }
 0x35e   : > { %v542_v53 = vpop.xlane.xlu0 %541 }
 0x35f   : > { %2282 = vrcp.f32 %v542_v53 }
 0x362   : > { %v550_v54 = vpop.permute.xlu0 %549 }
 0x363   : > { %2097 = vmatpush3.msra.mxu0 %v550_v54 }
 0x364   : > { %2101 = vmatprep.subr.bf16.mxu0 %v2305_v4 }
 0x366   : > { %v811_v5 = vpop.permute.xlu0 %810 }
 0x367   : > { %v816_v7 = vsel %vm353_vm2, %v811_v5, 0 }
 0x369   : > { %v2283_v56 = vpop.eup %2282 }
 0x36a   : > { %v544_v57 = vmul.f32 %v2283_v56, %v2281_v48  ;;  %v861_v8 = vpop.permute.xlu0 %860 }
 0x36b   : > { %v866_v11 = vsel %vm353_vm2, %v861_v8, 0 }
 0x36c   : > { %2099 = vmatmul.mubr.msk.f32.vlgmr.msra.gmra.mrb[4].mxu0 %vm353_vm2, %v544_v57  ;;  %v626_v59 = vmul.f32 %v544_v57, %v544_v57  ;;  %v545_v60 = vsub.f32 1.0, %v544_v57 }
 0x36d   : > { %2102 = vmatpush3.bf16.msra.mxu0 %v635_v58  ;;  %2103 = vmatprep.mubr.msk.bf16.mxu0 %vm2306_vm0, %v2305_v4 }
 0x36e   : > { %2107 = vmatprep.subr.bf16.mxu0 %v2305_v4  ;;  %v627_v62 = vpack.c.bf16 %v626_v59, %v626_v59  ;;  %v546_v63 = vmul.f32 %v545_v60, %v544_v57  ;;  %v1115_v14 = vpop.permute.xlu0 %1114 }
 0x370   : > { %2104 = vmatmul.mubr.msk.bf16.vlgmr.msra.gmra.mrb[8].mxu0 %vm353_vm2, %v627_v62  ;;  %v547_v1 = vmul.f32 %v546_v63, %v546_v63 }
 0x371   : > { %2108 = vmatpush3.bf16.msra.mxu0 %v683_v0  ;;  %2109 = vmatprep.mubr.msk.bf16.mxu0 %vm2306_vm0, %v2305_v4 }
 0x372   : > { %2118 = vmatprep.subr.bf16.mxu0 %v2305_v4  ;;  %v548_v3 = vmul.f32 %v547_v1, %v532_v2 }
 0x374   : > { %v625_v6 = vpack.c.bf16 %v548_v3, %v548_v3 }
 0x37c   : > { %2110 = vmatmul.mubr.msk.bf16.vlgmr.msra.gmra.mrb[8].mxu0 %vm353_vm2, %v625_v6 }
 0x37d   : > { %2119 = vmatpush3.bf16.xpose.msra.mxu0 %v816_v7  ;;  %2120 = vmatprep.mubr.msk.bf16.mxu0 %vm2306_vm0, %v2305_v4 }
 0x37e   : > { %2124 = vmatprep.subr.bf16.mxu0 %v2305_v4 }
 0x384   : > { %2121 = vmatmul.mubr.msk.bf16.vlgmr.msra.gmra.mrb[12].mxu0 %vm353_vm2, %v809_v9 }
 0x385   : > { %2125 = vmatpush3.bf16.xpose.msra.mxu0 %v866_v11  ;;  %2126 = vmatprep.mubr.msk.bf16.mxu0 %vm2306_vm0, %v2305_v4 }
 0x386   : > { %2147 = vmatprep.subr.mxu0 %v2305_v4 }
 0x390   : > { %2127 = vmatmul.mubr.msk.bf16.vlgmr.msra.gmra.mrb[12].mxu0 %vm353_vm2, %v859_v12 }
 0x391   : > { %2148 = vmatpush3.xpose.msk.msra.mxu0 %vm353_vm2, %v1115_v14  ;;  %2149 = vmatprep.mubr.msk.f32.mxu0 %vm2306_vm0, %v2305_v4 }
 0x392   : > { %2164 = vmatprep.subr.mxu0 %v2305_v4 }
 0x398   : > { %2150 = vmatmul.mubr.msk.f32.vlgmr.msra.gmra.mrb[6].mxu0 %vm353_vm2, %v1113_v15 }
 0x399   : > { %2166 = vmatprep.mubr.msk.f32.mxu0 %vm2306_vm0, %v2305_v4 }
 0x39f   : > { %v912_v16 = vpop.xlane.xlu0 %911 }
 0x3a0   : > { %v913_v17 = vsub.f32 %v909_v51, %v912_v16 }
 0x3a2   : > { %v914_v19 = vmul.f32 1.442695, %v913_v17 }
 0x3a3   : > { %v926_v20 = vpop.permute.xlu0 %925 }
 0x3a4   : > { %2284 = vpow2.f32 %v914_v19  ;;  %2131 = vmatpush3.msra.mxu1 %v926_v20 }
 0x3a5   : > { %2135 = vmatprep.subr.bf16.mxu1 %v2305_v4 }
 0x3a7   : > { %v1053_v36 = vpop.permute.xlu0 %1052 }
 0x3a8   : > { %v1058_v38 = vsel %vm633_vm4, %v1053_v36, 0 }
 0x3ab   : > { %v1192_v61 = vpop.permute.xlu0 %1191 }
 0x3ae   : > { %v2285_v22 = vpop.eup %2284 }
 0x3af   : > { %v916_v23 = vsel %vm353_vm2, %v2285_v22, 0.0  ;;  %v1242_v63 = vpop.permute.xlu0 %1241 }
 0x3b0   : > { %917 = vadd.xlane.f32.xlu1 %v916_v23 }
 0x3b3   : > { %v1496_v1 = vpop.permute.xlu0 %1495 }
 0x3c1   : > { %1004 = vrot.lane.b32.xlu1 %v2400_v18, %s2313_s13 }
 0x3c5   : > { %1193 = vrot.lane.b32.xlu1 %v2400_v18, %s2312_s12 }
 0x3c9   : > { %1243 = vrot.lane.b32.xlu1 %v2402_v21, %s2312_s12 }
 0x3cd   : > { %1497 = vrot.lane.b32.xlu1 %v2395_v13, %s2315_s16 }
 0x43d   : > { %v918_v24 = vpop.xlane.xlu1 %917 }
 0x43e   : > { %2286 = vrcp.f32 %v918_v24 }
 0x43f   : > { %v621_v25 = vpop.f32.mrb[4].mxu0 }
 0x440   : > { %v725_v26 = vadd.f32 %v621_v25, %v2384_v10  ;;  %v2100_v28 = vpop.f32.mrb[5].mxu0 }
 0x441   : > { %v1005_v30 = vpop.permute.xlu1 %1004 }
 0x442   : > { %726 = vst.msk [vmem:[%s2515_s19] sm:$0xff] %vm353_vm2, %v725_v26  ;;  %v1010_v34 = vsel %vm633_vm4, %v1005_v30, 0 }
 0x445   : > { %v1194_v52 = vpop.permute.xlu1 %1193 }
 0x446   : > { %v1199_v54 = vsel %vm353_vm2, %v1194_v52, 0 }
 0x448   : > { %v2287_v29 = vpop.eup %2286 }
 0x449   : > { %v920_v31 = vmul.f32 %v2287_v29, %v2285_v22  ;;  %v1244_v59 = vpop.permute.xlu1 %1243 }
 0x44a   : > { %v1249_v62 = vsel %vm353_vm2, %v1244_v59, 0 }
 0x44b   : > { %2133 = vmatmul.mubr.msk.f32.vlgmr.msra.gmra.mrb[10].mxu1 %vm353_vm2, %v920_v31  ;;  %v1002_v35 = vmul.f32 %v920_v31, %v920_v31  ;;  %v921_v43 = vsub.f32 1.0, %v920_v31 }
 0x44c   : > { %2136 = vmatpush3.bf16.msra.mxu1 %v1010_v34  ;;  %2137 = vmatprep.mubr.msk.bf16.mxu1 %vm2306_vm0, %v2305_v4 }
 0x44d   : > { %2141 = vmatprep.subr.bf16.mxu1 %v2305_v4  ;;  %v1003_v37 = vpack.c.bf16 %v1002_v35, %v1002_v35  ;;  %v922_v44 = vmul.f32 %v921_v43, %v920_v31  ;;  %v1498_v0 = vpop.permute.xlu1 %1497 }
 0x44f   : > { %v719_v39 = vpop.f32.mrb[8].mxu0  ;;  %2138 = vmatmul.mubr.msk.bf16.vlgmr.msra.gmra.mrb[12].mxu1 %vm353_vm2, %v1003_v37  ;;  %v923_v47 = vmul.f32 %v922_v44, %v922_v44 }
 0x450   : > { %727 = vst.msk [vmem:[%s2529_s22] sm:$0xff] %vm353_vm2, %v719_v39  ;;  %2142 = vmatpush3.bf16.msra.mxu1 %v1058_v38  ;;  %v2111_v40 = vpop.f32.mrb[9].mxu0  ;;  %2143 = vmatprep.mubr.msk.bf16.mxu1 %vm2306_vm0, %v2305_v4 }
 0x451   : > { %v722_v41 = vpop.f32.mrb[10].mxu0  ;;  %2152 = vmatprep.subr.bf16.mxu1 %v2305_v4 }
 0x452   : > { %v2112_v42 = vpop.f32.mrb[11].mxu0 }
 0x463   : > { %v902_v45 = vpop.f32.mrb[12].mxu0 }
 0x464   : > { %v908_v46 = vmul.f32 0.03125, %v902_v45  ;;  %v2128_v48 = vpop.f32.mrb[13].mxu0 }
 0x465   : > { %v905_v49 = vpop.f32.mrb[14].mxu0 }
 0x466   : > { %v924_v50 = vmul.f32 %v923_v47, %v908_v46  ;;  %v2129_v51 = vpop.f32.mrb[15].mxu0 }
 0x468   : > { %v1001_v53 = vpack.c.bf16 %v924_v50, %v924_v50 }
 0x46a   : > { %2144 = vmatmul.mubr.msk.bf16.vlgmr.msra.gmra.mrb[12].mxu1 %vm353_vm2, %v1001_v53 }
 0x46b   : > { %2153 = vmatpush3.bf16.xpose.msra.mxu1 %v1199_v54  ;;  %v1186_v55 = vpop.f32.mrb[6].mxu0  ;;  %2154 = vmatprep.mubr.msk.bf16.mxu1 %vm2306_vm0, %v2305_v4 }
 0x46c   : > { %v1190_v56 = vmul.f32 0.17677669, %v1186_v55  ;;  %v2151_v57 = vpop.f32.mrb[7].mxu0  ;;  %2158 = vmatprep.subr.bf16.mxu1 %v2305_v4 }
 0x46e   : > { %v1292_v58 = vsel %vm349_vm3, -1e+30, %v1190_v56 }
 0x46f   : > { %v1293_v60 = vsel %vm353_vm2, %v1292_v58, -inf }
 0x470   : > { %1294 = vmax.xlane.f32.xlu1 %v1293_v60 }
 0x472   : > { %2155 = vmatmul.mubr.msk.bf16.vlgmr.msra.gmra.mrb[16].mxu1 %vm353_vm2, %v1192_v61 }
 0x473   : > { %2159 = vmatpush3.bf16.xpose.msra.mxu1 %v1249_v62  ;;  %2160 = vmatprep.mubr.msk.bf16.mxu1 %vm2306_vm0, %v2305_v4 }
 0x474   : > { %2181 = vmatprep.subr.mxu1 %v2305_v4 }
 0x47e   : > { %2161 = vmatmul.mubr.msk.bf16.vlgmr.msra.gmra.mrb[16].mxu1 %vm353_vm2, %v1242_v63 }
 0x47f   : > { %2182 = vmatpush3.xpose.msk.msra.mxu1 %vm353_vm2, %v1498_v0  ;;  %2183 = vmatprep.mubr.msk.f32.mxu1 %vm2306_vm0, %v2305_v4 }
 0x480   : > { %2198 = vmatprep.subr.mxu1 %v2305_v4 }
 0x481   : > { %1387 = vrot.lane.b32.xlu1 %v2400_v18, %s2316_s23 }
 0x485   : > { %1435 = vrot.lane.b32.xlu1 %v2402_v21, %s2316_s23 }
 0x486   : > { %2184 = vmatmul.mubr.msk.f32.vlgmr.msra.gmra.mrb[20].mxu1 %vm353_vm2, %v1496_v1 }
 0x487   : > { %2200 = vmatprep.mubr.msk.f32.mxu1 %vm2306_vm0, %v2305_v4 }
 0x489   : > { %1574 = vrot.lane.b32.xlu1 %v2418_v27, %s2314_s14 }
 0x48d   : > { %1624 = vrot.lane.b32.xlu1 %v2400_v18, %s2314_s14 }
 0x4fd   : > { %v1295_v2 = vpop.xlane.xlu1 %1294 }
 0x4fe   : > { %v1296_v3 = vsub.f32 %v1292_v58, %v1295_v2 }
 0x500   : > { %v1297_v5 = vmul.f32 1.442695, %v1296_v3 }
 0x501   : > { %v1388_v29 = vpop.permute.xlu1 %1387 }
 0x502   : > { %2288 = vpow2.f32 %v1297_v5  ;;  %v1393_v33 = vsel %vm633_vm4, %v1388_v29, 0 }
 0x505   : > { %v1436_v35 = vpop.permute.xlu1 %1435 }
 0x506   : > { %v1441_v36 = vsel %vm633_vm4, %v1436_v35, 0 }
 0x509   : > { %v1575_v44 = vpop.permute.xlu1 %1574 }
 0x50c   : > { %v2289_v6 = vpop.eup %2288 }
 0x50d   : > { %v1299_v7 = vsel %vm353_vm2, %v2289_v6, 0.0  ;;  %v1625_v46 = vpop.permute.xlu1 %1624 }
 0x50e   : > { %1300 = vadd.xlane.f32.xlu0 %v1299_v7 }
 0x51e   : > { %v2567_v8 = vpop.f32.mrb[10].mxu1 }
 0x51f   : > { %v2134_v9 = vpop.f32.mrb[11].mxu1 }
 0x524   : > { %1308 = vrot.lane.b32.xlu0 %v2395_v13, %s2316_s23 }
 0x528   : > { %1576 = vrot.lane.b32.xlu0 %v2400_v18, %s2315_s16 }
 0x52c   : > { %1626 = vrot.lane.b32.xlu0 %v2402_v21, %s2315_s16 }
 0x53d   : > { %v2574_v27 = vpop.f32.mrb[12].mxu1 }
 0x53e   : > { %v2145_v11 = vpop.f32.mrb[13].mxu1 }
 0x53f   : > { %v1097_v12 = vpop.f32.mrb[14].mxu1 }
 0x540   : > { %v2146_v14 = vpop.f32.mrb[15].mxu1 }
 0x551   : > { %v1285_v15 = vpop.f32.mrb[16].mxu1 }
 0x552   : > { %v2162_v16 = vpop.f32.mrb[17].mxu1  ;;  %v1291_v38 = vmul.f32 0.03125, %v1285_v15 }
 0x553   : > { %v1288_v17 = vpop.f32.mrb[18].mxu1 }
 0x554   : > { %v2163_v19 = vpop.f32.mrb[19].mxu1 }
 0x559   : > { %v1569_v20 = vpop.f32.mrb[20].mxu1 }
 0x55a   : > { %v1573_v22 = vmul.f32 0.17677669, %v1569_v20  ;;  %v2185_v23 = vpop.f32.mrb[21].mxu1 }
 0x55c   : > { %v1675_v24 = vsel %vm349_vm3, -1e+30, %v1573_v22 }
 0x55d   : > { %v1676_v25 = vsel %vm353_vm2, %v1675_v24, -inf }
 0x55e   : > { %1677 = vmax.xlane.f32.xlu0 %v1676_v25 }
 0x574   : > { %1691 = vrot.lane.b32.xlu0 %v2395_v13, %s2317_s24 }
 0x578   : > { %1818 = vrot.lane.b32.xlu0 %v2402_v21, %s2317_s24 }
 0x59b   : > { %v1301_v26 = vpop.xlane.xlu0 %1300 }
 0x59c   : > { %2290 = vrcp.f32 %v1301_v26 }
 0x59f   : > { %v1309_v28 = vpop.permute.xlu0 %1308 }
 0x5a0   : > { %2165 = vmatpush3.msra.mxu0 %v1309_v28 }
 0x5a1   : > { %2169 = vmatprep.subr.bf16.mxu0 %v2305_v4 }
 0x5a3   : > { %v1577_v40 = vpop.permute.xlu0 %1576 }
 0x5a4   : > { %v1582_v42 = vsel %vm353_vm2, %v1577_v40, 0 }
 0x5a6   : > { %v2291_v30 = vpop.eup %2290 }
 0x5a7   : > { %v1303_v32 = vmul.f32 %v2291_v30, %v2289_v6  ;;  %v1627_v43 = vpop.permute.xlu0 %1626 }
 0x5a8   : > { %v1632_v45 = vsel %vm353_vm2, %v1627_v43, 0 }
 0x5a9   : > { %2167 = vmatmul.mubr.msk.f32.vlgmr.msra.gmra.mrb[16].mxu0 %vm353_vm2, %v1303_v32  ;;  %v1385_v31 = vmul.f32 %v1303_v32, %v1303_v32  ;;  %v1304_v34 = vsub.f32 1.0, %v1303_v32 }
 0x5aa   : > { %2170 = vmatpush3.bf16.msra.mxu0 %v1393_v33  ;;  %2171 = vmatprep.mubr.msk.bf16.mxu0 %vm2306_vm0, %v2305_v4 }
 0x5ab   : > { %2175 = vmatprep.subr.bf16.mxu0 %v2305_v4  ;;  %v1386_v13 = vpack.c.bf16 %v1385_v31, %v1385_v31  ;;  %v1305_v21 = vmul.f32 %v1304_v34, %v1303_v32 }
 0x5ad   : > { %2172 = vmatmul.mubr.msk.bf16.vlgmr.msra.gmra.mrb[20].mxu0 %vm353_vm2, %v1386_v13  ;;  %v1306_v37 = vmul.f32 %v1305_v21, %v1305_v21 }
 0x5ae   : > { %2176 = vmatpush3.bf16.msra.mxu0 %v1441_v36  ;;  %2177 = vmatprep.mubr.msk.bf16.mxu0 %vm2306_vm0, %v2305_v4 }
 0x5af   : > { %2186 = vmatprep.subr.bf16.mxu0 %v2305_v4  ;;  %v1307_v39 = vmul.f32 %v1306_v37, %v1291_v38 }
 0x5b1   : > { %v1384_v41 = vpack.c.bf16 %v1307_v39, %v1307_v39 }
 0x5b9   : > { %2178 = vmatmul.mubr.msk.bf16.vlgmr.msra.gmra.mrb[20].mxu0 %vm353_vm2, %v1384_v41 }
 0x5ba   : > { %2187 = vmatpush3.bf16.xpose.msra.mxu0 %v1582_v42  ;;  %2188 = vmatprep.mubr.msk.bf16.mxu0 %vm2306_vm0, %v2305_v4 }
 0x5bb   : > { %2192 = vmatprep.subr.bf16.mxu0 %v2305_v4 }
 0x5c1   : > { %2189 = vmatmul.mubr.msk.bf16.vlgmr.msra.gmra.mrb[24].mxu0 %vm353_vm2, %v1575_v44 }
 0x5c2   : > { %2193 = vmatpush3.bf16.xpose.msra.mxu0 %v1632_v45  ;;  %2194 = vmatprep.mubr.msk.bf16.mxu0 %vm2306_vm0, %v2305_v4 }
 0x5cd   : > { %2195 = vmatmul.mubr.msk.bf16.vlgmr.msra.gmra.mrb[24].mxu0 %vm353_vm2, %v1625_v46 }
 0x5eb   : > { %v1678_v47 = vpop.xlane.xlu0 %1677 }
 0x5ec   : > { %v1679_v48 = vsub.f32 %v1675_v24, %v1678_v47 }
 0x5ee   : > { %v1680_v49 = vmul.f32 1.442695, %v1679_v48 }
 0x5ef   : > { %v1692_v50 = vpop.permute.xlu0 %1691 }
 0x5f0   : > { %2292 = vpow2.f32 %v1680_v49  ;;  %2199 = vmatpush3.msra.mxu1 %v1692_v50 }
 0x5f1   : > { %2203 = vmatprep.subr.bf16.mxu1 %v2305_v4 }
 0x5f3   : > { %v1819_v3 = vpop.permute.xlu0 %1818 }
 0x5f4   : > { %v1824_v7 = vsel %vm633_vm4, %v1819_v3, 0 }
 0x5fa   : > { %v2293_v51 = vpop.eup %2292 }
 0x5fb   : > { %v1682_v52 = vsel %vm353_vm2, %v2293_v51, 0.0 }
 0x5fc   : > { %1683 = vadd.xlane.f32.xlu1 %v1682_v52 }
 0x60d   : > { %1770 = vrot.lane.b32.xlu1 %v2400_v18, %s2317_s24 }
 0x611   : > { %1101 = vrot.lane.b32.xlu1 %v2567_v8, %s2318_s25 }
 0x615   : > { %1108 = vrot.lane.b32.xlu1 %v2574_v27, %s2318_s25 }
 0x67c   : > { %v1380_v53 = vpop.f32.mrb[16].mxu0 }
 0x67d   : > { %1484 = vrot.lane.b32.xlu0 %v1380_v53, %s2319_s26  ;;  %v2168_v54 = vpop.f32.mrb[17].mxu0 }
 0x689   : > { %v1684_v55 = vpop.xlane.xlu1 %1683 }
 0x68a   : > { %2294 = vrcp.f32 %v1684_v55 }
 0x68c   : > { %v1477_v56 = vpop.f32.mrb[20].mxu0 }
 0x68d   : > { %v1771_v57 = vpop.permute.xlu1 %1770  ;;  %1491 = vrot.lane.b32.xlu1 %v1477_v56, %s2319_s26  ;;  %v2179_v58 = vpop.f32.mrb[21].mxu0 }
 0x68e   : > { %v1480_v59 = vpop.f32.mrb[22].mxu0  ;;  %v1776_v1 = vsel %vm633_vm4, %v1771_v57, 0 }
 0x68f   : > { %v2180_v60 = vpop.f32.mrb[23].mxu0 }
 0x691   : > { %v1102_v18 = vpop.permute.xlu1 %1101 }
 0x692   : > { %v1104_v61 = vadd.f32 %v1102_v18, %v2384_v10 }
 0x694   : > { %v2295_v62 = vpop.eup %2294  ;;  %1106 = vst.msk [vmem:[%s2515_s19] sm:$0xff] %vm1105_vm5, %v1104_v61 }
 0x695   : > { %v1686_v63 = vmul.f32 %v2295_v62, %v2293_v51  ;;  %v1109_v0 = vpop.permute.xlu1 %1108 }
 0x696   : > { %1111 = vst.msk [vmem:[%s2529_s22] sm:$0xff] %vm1105_vm5, %v1109_v0 }
 0x697   : > { %2201 = vmatmul.mubr.msk.f32.vlgmr.msra.gmra.mrb[22].mxu1 %vm353_vm2, %v1686_v63  ;;  %v1768_v2 = vmul.f32 %v1686_v63, %v1686_v63  ;;  %v1687_v6 = vsub.f32 1.0, %v1686_v63 }
 0x698   : > { %2204 = vmatpush3.bf16.msra.mxu1 %v1776_v1  ;;  %2205 = vmatprep.mubr.msk.bf16.mxu1 %vm2306_vm0, %v2305_v4 }
 0x699   : > { %2209 = vmatprep.subr.bf16.mxu1 %v2305_v4  ;;  %v1769_v5 = vpack.c.bf16 %v1768_v2, %v1768_v2  ;;  %v1688_v8 = vmul.f32 %v1687_v6, %v1686_v63 }
 0x69b   : > { %2206 = vmatmul.mubr.msk.bf16.vlgmr.msra.gmra.mrb[24].mxu1 %vm353_vm2, %v1769_v5  ;;  %v1689_v11 = vmul.f32 %v1688_v8, %v1688_v8 }
 0x69c   : > { %2210 = vmatpush3.bf16.msra.mxu1 %v1824_v7  ;;  %2211 = vmatprep.mubr.msk.bf16.mxu1 %vm2306_vm0, %v2305_v4 }
 0x6a0   : > { %v1668_v9 = vpop.f32.mrb[24].mxu0 }
 0x6a1   : > { %v1674_v27 = vmul.f32 0.03125, %v1668_v9  ;;  %v2196_v12 = vpop.f32.mrb[25].mxu0 }
 0x6a2   : > { %v1671_v14 = vpop.f32.mrb[26].mxu0 }
 0x6a3   : > { %v1690_v15 = vmul.f32 %v1689_v11, %v1674_v27  ;;  %v2197_v16 = vpop.f32.mrb[27].mxu0 }
 0x6a5   : > { %v1767_v17 = vpack.c.bf16 %v1690_v15, %v1690_v15 }
 0x6a7   : > { %2212 = vmatmul.mubr.msk.bf16.vlgmr.msra.gmra.mrb[24].mxu1 %vm353_vm2, %v1767_v17 }
 0x6ef   : > { %v1485_v19 = vpop.permute.xlu0 %1484 }
 0x6f0   : > { %v1487_v20 = vadd.f32 %v1485_v19, %v2384_v10 }
 0x6f2   : > { %1489 = vst.msk [vmem:[%s2515_s19] sm:$0xff] %vm1488_vm6, %v1487_v20 }
 0x6ff   : > { %v1492_v22 = vpop.permute.xlu1 %1491 }
 0x700   : > { %1494 = vst.msk [vmem:[%s2529_s22] sm:$0xff] %vm1488_vm6, %v1492_v22 }
 0x76a   : > { %v1763_v4 = vpop.f32.mrb[22].mxu1 }
 0x76b   : > { %v2202_v23 = vpop.f32.mrb[23].mxu1  ;;  %1867 = vrot.lane.b32.xlu0 %v1763_v4, %s2320_s27 }
 0x77a   : > { %v1860_v24 = vpop.f32.mrb[24].mxu1 }
 0x77b   : > { %1874 = vrot.lane.b32.xlu0 %v1860_v24, %s2320_s27  ;;  %v2213_v25 = vpop.f32.mrb[25].mxu1 }
 0x77c   : > { %v1863_v26 = vpop.f32.mrb[26].mxu1 }
 0x77d   : > { %v2214_v28 = vpop.f32.mrb[27].mxu1 }
 0x7dd   : > { %v1868_v29 = vpop.permute.xlu0 %1867 }
 0x7de   : > { %v1870_v30 = vadd.f32 %v1868_v29, %v2384_v10 }
 0x7e0   : > { %1872 = vst.msk [vmem:[%s2515_s19] sm:$0xff] %vm1871_vm7, %v1870_v30 }
 0x7ed   : > { %v1875_v32 = vpop.permute.xlu0 %1874 }
 0x7ee   : > { %1877 = vst.msk [vmem:[%s2529_s22] sm:$0xff] %vm1871_vm7, %v1875_v32 }
 0x7ef PF: > { %s15_s15 = sadd.s32 1, %s2302_s15  }
 0x7f0   : > { %p12_p4 = scmp.ge.s32.totalorder %s15_s15, 4  }
 0x7f2   :  { %14 = sbr.rel (!%p12_p4) target bundleno = 1 (0x1), region = 74 }

// kernel: decoder_vmp_forward.7
= control target key start
LH: loop header
LB: loop body
LE: loop exit
PB: predicated region body
PF: predicated region fallthrough
CT: control target
= control target key end

     0   :  { %s2476_s25 = smov 0   ;;  %s2760_s0 = inlined_call_operand.vmem [shape: f32[2,8,32], index: 0, kind: input, shape index: {}]   ;;  %s2761_s1 = inlined_call_operand.vmem [shape: f32[2,8,32], index: 1, kind: input, shape index: {}]   ;;  %s2762_s2 = inlined_call_operand.vmem [shape: f32[1,32], index: 2, kind: input, shape index: {}]   ;;  %s2763_s3 = inlined_call_operand.vmem [shape: f32[1,32], index: 3, kind: input, shape index: {}]   ;;  %s2764_s4 = inlined_call_operand.vmem [shape: f32[1,32], index: 4, kind: input, shape index: {}]   ;;  %s2765_s5 = inlined_call_operand.vmem [shape: f32[1,32], index: 5, kind: input, shape index: {}]   ;;  %s2766_s6 = inlined_call_operand.vmem [shape: f32[32,32], index: 6, kind: input, shape index: {}]   ;;  %s2767_s7 = inlined_call_operand.vmem [shape: bf16[64,32], index: 7, kind: input, shape index: {}]   ;;  %s2768_s8 = inlined_call_operand.vmem [shape: f32[2,4,8,8], index: 8, kind: input, shape index: {}]   ;;  %s2769_s9 = inlined_call_operand.vmem [shape: bf16[2,4,16,8], index: 9, kind: input, shape index: {}]   ;;  %s2770_s10 = inlined_call_operand.vmem [shape: f32[2,4,8,8], index: 10, kind: input, shape index: {}]   ;;  %s2771_s11 = inlined_call_operand.vmem [shape: bf16[2,4,16,8], index: 11, kind: input, shape index: {}]   ;;  %s2772_s12 = inlined_call_operand.vmem [shape: f32[2,8,32], index: 12, kind: output, shape index: {0}]   ;;  %s2773_s13 = inlined_call_operand.vmem [shape: f32[2,8,32], index: 13, kind: output, shape index: {1}]  }
   0x1 LB: > { %s2107_s26 = sadd.s32 4294967295, %s2394_s25   ;;  %p2111_p0 = scmp.ge.s32.totalorder %s2394_s25, 1  ;;  %s2394_s25 = sphi %s2476_s25, %s24_s25  }
   0x2   : > { %p438_p1 = scmp.lt.s32.totalorder %s2394_s25, 3 }
   0x4   : > { %p439_p2 = pnand %p2111_p0, %p438_p1 }
   0x5   : > { %p508_p3 = scmp.lt.s32.totalorder (!%p439_p2), %s2107_s26, 1  ;;  %v547_v0 = vld [vmem:[%s2762_s2] sm:$0x1] (!%p439_p2)  ;;  %v570_v1 = vlaneseq (!%p439_p2)  ;;  %vm551_vm0 = vcmask (!%p439_p2), 261120   ;;  %v610_v11 = vld [vmem:[%s2766_s6 + $0x8] sm:$0xff] (!%p439_p2)  ;;  %v2396_v13 = vmov (!%p439_p2), 0.0|0.0  }
   0x6   : > { %442 = sbr.rel (%p439_p2) target bundleno = 1937 (0x791), region = 68  ;;  %v583_v3 = vmul.f32 (!%p439_p2), %v547_v0, %v547_v0  ;;  %v609_v10 = vld [vmem:[%s2766_s6] sm:$0xff] (!%p439_p2)  ;;  %2334 = vmatprep.subr.bf16.mxu0 (!%p439_p2), %v2396_v13  ;;  %v611_v14 = vld [vmem:[%s2766_s6 + $0x10] sm:$0xff] (!%p439_p2)  ;;  %v612_v15 = vld [vmem:[%s2766_s6 + $0x18] sm:$0xff] (!%p439_p2)  ;;  %vm2397_vm1 = vmmov (!%p439_p2), 0   ;;  %v2398_v17 = vmov (!%p439_p2), 0.0  }
   0x7   : > { %v2488_v2 = vshrl.u32 (!%p439_p2), %v570_v1, 7  ;;  %v2335_v12 = vpack.c.bf16 (!%p439_p2), %v610_v11, %v609_v10  ;;  %v2338_v16 = vpack.c.bf16 (!%p439_p2), %v612_v15, %v611_v14  ;;  %2231 = vmatprep.mubr.msk.f32.mxu0 (!%p439_p2), %vm2397_vm1, %v2398_v17  ;;  %2234 = vmatprep.subr.bf16.mxu1 (!%p439_p2), %v2398_v17  ;;  %v2358_v18 = vld [vmem:[%s2767_s7] sm:$0xff] (!%p439_p2)   ;;  %v2359_v19 = vld [vmem:[%s2767_s7 + $0x8] sm:$0xff] (!%p439_p2)   ;;  %v2360_v20 = vld [vmem:[%s2767_s7 + $0x10] sm:$0xff] (!%p439_p2)   ;;  %vm725_vm2 = vcmask (!%p439_p2), 523264   ;;  %s2400_s30 = smov (!%p439_p2), 8  }
   0x8   : > { %2242 = vmatprep.mubr.msk.bf16.mxu1 (!%p439_p2), %vm2397_vm1, %v2398_v17  ;;  %2235 = vmatpush3.bf16.msra.mxu1 (!%p439_p2), %v2358_v18  ;;  %v2361_v29 = vld [vmem:[%s2767_s7 + $0x18] sm:$0xff] (!%p439_p2)   ;;  %v2124_v37 = vld [vmem:[%s2764_s4] ss:$0 sm:$0xff] (!%p439_p2)  ;;  %vm775_vm3 = vcmask (!%p439_p2), 64512   ;;  %vm865_vm4 = vcmask (!%p439_p2), 130048   ;;  %v2596_v63 = vand.u32 (!%p439_p2), 127, %v570_v1 }
   0x9   : > { %v572_v4 = vsub.s32 (!%p439_p2), 0, %v2488_v2  ;;  %2336 = vmatpush3.bf16.msra.mxu0 (!%p439_p2), %v2335_v12  ;;  %2236 = vmatprep.subr.bf16.mxu1 (!%p439_p2), %v2398_v17  ;;  %v2125_v38 = vld [vmem:[%s2763_s3] ss:$0 sm:$0xff] (!%p439_p2)  ;;  %s2401_s14 = smov (!%p439_p2), 112   ;;  %s2403_s21 = smov (!%p439_p2), 104   ;;  %vm1353_vm6 = vcmask (!%p439_p2), 130112  }
   0xa   : > { %2337 = vmatprep.subr.bf16.mxu0 (!%p439_p2), %v2396_v13  ;;  %v2126_v47 = vld [vmem:[%s2765_s5] ss:$0 sm:$0xff] (!%p439_p2)  ;;  %vm773_vm5 = vcmp.gt.s32.totalorder (!%p439_p2), %v2596_v63, %v2488_v2  ;;  %vm1654_vm7 = vcmask (!%p439_p2), 195712   ;;  %vm1955_vm8 = vcmask (!%p439_p2), 261312  }
   0xb   : > { %v588_v6 = vrot.slane (!%p439_p2), %v583_v3, %v572_v4  ;;  %v573_v31 = vrot.slane (!%p439_p2), %v547_v0, %v572_v4 }
   0xc   : > { %2237 = vmatpush3.bf16.msra.mxu1 (!%p439_p2), %v2359_v19 }
   0xd   : > { %s2775_s26 = smov (!%p508_p3, %s2107_s26), 1  ;;  %2339 = vmatpush3.bf16.msra.mxu0 %v2338_v16  ;;  %2238 = vmatprep.subr.bf16.mxu1 %v2398_v17 }
   0xe   : > { %s2490_s29 = sshll.u32 %s2775_s26, 3  ;;  %s2497_s16 = sshll.u32 %s2775_s26, 5  ;;  %2246 = vmatprep.subr.mxu0 %v2398_v17 }
   0xf   : > { %s511_s15 = scalar_lea.vmem %s2760_s0, %s2490_s29  ;;  %s2503_s19 = scalar_lea.vmem %s2769_s9, %s2497_s16 }
  0x10   : > { %v545_v5 = vld [vmem:[%s511_s15] sm:$0xff]  ;;  %s2510_s22 = scalar_lea.vmem %s2771_s11, %s2497_s16  ;;  %2239 = vmatpush3.bf16.msra.mxu1 %v2360_v20  ;;  %s515_s28 = scalar_lea.vmem %s2761_s1, %s2490_s29 }
  0x11   : > { %v552_v7 = vsel %vm551_vm0, %v545_v5, 0.0  ;;  %v557_v8 = vmul.f32 %v545_v5, %v545_v5  ;;  %2240 = vmatprep.subr.bf16.mxu1 %v2398_v17  ;;  %v546_v30 = vld [vmem:[%s515_s28] sm:$0xff]  ;;  %s2561_s24 = scalar_lea.vmem %s2768_s8, %s2497_s16  ;;  %s2399_s26 = smov 32  }
  0x12   : > { %553 = vadd.xlane.f32.xlu0 %v552_v7  ;;  %v590_v32 = vmul.f32 %v588_v6, %v546_v30  ;;  %v774_v44 = vld [vmem:[%s2561_s24] sm:$0xff]  ;;  %s2402_s15 = smov 120   ;;  %s2610_s20 = scalar_lea.vmem %s2770_s10, %s2497_s16 }
  0x13   : > { %v558_v9 = vsel %vm551_vm0, %v557_v8, 0.0  ;;  %v2362_v52 = vld [vmem:[%s2503_s19] sm:$0xff]   ;;  %s2736_s27 = scalar_lea.vmem %s2773_s13, %s2490_s29 }
  0x14   : > { %2241 = vmatpush3.bf16.msra.mxu1 %v2361_v29  ;;  %v926_v15 = vld [vmem:[%s2610_s20] sm:$0xff] }
  0x15   : > { %2262 = vmatprep.subr.bf16.mxu1 %v2398_v17 }
  0x16   : > { %559 = vadd.xlane.f32.xlu0 %v558_v9 }
  0x9f   : > { %v554_v21 = vpop.xlane.xlu0 %553 }
  0xa0   : > { %v556_v22 = vmul.f32 0.03125, %v554_v21  ;;  %v2139_v21 = vld [vmem:[%s2561_s24 + $0x8] sm:$0xff] }
  0xa2   : > { %v562_v24 = vmul.f32 %v556_v22, %v556_v22  ;;  %v567_v33 = vsub.f32 %v545_v5, %v556_v22 }
  0xa3   : > { %v560_v23 = vpop.xlane.xlu0 %559 }
  0xa4   : > { %v561_v25 = vmul.f32 0.03125, %v560_v23 }
  0xa6   : > { %v563_v26 = vsub.f32 %v561_v25, %v562_v24  ;;  %v2363_v24 = vld [vmem:[%s2503_s19 + $0x8] sm:$0xff]  }
  0xa8   : > { %v564_v27 = vmax.f32 %v563_v26, 0.0 }
  0xaa   : > { %v565_v28 = vadd.f32 1e-05, %v564_v27 }
  0xac   : > { %2370 = vrsqrt.f32 %v565_v28 }
  0xb6   : > { %v2371_v34 = vpop.eup %2370 }
  0xb7   : > { %v568_v35 = vmul.f32 %v2371_v34, %v567_v33  ;;  %v591_v36 = vmul.f32 %v2371_v34, %v2371_v34  ;;  %v2364_v34 = vld [vmem:[%s2503_s19 + $0x10] sm:$0xff]  }
  0xb9   : > { %v575_v39 = vmul.f32 %v573_v31, %v568_v35  ;;  %v592_v40 = vmul.f32 %v591_v36, %v590_v32  ;;  %v593_v41 = vmul.f32 %v568_v35, %v568_v35  ;;  %v2151_v31 = vld [vmem:[%s2561_s24 + $0x10] sm:$0xff] }
  0xbb   : > { %v2563_v42 = vadd.f32 %v2124_v37, %v575_v39  ;;  %v600_v43 = vmul.f32 %v2125_v38, %v593_v41  ;;  %v2163_v39 = vld [vmem:[%s2561_s24 + $0x18] sm:$0xff]  ;;  %s2660_s24 = scalar_lea.vmem %s2772_s12, %s2490_s29  ;;  %s2404_s29 = smov 16  }
  0xbc   : > { %v2365_v41 = vld [vmem:[%s2503_s19 + $0x18] sm:$0xff]  }
  0xbd   : > { %2232 = vmatmul.mubr.msk.f32.vlgmr.msra.gmra.mrb[0].mxu0 %vm551_vm0, %v2563_v42  ;;  %v694_v45 = vmul.f32 %v2563_v42, %v2563_v42  ;;  %v601_v46 = vadd.f32 %v600_v43, %v592_v40 }
  0xbe   : > { %2247 = vmatpush3.msra.mxu0 %v774_v44  ;;  %2248 = vmatprep.mubr.msk.f32.mxu0 %vm2397_vm1, %v2398_v17 }
  0xbf   : > { %696 = vrot.lane.b32.xlu1 %v694_v45, %s2399_s26  ;;  %2251 = vmatprep.subr.bf16.mxu0 %v2398_v17  ;;  %v2576_v48 = vadd.f32 %v2126_v47, %v601_v46 }
 0x131   : > { %v697_v49 = vpop.permute.xlu1 %696 }
 0x132   : > { %v699_v50 = vsel %vm551_vm0, %v2576_v48, %v697_v49 }
 0x133   : > { %v700_v51 = vpack.c.bf16 %v699_v50, %v699_v50 }
 0x135   : > { %2243 = vmatmul.mubr.msk.bf16.vlgmr.msra.gmra.mrb[0].mxu1 %vm725_vm2, %v700_v51 }
 0x136   : > { %2264 = vmatprep.mubr.msk.bf16.mxu1 %vm2397_vm1, %v2398_v17 }
 0x190   : > { %v690_v53 = vpop.f32.mrb[0].mxu0 }
 0x191   : > { %v2233_v54 = vpop.f32.mrb[1].mxu0  ;;  %2249 = vmatmul.mubr.msk.f32.vlgmr.msra.gmra.mrb[2].mxu0 %vm775_vm3, %v690_v53  ;;  %v2584_v55 = vmul.f32 %v690_v53, %v690_v53 }
 0x192   : > { %2252 = vmatpush3.bf16.msra.mxu0 %v2362_v52  ;;  %2253 = vmatprep.mubr.msk.bf16.mxu0 %vm2397_vm1, %v2398_v17 }
 0x193   : > { %852 = vrot.lane.b32.xlu0 %v2584_v55, %s2400_s30  ;;  %2257 = vmatprep.subr.mxu0 %v2398_v17 }
 0x205   : > { %v853_v56 = vpop.permute.xlu0 %852 }
 0x208   : > { %v763_v57 = vpop.f32.mrb[0].mxu1 }
 0x209   : > { %v855_v58 = vsel %vm775_vm3, %v763_v57, %v853_v56  ;;  %v2244_v59 = vpop.f32.mrb[1].mxu1 }
 0x20a   : > { %v856_v60 = vpack.c.bf16 %v855_v58, %v855_v58  ;;  %v766_v61 = vpop.f32.mrb[2].mxu1 }
 0x20b   : > { %v2245_v62 = vpop.f32.mrb[3].mxu1 }
 0x20c   : > { %2254 = vmatmul.mubr.msk.bf16.vlgmr.msra.gmra.mrb[4].mxu0 %vm865_vm4, %v856_v60 }
 0x20d   : > { %2259 = vmatprep.mubr.msk.f32.mxu0 %vm2397_vm1, %v2398_v17  ;;  %2258 = vmatpush3.msra.mxu0 %v926_v15 }
 0x20e   : > { %2268 = vmatprep.subr.mxu0 %v2398_v17 }
 0x264   : > { %v845_v0 = vpop.f32.mrb[2].mxu0 }
 0x265   : > { %v849_v3 = vmul.f32 0.17677669, %v845_v0  ;;  %v2250_v4 = vpop.f32.mrb[3].mxu0 }
 0x267   : > { %v910_v5 = vsel %vm773_vm5, -1e+30, %v849_v3 }
 0x268   : > { %v911_v6 = vsel %vm775_vm3, %v910_v5, -inf }
 0x269   : > { %912 = vmax.xlane.f32.xlu1 %v911_v6 }
 0x27a   : > { %1363 = vrot.lane.b32.xlu1 %v690_v53, %s2401_s14 }
 0x27e   : > { %1742 = vrot.lane.b32.xlu1 %v2584_v55, %s2401_s14 }
 0x2df   : > { %v903_v1 = vpop.f32.mrb[4].mxu0 }
 0x2e0   : > { %v2255_v7 = vpop.f32.mrb[5].mxu0  ;;  %v909_v27 = vmul.f32 0.03125, %v903_v1 }
 0x2e1   : > { %v906_v8 = vpop.f32.mrb[6].mxu0 }
 0x2e2   : > { %v2256_v9 = vpop.f32.mrb[7].mxu0 }
 0x2f6   : > { %v913_v10 = vpop.xlane.xlu1 %912 }
 0x2f7   : > { %v914_v11 = vsub.f32 %v910_v5, %v913_v10 }
 0x2f9   : > { %v915_v12 = vmul.f32 1.442695, %v914_v11 }
 0x2fa   : > { %v1364_v35 = vpop.permute.xlu1 %1363 }
 0x2fb   : > { %2372 = vpow2.f32 %v915_v12 }
 0x2fe   : > { %v1743_v43 = vpop.permute.xlu1 %1742 }
 0x305   : > { %v2373_v13 = vpop.eup %2372 }
 0x306   : > { %v917_v14 = vsel %vm775_vm3, %v2373_v13, 0.0 }
 0x307   : > { %918 = vadd.xlane.f32.xlu0 %v917_v14 }
 0x31d   : > { %1064 = vrot.lane.b32.xlu0 %v690_v53, %s2402_s15 }
 0x321   : > { %1140 = vrot.lane.b32.xlu0 %v763_v57, %s2402_s15 }
 0x325   : > { %1438 = vrot.lane.b32.xlu0 %v763_v57, %s2401_s14 }
 0x329   : > { %1441 = vrot.lane.b32.xlu0 %v2584_v55, %s2402_s15 }
 0x32d   : > { %1664 = vrot.lane.b32.xlu0 %v690_v53, %s2403_s21 }
 0x331   : > { %1739 = vrot.lane.b32.xlu0 %v763_v57, %s2403_s21 }
 0x394   : > { %v919_v16 = vpop.xlane.xlu0 %918 }
 0x395   : > { %2374 = vrcp.f32 %v919_v16 }
 0x398   : > { %v1065_v18 = vpop.permute.xlu0 %1064 }
 0x39c   : > { %v1141_v22 = vpop.permute.xlu0 %1140 }
 0x39d   : > { %v1143_v26 = vsel %vm775_vm3, %v1141_v22, %v2584_v55 }
 0x39e   : > { %v1144_v29 = vpack.c.bf16 %v1143_v26, %v1143_v26 }
 0x39f   : > { %v2375_v19 = vpop.eup %2374 }
 0x3a0   : > { %v2615_v20 = vmul.f32 %v2375_v19, %v2373_v13  ;;  %v1439_v30 = vpop.permute.xlu0 %1438 }
 0x3a2   : > { %2260 = vmatmul.mubr.msk.f32.vlgmr.msra.gmra.mrb[8].mxu0 %vm775_vm3, %v2615_v20  ;;  %v922_v23 = vsub.f32 1.0, %v2615_v20 }
 0x3a3   : > { %2269 = vmatpush3.msra.mxu0 %v2139_v21  ;;  %2270 = vmatprep.mubr.msk.f32.mxu0 %vm2397_vm1, %v2398_v17 }
 0x3a4   : > { %2273 = vmatprep.subr.bf16.mxu0 %v2398_v17  ;;  %v923_v25 = vmul.f32 %v922_v23, %v2615_v20  ;;  %v1442_v33 = vpop.permute.xlu0 %1441 }
 0x3a5   : > { %v1444_v36 = vsel %vm775_vm3, %v1439_v30, %v1442_v33  ;;  %v2366_v30 = vld [vmem:[%s2510_s22] sm:$0xff]  }
 0x3a6   : > { %2271 = vmatmul.mubr.msk.f32.vlgmr.msra.gmra.mrb[10].mxu0 %vm775_vm3, %v1065_v18  ;;  %v924_v28 = vmul.f32 %v923_v25, %v923_v25  ;;  %v1445_v37 = vpack.c.bf16 %v1444_v36, %v1444_v36  ;;  %2263 = vmatpush3.bf16.msra.mxu1 %v2366_v30 }
 0x3a7   : > { %2274 = vmatpush3.bf16.msra.mxu0 %v2363_v24  ;;  %2275 = vmatprep.mubr.msk.bf16.mxu0 %vm2397_vm1, %v2398_v17 }
 0x3a8   : > { %2290 = vmatprep.subr.mxu0 %v2398_v17  ;;  %v2633_v32 = vmul.f32 %v924_v28, %v909_v27  ;;  %v1665_v38 = vpop.permute.xlu0 %1664  ;;  %2279 = vmatprep.subr.mxu1 %v2398_v17 }
 0x3aa   : > { %2276 = vmatmul.mubr.msk.bf16.vlgmr.msra.gmra.mrb[12].mxu0 %vm865_vm4, %v1144_v29 }
 0x3ab   : > { %2291 = vmatpush3.msra.mxu0 %v2151_v31  ;;  %2292 = vmatprep.mubr.msk.f32.mxu0 %vm2397_vm1, %v2398_v17  ;;  %v1000_v31 = vmul.f32 %v2615_v20, %v2615_v20 }
 0x3ac   : > { %2295 = vmatprep.subr.bf16.mxu0 %v2398_v17  ;;  %v1740_v40 = vpop.permute.xlu0 %1739 }
 0x3ad   : > { %v1745_v44 = vsel %vm775_vm3, %v1740_v40, %v1743_v43 }
 0x3ae   : > { %v1746_v45 = vpack.c.bf16 %v1745_v44, %v1745_v44  ;;  %v2145_v44 = vld [vmem:[%s2610_s20 + $0x8] sm:$0xff] }
 0x3b2   : > { %2293 = vmatmul.mubr.msk.f32.vlgmr.msra.gmra.mrb[16].mxu0 %vm775_vm3, %v1364_v35 }
 0x3b3   : > { %2296 = vmatpush3.bf16.msra.mxu0 %v2364_v34  ;;  %2297 = vmatprep.mubr.msk.bf16.mxu0 %vm2397_vm1, %v2398_v17 }
 0x3b4   : > { %2312 = vmatprep.subr.mxu0 %v2398_v17 }
 0x3b6   : > { %2298 = vmatmul.mubr.msk.bf16.vlgmr.msra.gmra.mrb[20].mxu0 %vm865_vm4, %v1445_v37 }
 0x3b7   : > { %2313 = vmatpush3.msra.mxu0 %v2163_v39  ;;  %2314 = vmatprep.mubr.msk.f32.mxu0 %vm2397_vm1, %v2398_v17 }
 0x3b8   : > { %2317 = vmatprep.subr.bf16.mxu0 %v2398_v17 }
 0x3be   : > { %2315 = vmatmul.mubr.msk.f32.vlgmr.msra.gmra.mrb[18].mxu0 %vm775_vm3, %v1665_v38 }
 0x3bf   : > { %2318 = vmatpush3.bf16.msra.mxu0 %v2365_v41  ;;  %2319 = vmatprep.mubr.msk.bf16.mxu0 %vm2397_vm1, %v2398_v17 }
 0x3c2   : > { %2320 = vmatmul.mubr.msk.bf16.vlgmr.msra.gmra.mrb[24].mxu0 %vm865_vm4, %v1746_v45 }
 0x475   : > { %v996_v46 = vpop.f32.mrb[8].mxu0 }
 0x476   : > { %v1058_v47 = vadd.f32 %v996_v46, %v2563_v42  ;;  %v2261_v49 = vpop.f32.mrb[9].mxu0 }
 0x478   : > { %1059 = vst.msk [vmem:[%s2660_s24] sm:$0xff] %vm775_vm3, %v1058_v47 }
 0x479   : > { %v1134_v50 = vpop.f32.mrb[10].mxu0 }
 0x47a   : > { %v1138_v51 = vmul.f32 0.17677669, %v1134_v50  ;;  %v2272_v52 = vpop.f32.mrb[11].mxu0 }
 0x47c   : > { %v1198_v53 = vsel %vm773_vm5, -1e+30, %v1138_v51 }
 0x47d   : > { %v2668_v54 = vpop.f32.mrb[12].mxu0  ;;  %v1199_v55 = vsel %vm775_vm3, %v1198_v53, -inf }
 0x47e   : > { %1200 = vmax.xlane.f32.xlu0 %v1199_v55  ;;  %v2277_v56 = vpop.f32.mrb[13].mxu0  ;;  %v1197_v20 = vmul.f32 0.03125, %v2668_v54 }
 0x47f   : > { %v1194_v57 = vpop.f32.mrb[14].mxu0 }
 0x480   : > { %v2278_v58 = vpop.f32.mrb[15].mxu0 }
 0x485   : > { %v1433_v59 = vpop.f32.mrb[16].mxu0 }
 0x486   : > { %v1437_v60 = vmul.f32 0.17677669, %v1433_v59  ;;  %v2294_v61 = vpop.f32.mrb[17].mxu0  ;;  %v2157_v59 = vld [vmem:[%s2610_s20 + $0x10] sm:$0xff] }
 0x488   : > { %v1499_v62 = vsel %vm773_vm5, -1e+30, %v1437_v60 }
 0x489   : > { %v2674_v0 = vpop.f32.mrb[20].mxu0  ;;  %v1500_v3 = vsel %vm775_vm3, %v1499_v62, -inf }
 0x48a   : > { %1501 = vmax.xlane.f32.xlu1 %v1500_v3  ;;  %v2299_v4 = vpop.f32.mrb[21].mxu0  ;;  %v2368_v3 = vld [vmem:[%s2510_s22 + $0x10] sm:$0xff]  }
 0x48b   : > { %v1495_v5 = vpop.f32.mrb[22].mxu0 }
 0x48c   : > { %v2300_v6 = vpop.f32.mrb[23].mxu0 }
 0x491   : > { %v1734_v1 = vpop.f32.mrb[18].mxu0 }
 0x492   : > { %v1738_v7 = vmul.f32 0.17677669, %v1734_v1  ;;  %v2316_v8 = vpop.f32.mrb[19].mxu0 }
 0x493   : > { %v2169_v8 = vld [vmem:[%s2610_s20 + $0x18] sm:$0xff] }
 0x494   : > { %v1800_v9 = vsel %vm773_vm5, -1e+30, %v1738_v7 }
 0x495   : > { %v2680_v10 = vpop.f32.mrb[24].mxu0  ;;  %v1801_v11 = vsel %vm775_vm3, %v1800_v9, -inf }
 0x496   : > { %1802 = vmax.xlane.f32.xlu0 %v1801_v11  ;;  %v2321_v12 = vpop.f32.mrb[25].mxu0  ;;  %v1799_v11 = vmul.f32 0.03125, %v2680_v10 }
 0x497   : > { %v1796_v13 = vpop.f32.mrb[26].mxu0  ;;  %v2369_v12 = vld [vmem:[%s2510_s22 + $0x18] sm:$0xff]  }
 0x498   : > { %v2322_v14 = vpop.f32.mrb[27].mxu0 }
 0x50b   : > { %v1201_v15 = vpop.xlane.xlu0 %1200 }
 0x50c   : > { %v1202_v16 = vsub.f32 %v1198_v53, %v1201_v15 }
 0x50e   : > { %v1203_v18 = vmul.f32 1.442695, %v1202_v16 }
 0x510   : > { %2376 = vpow2.f32 %v1203_v18 }
 0x517   : > { %v1502_v19 = vpop.xlane.xlu1 %1501 }
 0x518   : > { %v1503_v21 = vsub.f32 %v1499_v62, %v1502_v19  ;;  %v1498_v62 = vmul.f32 0.03125, %v2674_v0 }
 0x51a   : > { %v2377_v22 = vpop.eup %2376  ;;  %v1504_v23 = vmul.f32 1.442695, %v1503_v21 }
 0x51b   : > { %v1205_v2 = vsel %vm775_vm3, %v2377_v22, 0.0 }
 0x51c   : > { %2378 = vpow2.f32 %v1504_v23  ;;  %1206 = vadd.xlane.f32.xlu0 %v1205_v2 }
 0x523   : > { %v1803_v63 = vpop.xlane.xlu0 %1802 }
 0x524   : > { %v1804_v24 = vsub.f32 %v1800_v9, %v1803_v63 }
 0x526   : > { %v2379_v25 = vpop.eup %2378  ;;  %v1805_v26 = vmul.f32 1.442695, %v1804_v24 }
 0x527   : > { %v1506_v27 = vsel %vm775_vm3, %v2379_v25, 0.0 }
 0x528   : > { %2380 = vpow2.f32 %v1805_v26  ;;  %1507 = vadd.xlane.f32.xlu0 %v1506_v27 }
 0x532   : > { %v2381_v28 = vpop.eup %2380 }
 0x533   : > { %v1807_v29 = vsel %vm775_vm3, %v2381_v28, 0.0 }
 0x534   : > { %1808 = vadd.xlane.f32.xlu1 %v1807_v29 }
 0x53e   : > { %1002 = vrot.lane.b32.xlu0 %v1000_v31, %s2400_s30 }
 0x5a9   : > { %v1207_v33 = vpop.xlane.xlu0 %1206 }
 0x5aa   : > { %2382 = vrcp.f32 %v1207_v33 }
 0x5b4   : > { %v2383_v34 = vpop.eup %2382 }
 0x5b5   : > { %v1209_v35 = vmul.f32 %v2383_v34, %v2377_v22  ;;  %v1508_v36 = vpop.xlane.xlu0 %1507 }
 0x5b6   : > { %2384 = vrcp.f32 %v1508_v36 }
 0x5b7   : > { %v1289_v37 = vmul.f32 %v1209_v35, %v1209_v35  ;;  %v1210_v38 = vsub.f32 1.0, %v1209_v35 }
 0x5b9   : > { %1291 = vrot.lane.b32.xlu1 %v1289_v37, %s2400_s30  ;;  %v1003_v39 = vpop.permute.xlu0 %1002  ;;  %v1211_v40 = vmul.f32 %v1210_v38, %v1209_v35 }
 0x5ba   : > { %v1005_v41 = vsel %vm775_vm3, %v2633_v32, %v1003_v39  ;;  %v2367_v32 = vld [vmem:[%s2510_s22 + $0x8] sm:$0xff]   ;;  %s2405_s22 = smov 24  }
 0x5bb   : > { %v1006_v43 = vpack.c.bf16 %v1005_v41, %v1005_v41  ;;  %v1212_v45 = vmul.f32 %v1211_v40, %v1211_v40 }
 0x5bd   : > { %2265 = vmatmul.mubr.msk.bf16.vlgmr.msra.gmra.mrb[4].mxu1 %vm865_vm4, %v1006_v43  ;;  %v1213_v46 = vmul.f32 %v1212_v45, %v1197_v20 }
 0x5be   : > { %2280 = vmatpush3.msra.mxu1 %v2145_v44  ;;  %2281 = vmatprep.mubr.msk.f32.mxu1 %vm2397_vm1, %v2398_v17 }
 0x5bf   : > { %2284 = vmatprep.subr.bf16.mxu1 %v2398_v17 }
 0x5c0   : > { %v2385_v47 = vpop.eup %2384 }
 0x5c1   : > { %v1510_v49 = vmul.f32 %v2385_v47, %v2379_v25  ;;  %v1809_v50 = vpop.xlane.xlu1 %1808 }
 0x5c2   : > { %2386 = vrcp.f32 %v1809_v50 }
 0x5c3   : > { %v1590_v51 = vmul.f32 %v1510_v49, %v1510_v49  ;;  %v1511_v55 = vsub.f32 1.0, %v1510_v49 }
 0x5c5   : > { %1592 = vrot.lane.b32.xlu1 %v1590_v51, %s2400_s30  ;;  %2282 = vmatmul.mubr.msk.f32.vlgmr.msra.gmra.mrb[8].mxu1 %vm775_vm3, %v1209_v35  ;;  %v1512_v60 = vmul.f32 %v1511_v55, %v1510_v49 }
 0x5c6   : > { %2285 = vmatpush3.bf16.msra.mxu1 %v2367_v32  ;;  %2286 = vmatprep.mubr.msk.bf16.mxu1 %vm2397_vm1, %v2398_v17 }
 0x5c7   : > { %2301 = vmatprep.subr.mxu1 %v2398_v17  ;;  %v1513_v61 = vmul.f32 %v1512_v60, %v1512_v60 }
 0x5c9   : > { %v1514_v4 = vmul.f32 %v1513_v61, %v1498_v62 }
 0x5cc   : > { %v2387_v52 = vpop.eup %2386 }
 0x5cd   : > { %v1811_v53 = vmul.f32 %v2387_v52, %v2381_v28 }
 0x5cf   : > { %v1891_v54 = vmul.f32 %v1811_v53, %v1811_v53  ;;  %v1812_v5 = vsub.f32 1.0, %v1811_v53 }
 0x5d1   : > { %1893 = vrot.lane.b32.xlu1 %v1891_v54, %s2400_s30  ;;  %v1813_v9 = vmul.f32 %v1812_v5, %v1811_v53 }
 0x5d3   : > { %v1814_v0 = vmul.f32 %v1813_v9, %v1813_v9 }
 0x5d5   : > { %v1815_v13 = vmul.f32 %v1814_v0, %v1799_v11 }
 0x62b   : > { %v1292_v56 = vpop.permute.xlu1 %1291 }
 0x62c   : > { %v1294_v57 = vsel %vm775_vm3, %v1213_v46, %v1292_v56 }
 0x62d   : > { %v1295_v58 = vpack.c.bf16 %v1294_v57, %v1294_v57 }
 0x62f   : > { %2287 = vmatmul.mubr.msk.bf16.vlgmr.msra.gmra.mrb[12].mxu1 %vm865_vm4, %v1295_v58 }
 0x630   : > { %2302 = vmatpush3.msra.mxu1 %v2157_v59  ;;  %2303 = vmatprep.mubr.msk.f32.mxu1 %vm2397_vm1, %v2398_v17 }
 0x631   : > { %2306 = vmatprep.subr.bf16.mxu1 %v2398_v17 }
 0x637   : > { %v1593_v6 = vpop.permute.xlu1 %1592  ;;  %2304 = vmatmul.mubr.msk.f32.vlgmr.msra.gmra.mrb[10].mxu1 %vm775_vm3, %v1510_v49 }
 0x638   : > { %v1595_v1 = vsel %vm775_vm3, %v1514_v4, %v1593_v6  ;;  %2307 = vmatpush3.bf16.msra.mxu1 %v2368_v3  ;;  %2308 = vmatprep.mubr.msk.bf16.mxu1 %vm2397_vm1, %v2398_v17 }
 0x639   : > { %v1596_v7 = vpack.c.bf16 %v1595_v1, %v1595_v1  ;;  %2323 = vmatprep.subr.mxu1 %v2398_v17 }
 0x63b   : > { %2309 = vmatmul.mubr.msk.bf16.vlgmr.msra.gmra.mrb[16].mxu1 %vm865_vm4, %v1596_v7 }
 0x63c   : > { %2324 = vmatpush3.msra.mxu1 %v2169_v8  ;;  %2325 = vmatprep.mubr.msk.f32.mxu1 %vm2397_vm1, %v2398_v17 }
 0x63d   : > { %2328 = vmatprep.subr.bf16.mxu1 %v2398_v17 }
 0x643   : > { %v1894_v14 = vpop.permute.xlu1 %1893  ;;  %2326 = vmatmul.mubr.msk.f32.vlgmr.msra.gmra.mrb[20].mxu1 %vm775_vm3, %v1811_v53 }
 0x644   : > { %v1896_v15 = vsel %vm775_vm3, %v1815_v13, %v1894_v14  ;;  %2329 = vmatpush3.bf16.msra.mxu1 %v2369_v12  ;;  %2330 = vmatprep.mubr.msk.bf16.mxu1 %vm2397_vm1, %v2398_v17 }
 0x645   : > { %v1897_v16 = vpack.c.bf16 %v1896_v15, %v1896_v15 }
 0x647   : > { %2331 = vmatmul.mubr.msk.bf16.vlgmr.msra.gmra.mrb[24].mxu1 %vm865_vm4, %v1897_v16 }
 0x690   : > { %v1052_v10 = vpop.f32.mrb[4].mxu1 }
 0x691   : > { %v1060_v18 = vadd.f32 %v1052_v10, %v2576_v48  ;;  %v2266_v19 = vpop.f32.mrb[5].mxu1 }
 0x692   : > { %v1055_v21 = vpop.f32.mrb[6].mxu1 }
 0x693   : > { %1061 = vst.msk [vmem:[%s2736_s27] sm:$0xff] %vm775_vm3, %v1060_v18  ;;  %v2267_v22 = vpop.f32.mrb[7].mxu1 }
 0x698   : > { %v1285_v23 = vpop.f32.mrb[8].mxu1 }
 0x699   : > { %1349 = vrot.lane.b32.xlu0 %v1285_v23, %s2400_s30  ;;  %v2283_v17 = vpop.f32.mrb[9].mxu1 }
 0x702   : > { %v1342_v2 = vpop.f32.mrb[12].mxu1 }
 0x703   : > { %1356 = vrot.lane.b32.xlu1 %v1342_v2, %s2400_s30  ;;  %v2288_v63 = vpop.f32.mrb[13].mxu1 }
 0x704   : > { %v1345_v24 = vpop.f32.mrb[14].mxu1 }
 0x705   : > { %v2289_v25 = vpop.f32.mrb[15].mxu1 }
 0x70a   : > { %v1586_v26 = vpop.f32.mrb[10].mxu1 }
 0x70b   : > { %v1350_v27 = vpop.permute.xlu0 %1349  ;;  %1650 = vrot.lane.b32.xlu0 %v1586_v26, %s2404_s29  ;;  %v2305_v28 = vpop.f32.mrb[11].mxu1 }
 0x70c   : > { %v1352_v29 = vadd.f32 %v1350_v27, %v2563_v42 }
 0x70e   : > { %1354 = vst.msk [vmem:[%s2660_s24] sm:$0xff] %vm1353_vm6, %v1352_v29  ;;  %v1643_v30 = vpop.f32.mrb[16].mxu1 }
 0x70f   : > { %1657 = vrot.lane.b32.xlu1 %v1643_v30, %s2404_s29  ;;  %v2310_v31 = vpop.f32.mrb[17].mxu1 }
 0x710   : > { %v1646_v33 = vpop.f32.mrb[18].mxu1 }
 0x711   : > { %v2311_v34 = vpop.f32.mrb[19].mxu1 }
 0x716   : > { %v1887_v35 = vpop.f32.mrb[20].mxu1 }
 0x717   : > { %1951 = vrot.lane.b32.xlu0 %v1887_v35, %s2405_s22  ;;  %v2327_v36 = vpop.f32.mrb[21].mxu1 }
 0x71a   : > { %v1944_v37 = vpop.f32.mrb[24].mxu1 }
 0x71b   : > { %1958 = vrot.lane.b32.xlu1 %v1944_v37, %s2405_s22  ;;  %v2332_v38 = vpop.f32.mrb[25].mxu1 }
 0x71c   : > { %v1947_v39 = vpop.f32.mrb[26].mxu1 }
 0x71d   : > { %v2333_v40 = vpop.f32.mrb[27].mxu1 }
 0x775   : > { %v1357_v41 = vpop.permute.xlu1 %1356 }
 0x776   : > { %v1359_v20 = vadd.f32 %v1357_v41, %v2576_v48 }
 0x778   : > { %1360 = vst.msk [vmem:[%s2736_s27] sm:$0xff] %vm1353_vm6, %v1359_v20 }
 0x77d   : > { %v1651_v43 = vpop.permute.xlu0 %1650 }
 0x77e   : > { %v1653_v44 = vadd.f32 %v1651_v43, %v2563_v42 }
 0x780   : > { %1655 = vst.msk [vmem:[%s2660_s24] sm:$0xff] %vm1654_vm7, %v1653_v44 }
 0x781   : > { %v1658_v45 = vpop.permute.xlu1 %1657 }
 0x782   : > { %v1660_v46 = vadd.f32 %v1658_v45, %v2576_v48 }
 0x784   : > { %1661 = vst.msk [vmem:[%s2736_s27] sm:$0xff] %vm1654_vm7, %v1660_v46 }
 0x789   : > { %v1952_v47 = vpop.permute.xlu0 %1951 }
 0x78a   : > { %v1954_v49 = vadd.f32 %v1952_v47, %v2563_v42 }
 0x78c   : > { %1956 = vst.msk [vmem:[%s2660_s24] sm:$0xff] %vm1955_vm8, %v1954_v49 }
 0x78d   : > { %v1959_v50 = vpop.permute.xlu1 %1958 }
 0x78e   : > { %v1961_v32 = vadd.f32 %v1959_v50, %v2576_v48 }
 0x790   : > { %1962 = vst.msk [vmem:[%s2736_s27] sm:$0xff] %vm1955_vm8, %v1961_v32 }
 0x791 PF: > { %s24_s25 = sadd.s32 1, %s2394_s25  }
 0x792   : > { %p21_p4 = scmp.ge.s32.totalorder %s24_s25, 4  }
 0x794   :  { %23 = sbr.rel (!%p21_p4) target bundleno = 1 (0x1), region = 137 }

// kernel: decoder_vmp_forward.9
= control target key start
LH: loop header
LB: loop body
LE: loop exit
PB: predicated region body
PF: predicated region fallthrough
CT: control target
= control target key end

     0   :  { %s2637_s30 = smov 0   ;;  %s2963_s0 = inlined_call_operand.vmem [shape: f32[2,8,32], index: 0, kind: input, shape index: {}]   ;;  %s2964_s1 = inlined_call_operand.vmem [shape: f32[2,8,32], index: 1, kind: input, shape index: {}]   ;;  %s2965_s2 = inlined_call_operand.vmem [shape: f32[1,32], index: 2, kind: input, shape index: {}]   ;;  %s2966_s3 = inlined_call_operand.vmem [shape: f32[1,32], index: 3, kind: input, shape index: {}]   ;;  %s2967_s4 = inlined_call_operand.vmem [shape: f32[1,32], index: 4, kind: input, shape index: {}]   ;;  %s2968_s5 = inlined_call_operand.vmem [shape: f32[1,32], index: 5, kind: input, shape index: {}]   ;;  %s2969_s6 = inlined_call_operand.vmem [shape: f32[32,96], index: 6, kind: input, shape index: {}]   ;;  %s2970_s7 = inlined_call_operand.vmem [shape: bf16[64,96], index: 7, kind: input, shape index: {}]   ;;  %s2971_s8 = inlined_call_operand.vmem [shape: f32[2,8,32], index: 8, kind: output, shape index: {0}]   ;;  %s2972_s9 = inlined_call_operand.vmem [shape: f32[2,8,32], index: 9, kind: output, shape index: {1}]  }
   0x1 LB: > { %s2214_s10 = sadd.s32 4294967295, %s2567_s30   ;;  %p2218_p0 = scmp.ge.s32.totalorder %s2567_s30, 1  ;;  %s2567_s30 = sphi %s2637_s30, %s20_s30  }
   0x2   : > { %p298_p1 = scmp.lt.s32.totalorder %s2567_s30, 3 }
   0x4   : > { %p299_p2 = pnand %p2218_p0, %p298_p1 }
   0x5   : > { %p340_p3 = scmp.lt.s32.totalorder (!%p299_p2), %s2214_s10, 1  ;;  %v359_v0 = vld [vmem:[%s2965_s2] sm:$0x1] (!%p299_p2)  ;;  %v382_v1 = vlaneseq (!%p299_p2)  ;;  %vm363_vm0 = vcmask (!%p299_p2), 261120   ;;  %v422_v11 = vld [vmem:[%s2969_s6 + $0x8] sm:$0xff] (!%p299_p2)  ;;  %v2569_v13 = vmov (!%p299_p2), 0.0|0.0  }
   0x6   : > { %302 = sbr.rel (%p299_p2) target bundleno = 2509 (0x9cd), region = 52  ;;  %v395_v3 = vmul.f32 (!%p299_p2), %v359_v0, %v359_v0  ;;  %v421_v10 = vld [vmem:[%s2969_s6] sm:$0xff] (!%p299_p2)  ;;  %2479 = vmatprep.subr.bf16.mxu0 (!%p299_p2), %v2569_v13  ;;  %v423_v14 = vld [vmem:[%s2969_s6 + $0x10] sm:$0xff] (!%p299_p2)  ;;  %v424_v15 = vld [vmem:[%s2969_s6 + $0x18] sm:$0xff] (!%p299_p2)  ;;  %vm2570_vm1 = vmmov (!%p299_p2), 0   ;;  %v2571_v17 = vmov (!%p299_p2), 0.0  }
   0x7   : > { %v2649_v2 = vshrl.u32 (!%p299_p2), %v382_v1, 7  ;;  %v2480_v12 = vpack.c.bf16 (!%p299_p2), %v422_v11, %v421_v10  ;;  %v2483_v16 = vpack.c.bf16 (!%p299_p2), %v424_v15, %v423_v14  ;;  %2328 = vmatprep.mubr.msk.f32.mxu0 (!%p299_p2), %vm2570_vm1, %v2571_v17  ;;  %2331 = vmatprep.subr.bf16.mxu1 (!%p299_p2), %v2571_v17  ;;  %v2223_v33 = vld [vmem:[%s2967_s4] ss:$0 sm:$0xff] (!%p299_p2)  ;;  %v2540_v42 = vld [vmem:[%s2970_s7 + $0x8] sm:$0xff] (!%p299_p2)   ;;  %v2541_v43 = vld [vmem:[%s2970_s7 + $0x10] sm:$0xff] (!%p299_p2)   ;;  %s2572_s21 = smov (!%p299_p2), 96  }
   0x8   : > { %2339 = vmatprep.mubr.msk.bf16.mxu1 (!%p299_p2), %vm2570_vm1, %v2571_v17  ;;  %v2224_v34 = vld [vmem:[%s2966_s3] ss:$0 sm:$0xff] (!%p299_p2)  ;;  %v2542_v44 = vld [vmem:[%s2970_s7 + $0x18] sm:$0xff] (!%p299_p2)   ;;  %s2573_s22 = smov (!%p299_p2), 32   ;;  %vm589_vm2 = vcmask (!%p299_p2), 64512   ;;  %vm537_vm3 = vcmask (!%p299_p2), 523264  }
   0x9   : > { %v384_v4 = vsub.s32 (!%p299_p2), 0, %v2649_v2  ;;  %2481 = vmatpush3.bf16.msra.mxu0 (!%p299_p2), %v2480_v12  ;;  %v2539_v41 = vld [vmem:[%s2970_s7] sm:$0xff] (!%p299_p2)   ;;  %v2732_v54 = vand.u32 (!%p299_p2), 127, %v382_v1  ;;  %s2574_s25 = smov (!%p299_p2), 64   ;;  %s2575_s26 = smov (!%p299_p2), 88   ;;  %vm869_vm5 = vcmask (!%p299_p2), 1043456  }
   0xa   : > { %2482 = vmatprep.subr.bf16.mxu0 (!%p299_p2), %v2569_v13  ;;  %2332 = vmatpush3.bf16.msra.mxu1 (!%p299_p2), %v2539_v41  ;;  %v2225_v49 = vld [vmem:[%s2968_s5] ss:$0 sm:$0xff] (!%p299_p2)  ;;  %s2577_s28 = smov (!%p299_p2), 112   ;;  %s2578_s29 = smov (!%p299_p2), 80   ;;  %vm1342_vm6 = vcmask (!%p299_p2), 130112   ;;  %vm1726_vm7 = vcmask (!%p299_p2), 195712  }
   0xb   : > { %v400_v6 = vrot.slane (!%p299_p2), %v395_v3, %v384_v4  ;;  %v385_v27 = vrot.slane (!%p299_p2), %v359_v0, %v384_v4  ;;  %2333 = vmatprep.subr.bf16.mxu1 (!%p299_p2), %v2571_v17  ;;  %vm585_vm4 = vcmp.gt.s32.totalorder (!%p299_p2), %v2732_v54, %v2649_v2  ;;  %s2579_s14 = smov (!%p299_p2), 56   ;;  %s2580_s15 = smov (!%p299_p2), 104   ;;  %vm2110_vm8 = vcmask (!%p299_p2), 261312  }
   0xc   : > { %s2582_s19 = smov (!%p299_p2), 48   ;;  %s2583_s20 = smov (!%p299_p2), 40  }
   0xd   : > { %s2974_s10 = smov (!%p340_p3, %s2214_s10), 1  ;;  %2484 = vmatpush3.bf16.msra.mxu0 %v2483_v16  ;;  %s2586_s23 = smov 24  }
   0xe   : > { %s2651_s13 = sshll.u32 %s2974_s10, 3  ;;  %2343 = vmatprep.subr.mxu0 %v2571_v17  ;;  %2334 = vmatpush3.bf16.msra.mxu1 %v2540_v42 }
   0xf   : > { %s343_s16 = scalar_lea.vmem %s2963_s0, %s2651_s13  ;;  %s347_s27 = scalar_lea.vmem %s2964_s1, %s2651_s13  ;;  %2335 = vmatprep.subr.bf16.mxu1 %v2571_v17 }
  0x10   : > { %v357_v5 = vld [vmem:[%s343_s16] sm:$0xff]  ;;  %s2819_s12 = scalar_lea.vmem %s2971_s8, %s2651_s13  ;;  %s2840_s18 = scalar_lea.vmem %s2972_s9, %s2651_s13 }
  0x11   : > { %v364_v7 = vsel %vm363_vm0, %v357_v5, 0.0  ;;  %v369_v8 = vmul.f32 %v357_v5, %v357_v5  ;;  %v358_v26 = vld [vmem:[%s347_s27] sm:$0xff]  ;;  %s2576_s27 = smov 120   ;;  %s2581_s13 = smov 72  }
  0x12   : > { %365 = vadd.xlane.f32.xlu0 %v364_v7  ;;  %v402_v28 = vmul.f32 %v400_v6, %v358_v26  ;;  %2336 = vmatpush3.bf16.msra.mxu1 %v2541_v43 }
  0x13   : > { %v370_v9 = vsel %vm363_vm0, %v369_v8, 0.0  ;;  %2337 = vmatprep.subr.bf16.mxu1 %v2571_v17 }
  0x16   : > { %371 = vadd.xlane.f32.xlu0 %v370_v9  ;;  %2338 = vmatpush3.bf16.msra.mxu1 %v2542_v44 }
  0x17   : > { %2360 = vmatprep.subr.mxu1 %v2571_v17 }
  0x9f   : > { %v366_v18 = vpop.xlane.xlu0 %365 }
  0xa0   : > { %v368_v19 = vmul.f32 0.03125, %v366_v18 }
  0xa2   : > { %v374_v21 = vmul.f32 %v368_v19, %v368_v19  ;;  %v379_v29 = vsub.f32 %v357_v5, %v368_v19 }
  0xa3   : > { %v372_v20 = vpop.xlane.xlu0 %371 }
  0xa4   : > { %v373_v22 = vmul.f32 0.03125, %v372_v20 }
  0xa6   : > { %v375_v23 = vsub.f32 %v373_v22, %v374_v21 }
  0xa8   : > { %v376_v24 = vmax.f32 %v375_v23, 0.0 }
  0xaa   : > { %v377_v25 = vadd.f32 1e-05, %v376_v24 }
  0xac   : > { %2543 = vrsqrt.f32 %v377_v25 }
  0xb6   : > { %v2544_v30 = vpop.eup %2543 }
  0xb7   : > { %v380_v31 = vmul.f32 %v2544_v30, %v379_v29  ;;  %v403_v32 = vmul.f32 %v2544_v30, %v2544_v30 }
  0xb9   : > { %v387_v35 = vmul.f32 %v385_v27, %v380_v31  ;;  %v404_v36 = vmul.f32 %v403_v32, %v402_v28  ;;  %v405_v37 = vmul.f32 %v380_v31, %v380_v31 }
  0xbb   : > { %v2688_v38 = vadd.f32 %v2223_v33, %v387_v35  ;;  %v412_v39 = vmul.f32 %v2224_v34, %v405_v37 }
  0xbd   : > { %2329 = vmatmul.mubr.msk.f32.vlgmr.msra.gmra.mrb[0].mxu0 %vm363_vm0, %v2688_v38  ;;  %v413_v40 = vadd.f32 %v412_v39, %v404_v36  ;;  %v506_v47 = vmul.f32 %v2688_v38, %v2688_v38 }
  0xbe   : > { %2345 = vmatprep.mubr.msk.f32.mxu0 %vm2570_vm1, %v2571_v17 }
  0xbf   : > { %v2721_v50 = vadd.f32 %v2225_v49, %v413_v40 }
 0x190   : > { %v2710_v45 = vpop.f32.mrb[0].mxu0 }
 0x191   : > { %587 = vrot.lane.b32.xlu1 %v2710_v45, %s2572_s21  ;;  %v2330_v46 = vpop.f32.mrb[1].mxu0  ;;  %v665_v58 = vmul.f32 %v2710_v45, %v2710_v45 }
 0x193   : > { %v2757_v5 = vpack.c.bf16 %v665_v58, %v665_v58 }
 0x195   : > { %508 = vrot.lane.b32.xlu1 %v506_v47, %s2573_s22  ;;  %s2585_s22 = smov 16  }
 0x203   : > { %v588_v48 = vpop.permute.xlu1 %587 }
 0x204   : > { %2344 = vmatpush3.xpose.msk.msra.mxu0 %vm589_vm2, %v588_v48 }
 0x205   : > { %2348 = vmatprep.subr.bf16.mxu0 %v2571_v17 }
 0x207   : > { %2346 = vmatmul.mubr.msk.f32.vlgmr.msra.gmra.mrb[2].mxu0 %vm589_vm2, %v2710_v45  ;;  %v509_v51 = vpop.permute.xlu1 %508 }
 0x208   : > { %v511_v52 = vsel %vm363_vm0, %v2721_v50, %v509_v51  ;;  %2350 = vmatprep.mubr.msk.bf16.mxu0 %vm2570_vm1, %v2571_v17 }
 0x209   : > { %v512_v53 = vpack.c.bf16 %v511_v52, %v511_v52 }
 0x20b   : > { %2340 = vmatmul.mubr.msk.bf16.vlgmr.msra.gmra.mrb[0].mxu1 %vm537_vm3, %v512_v53 }
 0x20c   : > { %2362 = vmatprep.mubr.msk.f32.mxu1 %vm2570_vm1, %v2571_v17 }
 0x2da   : > { %v660_v55 = vpop.f32.mrb[2].mxu0 }
 0x2db   : > { %v664_v56 = vmul.f32 0.17677669, %v660_v55  ;;  %v2347_v57 = vpop.f32.mrb[3].mxu0 }
 0x2dd   : > { %v769_v59 = vsel %vm585_vm4, -1e+30, %v664_v56 }
 0x2de   : > { %v575_v60 = vpop.f32.mrb[0].mxu1  ;;  %v770_v61 = vsel %vm589_vm2, %v769_v59, -inf }
 0x2df   : > { %v666_v62 = vadd.f32 %v665_v58, %v575_v60  ;;  %v2742_v63 = vpack.c.bf16 %v575_v60, %v575_v60  ;;  %v2341_v0 = vpop.f32.mrb[1].mxu1  ;;  %771 = vmax.xlane.f32.xlu0 %v770_v61 }
 0x2e0   : > { %v578_v1 = vpop.f32.mrb[2].mxu1 }
 0x2e1   : > { %671 = vrot.lane.b32.xlu1 %v2742_v63, %s2572_s21  ;;  %v2342_v3 = vpop.f32.mrb[3].mxu1  ;;  %v2746_v4 = vpack.c.bf16 %v666_v62, %v666_v62 }
 0x2f5   : > { %720 = vrot.lane.b32.xlu0 %v2746_v4, %s2572_s21  ;;  %s2584_s21 = smov 8  }
 0x2f9   : > { %785 = vrot.lane.b32.xlu0 %v2710_v45, %s2574_s25 }
 0x2fd   : > { %864 = vrot.lane.b32.xlu0 %v2742_v63, %s2574_s25 }
 0x301   : > { %967 = vrot.lane.b32.xlu0 %v2710_v45, %s2575_s26 }
 0x305   : > { %965 = vrot.lane.b32.xlu0 %v2710_v45, %s2576_s27 }
 0x309   : > { %1047 = vrot.lane.b32.xlu0 %v2742_v63, %s2575_s26 }
 0x30d   : > { %1045 = vrot.lane.b32.xlu0 %v2757_v5, %s2576_s27 }
 0x311   : > { %1097 = vrot.lane.b32.xlu0 %v2746_v4, %s2575_s26 }
 0x315   : > { %1095 = vrot.lane.b32.xlu0 %v2742_v63, %s2576_s27 }
 0x319   : > { %1350 = vrot.lane.b32.xlu0 %v2710_v45, %s2577_s28 }
 0x353   : > { %v672_v6 = vpop.permute.xlu1 %671 }
 0x354   : > { %v677_v7 = vsel %vm589_vm2, %v672_v6, 0 }
 0x355   : > { %2349 = vmatpush3.bf16.xpose.msra.mxu0 %v677_v7 }
 0x356   : > { %2354 = vmatprep.subr.bf16.mxu0 %v2571_v17 }
 0x35c   : > { %2351 = vmatmul.mubr.msk.bf16.vlgmr.msra.gmra.mrb[4].mxu0 %vm589_vm2, %v2757_v5 }
 0x35d   : > { %2356 = vmatprep.mubr.msk.bf16.mxu0 %vm2570_vm1, %v2571_v17 }
 0x36c   : > { %v772_v8 = vpop.xlane.xlu0 %771 }
 0x36d   : > { %v773_v9 = vsub.f32 %v769_v59, %v772_v8 }
 0x36f   : > { %v774_v10 = vmul.f32 1.442695, %v773_v9 }
 0x370   : > { %v721_v11 = vpop.permute.xlu0 %720 }
 0x371   : > { %2545 = vpow2.f32 %v774_v10  ;;  %v726_v12 = vsel %vm589_vm2, %v721_v11, 0 }
 0x372   : > { %2355 = vmatpush3.bf16.xpose.msra.mxu0 %v726_v12 }
 0x373   : > { %2371 = vmatprep.subr.bf16.mxu0 %v2571_v17 }
 0x374   : > { %v786_v13 = vpop.permute.xlu0 %785 }
 0x375   : > { %2361 = vmatpush3.msra.mxu1 %v786_v13 }
 0x376   : > { %2365 = vmatprep.subr.bf16.mxu1 %v2571_v17 }
 0x378   : > { %v865_v21 = vpop.permute.xlu0 %864 }
 0x379   : > { %2357 = vmatmul.mubr.msk.bf16.vlgmr.msra.gmra.mrb[4].mxu0 %vm589_vm2, %v2742_v63  ;;  %v871_v23 = vsel %vm869_vm5, %v865_v21, 0 }
 0x37a   : > { %2373 = vmatprep.mubr.msk.bf16.mxu0 %vm2570_vm1, %v2571_v17 }
 0x37b   : > { %v2546_v14 = vpop.eup %2545 }
 0x37c   : > { %v776_v15 = vsel %vm589_vm2, %v2546_v14, 0.0  ;;  %v968_v26 = vpop.permute.xlu0 %967 }
 0x37d   : > { %777 = vadd.xlane.f32.xlu1 %v776_v15 }
 0x380   : > { %v966_v27 = vpop.permute.xlu0 %965 }
 0x384   : > { %v1048_v30 = vpop.permute.xlu0 %1047 }
 0x385   : > { %v1053_v41 = vsel %vm589_vm2, %v1048_v30, 0 }
 0x388   : > { %v1046_v40 = vpop.permute.xlu0 %1045 }
 0x38c   : > { %v1098_v42 = vpop.permute.xlu0 %1097 }
 0x38d   : > { %v1103_v43 = vsel %vm589_vm2, %v1098_v42, 0 }
 0x38e   : > { %913 = vrot.lane.b32.xlu1 %v2746_v4, %s2574_s25 }
 0x390   : > { %v1096_v44 = vpop.permute.xlu0 %1095 }
 0x392   : > { %1352 = vrot.lane.b32.xlu1 %v2710_v45, %s2578_s29 }
 0x394   : > { %v1351_v47 = vpop.permute.xlu0 %1350 }
 0x40a   : > { %v778_v16 = vpop.xlane.xlu1 %777 }
 0x40b   : > { %2547 = vrcp.f32 %v778_v16 }
 0x40e   : > { %v914_v18 = vpop.permute.xlu1 %913 }
 0x40f   : > { %v919_v19 = vsel %vm869_vm5, %v914_v18, 0 }
 0x410   : > { %2372 = vmatpush3.bf16.msra.mxu0 %v919_v19 }
 0x411   : > { %2382 = vmatprep.subr.bf16.mxu0 %v2571_v17 }
 0x412   : > { %v1353_v46 = vpop.permute.xlu1 %1352 }
 0x415   : > { %v2548_v20 = vpop.eup %2547 }
 0x416   : > { %v780_v22 = vmul.f32 %v2548_v20, %v2546_v14 }
 0x418   : > { %2363 = vmatmul.mubr.msk.f32.vlgmr.msra.gmra.mrb[4].mxu1 %vm589_vm2, %v780_v22  ;;  %v862_v24 = vmul.f32 %v780_v22, %v780_v22  ;;  %v781_v28 = vsub.f32 1.0, %v780_v22 }
 0x419   : > { %2366 = vmatpush3.bf16.msra.mxu1 %v871_v23  ;;  %2367 = vmatprep.mubr.msk.bf16.mxu1 %vm2570_vm1, %v2571_v17 }
 0x41a   : > { %v863_v25 = vpack.c.bf16 %v862_v24, %v862_v24  ;;  %2377 = vmatprep.subr.mxu1 %v2571_v17  ;;  %v782_v29 = vmul.f32 %v781_v28, %v780_v22 }
 0x41c   : > { %2368 = vmatmul.mubr.msk.bf16.vlgmr.msra.gmra.mrb[8].mxu1 %vm589_vm2, %v863_v25  ;;  %v783_v33 = vmul.f32 %v782_v29, %v782_v29 }
 0x41d   : > { %2379 = vmatprep.mubr.msk.f32.mxu1 %vm2570_vm1, %v2571_v17 }
 0x422   : > { %2378 = vmatpush3.xpose.msk.msra.mxu1 %vm589_vm2, %v968_v26 }
 0x423   : > { %2394 = vmatprep.subr.mxu1 %v2571_v17 }
 0x425   : > { %2380 = vmatmul.mubr.msk.f32.vlgmr.msra.gmra.mrb[6].mxu1 %vm589_vm2, %v966_v27 }
 0x426   : > { %2396 = vmatprep.mubr.msk.f32.mxu1 %vm2570_vm1, %v2571_v17 }
 0x44c   : > { %v762_v31 = vpop.f32.mrb[4].mxu0 }
 0x44d   : > { %v768_v32 = vmul.f32 0.03125, %v762_v31  ;;  %v2358_v34 = vpop.f32.mrb[5].mxu0 }
 0x44e   : > { %v765_v35 = vpop.f32.mrb[6].mxu0 }
 0x44f   : > { %v784_v36 = vmul.f32 %v783_v33, %v768_v32  ;;  %v2359_v37 = vpop.f32.mrb[7].mxu0 }
 0x451   : > { %v861_v39 = vpack.c.bf16 %v784_v36, %v784_v36 }
 0x453   : > { %2374 = vmatmul.mubr.msk.bf16.vlgmr.msra.gmra.mrb[8].mxu0 %vm589_vm2, %v861_v39 }
 0x454   : > { %2383 = vmatpush3.bf16.xpose.msra.mxu0 %v1053_v41  ;;  %2384 = vmatprep.mubr.msk.bf16.mxu0 %vm2570_vm1, %v2571_v17 }
 0x455   : > { %2388 = vmatprep.subr.bf16.mxu0 %v2571_v17 }
 0x45b   : > { %2385 = vmatmul.mubr.msk.bf16.vlgmr.msra.gmra.mrb[12].mxu0 %vm589_vm2, %v1046_v40 }
 0x45c   : > { %2389 = vmatpush3.bf16.xpose.msra.mxu0 %v1103_v43  ;;  %2390 = vmatprep.mubr.msk.bf16.mxu0 %vm2570_vm1, %v2571_v17 }
 0x45d   : > { %2411 = vmatprep.subr.mxu0 %v2571_v17 }
 0x467   : > { %2391 = vmatmul.mubr.msk.bf16.vlgmr.msra.gmra.mrb[12].mxu0 %vm589_vm2, %v1096_v44 }
 0x468   : > { %2412 = vmatpush3.xpose.msk.msra.mxu0 %vm589_vm2, %v1353_v46  ;;  %2413 = vmatprep.mubr.msk.f32.mxu0 %vm2570_vm1, %v2571_v17 }
 0x469   : > { %2428 = vmatprep.subr.mxu0 %v2571_v17 }
 0x46f   : > { %2414 = vmatmul.mubr.msk.f32.vlgmr.msra.gmra.mrb[16].mxu0 %vm589_vm2, %v1351_v47 }
 0x470   : > { %2430 = vmatprep.mubr.msk.f32.mxu0 %vm2570_vm1, %v2571_v17 }
 0x4eb   : > { %v857_v48 = vpop.f32.mrb[4].mxu1 }
 0x4ec   : > { %v961_v49 = vadd.f32 %v857_v48, %v2688_v38  ;;  %v2364_v51 = vpop.f32.mrb[5].mxu1 }
 0x4ee   : > { %962 = vst.msk [vmem:[%s2819_s12] sm:$0xff] %vm589_vm2, %v961_v49 }
 0x4ef   : > { %v907_v52 = vpop.f32.mrb[8].mxu1 }
 0x4f0   : > { %v2369_v53 = vpop.f32.mrb[9].mxu1 }
 0x4f1   : > { %v910_v55 = vpop.f32.mrb[10].mxu1 }
 0x4f2   : > { %v2370_v56 = vpop.f32.mrb[11].mxu1 }
 0x4f8   : > { %v1039_v57 = vpop.f32.mrb[6].mxu1 }
 0x4f9   : > { %v1043_v58 = vmul.f32 0.17677669, %v1039_v57  ;;  %v2381_v59 = vpop.f32.mrb[7].mxu1 }
 0x4fb   : > { %v1146_v60 = vsel %vm585_vm4, -1e+30, %v1043_v58 }
 0x4fc   : > { %v1147_v61 = vsel %vm589_vm2, %v1146_v60, -inf }
 0x4fd   : > { %1148 = vmax.xlane.f32.xlu1 %v1147_v61 }
 0x50e   : > { %1241 = vrot.lane.b32.xlu1 %v2742_v63, %s2579_s14 }
 0x512   : > { %1289 = vrot.lane.b32.xlu1 %v2746_v4, %s2579_s14 }
 0x516   : > { %1429 = vrot.lane.b32.xlu1 %v2757_v5, %s2577_s28 }
 0x51a   : > { %1479 = vrot.lane.b32.xlu1 %v2742_v63, %s2577_s28 }
 0x51e   : > { %1734 = vrot.lane.b32.xlu1 %v2710_v45, %s2580_s15 }
 0x526   : > { %v955_v62 = vpop.f32.mrb[8].mxu0 }
 0x527   : > { %v956_v0 = vadd.f32 %v955_v62, %v907_v52  ;;  %v2375_v1 = vpop.f32.mrb[9].mxu0 }
 0x528   : > { %v958_v3 = vpop.f32.mrb[10].mxu0 }
 0x529   : > { %v963_v6 = vadd.f32 %v956_v0, %v2721_v50  ;;  %v2376_v7 = vpop.f32.mrb[11].mxu0 }
 0x52b   : > { %964 = vst.msk [vmem:[%s2840_s18] sm:$0xff] %vm589_vm2, %v963_v6 }
 0x53a   : > { %v1139_v8 = vpop.f32.mrb[12].mxu0 }
 0x53b   : > { %v2392_v9 = vpop.f32.mrb[13].mxu0  ;;  %v1145_v35 = vmul.f32 0.03125, %v1139_v8 }
 0x53c   : > { %v1142_v10 = vpop.f32.mrb[14].mxu0 }
 0x53d   : > { %v2393_v11 = vpop.f32.mrb[15].mxu0 }
 0x542   : > { %v1424_v12 = vpop.f32.mrb[16].mxu0 }
 0x543   : > { %v2415_v13 = vpop.f32.mrb[17].mxu0  ;;  %v1428_v20 = vmul.f32 0.17677669, %v1424_v12 }
 0x545   : > { %v1530_v21 = vsel %vm585_vm4, -1e+30, %v1428_v20 }
 0x546   : > { %v1531_v22 = vsel %vm589_vm2, %v1530_v21, -inf }
 0x58a   : > { %v1149_v14 = vpop.xlane.xlu1 %1148 }
 0x58b   : > { %v1150_v15 = vsub.f32 %v1146_v60, %v1149_v14 }
 0x58d   : > { %v1151_v16 = vmul.f32 1.442695, %v1150_v15 }
 0x58e   : > { %v1242_v25 = vpop.permute.xlu1 %1241 }
 0x58f   : > { %2549 = vpow2.f32 %v1151_v16  ;;  %v1247_v28 = vsel %vm869_vm5, %v1242_v25, 0 }
 0x592   : > { %v1290_v31 = vpop.permute.xlu1 %1289 }
 0x593   : > { %v1295_v33 = vsel %vm869_vm5, %v1290_v31, 0 }
 0x596   : > { %v1430_v42 = vpop.permute.xlu1 %1429 }
 0x599   : > { %v2550_v18 = vpop.eup %2549 }
 0x59a   : > { %v1153_v19 = vsel %vm589_vm2, %v2550_v18, 0.0  ;;  %v1480_v44 = vpop.permute.xlu1 %1479 }
 0x59b   : > { %1154 = vadd.xlane.f32.xlu0 %v1153_v19 }
 0x59e   : > { %v1735_v47 = vpop.permute.xlu1 %1734 }
 0x5b1   : > { %1162 = vrot.lane.b32.xlu0 %v2710_v45, %s2579_s14 }
 0x5b5   : > { %1431 = vrot.lane.b32.xlu0 %v2742_v63, %s2578_s29 }
 0x5b9   : > { %1481 = vrot.lane.b32.xlu0 %v2746_v4, %s2578_s29 }
 0x5bd   : > { %1736 = vrot.lane.b32.xlu0 %v2710_v45, %s2581_s13 }
 0x5dc   : > { %1532 = vmax.xlane.f32.xlu0 %v1531_v22 }
 0x5f2   : > { %1546 = vrot.lane.b32.xlu0 %v2710_v45, %s2582_s19 }
 0x5f6   : > { %1673 = vrot.lane.b32.xlu0 %v2746_v4, %s2582_s19 }
 0x5fa   : > { %1813 = vrot.lane.b32.xlu0 %v2757_v5, %s2580_s15 }
 0x5fe   : > { %1863 = vrot.lane.b32.xlu0 %v2742_v63, %s2580_s15 }
 0x628   : > { %v1155_v23 = vpop.xlane.xlu0 %1154 }
 0x629   : > { %2551 = vrcp.f32 %v1155_v23 }
 0x62c   : > { %v1163_v24 = vpop.permute.xlu0 %1162 }
 0x62d   : > { %2395 = vmatpush3.msra.mxu1 %v1163_v24 }
 0x62e   : > { %2399 = vmatprep.subr.bf16.mxu1 %v2571_v17 }
 0x630   : > { %v1432_v37 = vpop.permute.xlu0 %1431 }
 0x631   : > { %v1437_v40 = vsel %vm589_vm2, %v1432_v37, 0 }
 0x633   : > { %v2552_v26 = vpop.eup %2551 }
 0x634   : > { %v1157_v27 = vmul.f32 %v2552_v26, %v2550_v18  ;;  %v1482_v41 = vpop.permute.xlu0 %1481 }
 0x635   : > { %v1487_v43 = vsel %vm589_vm2, %v1482_v41, 0 }
 0x636   : > { %2397 = vmatmul.mubr.msk.f32.vlgmr.msra.gmra.mrb[12].mxu1 %vm589_vm2, %v1157_v27  ;;  %v1239_v29 = vmul.f32 %v1157_v27, %v1157_v27  ;;  %v1158_v30 = vsub.f32 1.0, %v1157_v27 }
 0x637   : > { %2400 = vmatpush3.bf16.msra.mxu1 %v1247_v28  ;;  %2401 = vmatprep.mubr.msk.bf16.mxu1 %vm2570_vm1, %v2571_v17 }
 0x638   : > { %2405 = vmatprep.subr.bf16.mxu1 %v2571_v17  ;;  %v1240_v5 = vpack.c.bf16 %v1239_v29, %v1239_v29  ;;  %v1159_v32 = vmul.f32 %v1158_v30, %v1157_v27  ;;  %v1737_v46 = vpop.permute.xlu0 %1736 }
 0x63a   : > { %2402 = vmatmul.mubr.msk.bf16.vlgmr.msra.gmra.mrb[16].mxu1 %vm589_vm2, %v1240_v5  ;;  %v1160_v34 = vmul.f32 %v1159_v32, %v1159_v32 }
 0x63b   : > { %2406 = vmatpush3.bf16.msra.mxu1 %v1295_v33  ;;  %2407 = vmatprep.mubr.msk.bf16.mxu1 %vm2570_vm1, %v2571_v17 }
 0x63c   : > { %2416 = vmatprep.subr.bf16.mxu1 %v2571_v17  ;;  %v1161_v36 = vmul.f32 %v1160_v34, %v1145_v35 }
 0x63e   : > { %v1238_v39 = vpack.c.bf16 %v1161_v36, %v1161_v36 }
 0x646   : > { %2408 = vmatmul.mubr.msk.bf16.vlgmr.msra.gmra.mrb[16].mxu1 %vm589_vm2, %v1238_v39 }
 0x647   : > { %2417 = vmatpush3.bf16.xpose.msra.mxu1 %v1437_v40  ;;  %2418 = vmatprep.mubr.msk.bf16.mxu1 %vm2570_vm1, %v2571_v17 }
 0x648   : > { %2422 = vmatprep.subr.bf16.mxu1 %v2571_v17 }
 0x64e   : > { %2419 = vmatmul.mubr.msk.bf16.vlgmr.msra.gmra.mrb[20].mxu1 %vm589_vm2, %v1430_v42 }
 0x64f   : > { %2423 = vmatpush3.bf16.xpose.msra.mxu1 %v1487_v43  ;;  %2424 = vmatprep.mubr.msk.bf16.mxu1 %vm2570_vm1, %v2571_v17 }
 0x650   : > { %2445 = vmatprep.subr.mxu1 %v2571_v17 }
 0x65a   : > { %2425 = vmatmul.mubr.msk.bf16.vlgmr.msra.gmra.mrb[20].mxu1 %vm589_vm2, %v1480_v44 }
 0x65b   : > { %2446 = vmatpush3.xpose.msk.msra.mxu1 %vm589_vm2, %v1737_v46  ;;  %2447 = vmatprep.mubr.msk.f32.mxu1 %vm2570_vm1, %v2571_v17 }
 0x65c   : > { %2462 = vmatprep.subr.mxu1 %v2571_v17 }
 0x662   : > { %2448 = vmatmul.mubr.msk.f32.vlgmr.msra.gmra.mrb[14].mxu1 %vm589_vm2, %v1735_v47 }
 0x663   : > { %2464 = vmatprep.mubr.msk.f32.mxu1 %vm2570_vm1, %v2571_v17 }
 0x669   : > { %v1533_v48 = vpop.xlane.xlu0 %1532 }
 0x66a   : > { %v1534_v49 = vsub.f32 %v1530_v21, %v1533_v48 }
 0x66c   : > { %v1535_v51 = vmul.f32 1.442695, %v1534_v49 }
 0x66d   : > { %v1547_v52 = vpop.permute.xlu0 %1546 }
 0x66e   : > { %2553 = vpow2.f32 %v1535_v51  ;;  %2429 = vmatpush3.msra.mxu0 %v1547_v52 }
 0x66f   : > { %2433 = vmatprep.subr.bf16.mxu0 %v2571_v17 }
 0x671   : > { %v1674_v1 = vpop.permute.xlu0 %1673 }
 0x672   : > { %v1679_v6 = vsel %vm869_vm5, %v1674_v1, 0 }
 0x675   : > { %v1814_v30 = vpop.permute.xlu0 %1813 }
 0x678   : > { %v2554_v53 = vpop.eup %2553 }
 0x679   : > { %v1537_v55 = vsel %vm589_vm2, %v2554_v53, 0.0  ;;  %v1864_v5 = vpop.permute.xlu0 %1863 }
 0x67a   : > { %1538 = vadd.xlane.f32.xlu1 %v1537_v55 }
 0x68b   : > { %1625 = vrot.lane.b32.xlu1 %v2742_v63, %s2582_s19 }
 0x68f   : > { %1815 = vrot.lane.b32.xlu1 %v2742_v63, %s2581_s13 }
 0x693   : > { %1865 = vrot.lane.b32.xlu1 %v2746_v4, %s2581_s13 }
 0x707   : > { %v1539_v56 = vpop.xlane.xlu1 %1538 }
 0x708   : > { %2555 = vrcp.f32 %v1539_v56 }
 0x709   : > { %v2902_v57 = vpop.f32.mrb[12].mxu1 }
 0x70a   : > { %v2398_v58 = vpop.f32.mrb[13].mxu1 }
 0x70b   : > { %v1626_v60 = vpop.permute.xlu1 %1625 }
 0x70c   : > { %v1631_v62 = vsel %vm869_vm5, %v1626_v60, 0 }
 0x70f   : > { %v1816_v21 = vpop.permute.xlu1 %1815 }
 0x710   : > { %v1821_v23 = vsel %vm589_vm2, %v1816_v21, 0 }
 0x712   : > { %v2556_v59 = vpop.eup %2555 }
 0x713   : > { %v1541_v61 = vmul.f32 %v2556_v59, %v2554_v53  ;;  %v1866_v28 = vpop.permute.xlu1 %1865 }
 0x714   : > { %v1871_v31 = vsel %vm589_vm2, %v1866_v28, 0 }
 0x715   : > { %2431 = vmatmul.mubr.msk.f32.vlgmr.msra.gmra.mrb[18].mxu0 %vm589_vm2, %v1541_v61  ;;  %v1623_v0 = vmul.f32 %v1541_v61, %v1541_v61  ;;  %v1542_v11 = vsub.f32 1.0, %v1541_v61 }
 0x716   : > { %2434 = vmatpush3.bf16.msra.mxu0 %v1631_v62  ;;  %2435 = vmatprep.mubr.msk.bf16.mxu0 %vm2570_vm1, %v2571_v17 }
 0x717   : > { %2439 = vmatprep.subr.bf16.mxu0 %v2571_v17  ;;  %v1624_v3 = vpack.c.bf16 %v1623_v0, %v1623_v0  ;;  %v1543_v12 = vmul.f32 %v1542_v11, %v1541_v61 }
 0x719   : > { %v1331_v7 = vpop.f32.mrb[16].mxu1  ;;  %2436 = vmatmul.mubr.msk.bf16.vlgmr.msra.gmra.mrb[20].mxu0 %vm589_vm2, %v1624_v3  ;;  %v1544_v15 = vmul.f32 %v1543_v12, %v1543_v12 }
 0x71a   : > { %2440 = vmatpush3.bf16.msra.mxu0 %v1679_v6  ;;  %v2409_v8 = vpop.f32.mrb[17].mxu1  ;;  %2441 = vmatprep.mubr.msk.bf16.mxu0 %vm2570_vm1, %v2571_v17 }
 0x71b   : > { %v1334_v9 = vpop.f32.mrb[18].mxu1  ;;  %2450 = vmatprep.subr.bf16.mxu0 %v2571_v17 }
 0x71c   : > { %v2410_v10 = vpop.f32.mrb[19].mxu1 }
 0x72d   : > { %v1523_v13 = vpop.f32.mrb[20].mxu1 }
 0x72e   : > { %v1529_v14 = vmul.f32 0.03125, %v1523_v13  ;;  %v2426_v16 = vpop.f32.mrb[21].mxu1 }
 0x72f   : > { %v1526_v18 = vpop.f32.mrb[22].mxu1 }
 0x730   : > { %v1545_v19 = vmul.f32 %v1544_v15, %v1529_v14  ;;  %v2427_v20 = vpop.f32.mrb[23].mxu1 }
 0x732   : > { %v1622_v22 = vpack.c.bf16 %v1545_v19, %v1545_v19 }
 0x734   : > { %2442 = vmatmul.mubr.msk.bf16.vlgmr.msra.gmra.mrb[20].mxu0 %vm589_vm2, %v1622_v22 }
 0x735   : > { %2451 = vmatpush3.bf16.xpose.msra.mxu0 %v1821_v23  ;;  %v1808_v24 = vpop.f32.mrb[14].mxu1  ;;  %2452 = vmatprep.mubr.msk.bf16.mxu0 %vm2570_vm1, %v2571_v17 }
 0x736   : > { %v1812_v25 = vmul.f32 0.17677669, %v1808_v24  ;;  %v2449_v26 = vpop.f32.mrb[15].mxu1  ;;  %2456 = vmatprep.subr.bf16.mxu0 %v2571_v17 }
 0x738   : > { %v1914_v27 = vsel %vm585_vm4, -1e+30, %v1812_v25 }
 0x739   : > { %v1915_v29 = vsel %vm589_vm2, %v1914_v27, -inf }
 0x73a   : > { %1916 = vmax.xlane.f32.xlu1 %v1915_v29 }
 0x73c   : > { %2453 = vmatmul.mubr.msk.bf16.vlgmr.msra.gmra.mrb[24].mxu0 %vm589_vm2, %v1814_v30 }
 0x73d   : > { %2457 = vmatpush3.bf16.xpose.msra.mxu0 %v1871_v31  ;;  %2458 = vmatprep.mubr.msk.bf16.mxu0 %vm2570_vm1, %v2571_v17 }
 0x748   : > { %2459 = vmatmul.mubr.msk.bf16.vlgmr.msra.gmra.mrb[24].mxu0 %vm589_vm2, %v1864_v5 }
 0x74b   : > { %2009 = vrot.lane.b32.xlu1 %v2742_v63, %s2583_s20 }
 0x74f   : > { %2057 = vrot.lane.b32.xlu1 %v2746_v4, %s2583_s20 }
 0x753   : > { %1345 = vrot.lane.b32.xlu1 %v1331_v7, %s2584_s21 }
 0x7c7   : > { %v1917_v2 = vpop.xlane.xlu1 %1916 }
 0x7c8   : > { %v1918_v54 = vsub.f32 %v1914_v27, %v1917_v2 }
 0x7ca   : > { %v1919_v32 = vmul.f32 1.442695, %v1918_v54 }
 0x7cb   : > { %v2010_v33 = vpop.permute.xlu1 %2009 }
 0x7cc   : > { %2557 = vpow2.f32 %v1919_v32  ;;  %v2015_v58 = vsel %vm869_vm5, %v2010_v33, 0 }
 0x7cf   : > { %v2058_v34 = vpop.permute.xlu1 %2057 }
 0x7d0   : > { %v2063_v0 = vsel %vm869_vm5, %v2058_v34, 0 }
 0x7d3   : > { %v1346_v35 = vpop.permute.xlu1 %1345 }
 0x7d4   : > { %v1348_v36 = vadd.f32 %v1346_v35, %v2721_v50 }
 0x7d6   : > { %v2558_v37 = vpop.eup %2557  ;;  %1349 = vst.msk [vmem:[%s2840_s18] sm:$0xff] %vm1342_vm6, %v1348_v36 }
 0x7d7   : > { %v1921_v39 = vsel %vm589_vm2, %v2558_v37, 0.0 }
 0x7d8   : > { %1922 = vadd.xlane.f32.xlu0 %v1921_v39 }
 0x7e8   : > { %v1618_v63 = vpop.f32.mrb[18].mxu0 }
 0x7e9   : > { %v2432_v4 = vpop.f32.mrb[19].mxu0 }
 0x7ee   : > { %1930 = vrot.lane.b32.xlu0 %v2710_v45, %s2583_s20 }
 0x7f2   : > { %1338 = vrot.lane.b32.xlu0 %v2902_v57, %s2584_s21 }
 0x7f6   : > { %1722 = vrot.lane.b32.xlu0 %v1618_v63, %s2585_s22 }
 0x807   : > { %v1715_v40 = vpop.f32.mrb[20].mxu0 }
 0x808   : > { %1729 = vrot.lane.b32.xlu1 %v1715_v40, %s2585_s22  ;;  %v2443_v41 = vpop.f32.mrb[21].mxu0 }
 0x809   : > { %v1718_v42 = vpop.f32.mrb[22].mxu0 }
 0x80a   : > { %v2444_v43 = vpop.f32.mrb[23].mxu0 }
 0x81b   : > { %v1907_v44 = vpop.f32.mrb[24].mxu0 }
 0x81c   : > { %v2460_v46 = vpop.f32.mrb[25].mxu0  ;;  %v1913_v6 = vmul.f32 0.03125, %v1907_v44 }
 0x81d   : > { %v1910_v47 = vpop.f32.mrb[26].mxu0 }
 0x81e   : > { %v2461_v48 = vpop.f32.mrb[27].mxu0 }
 0x865   : > { %v1923_v49 = vpop.xlane.xlu0 %1922 }
 0x866   : > { %2559 = vrcp.f32 %v1923_v49 }
 0x869   : > { %v1931_v51 = vpop.permute.xlu0 %1930 }
 0x86a   : > { %2463 = vmatpush3.msra.mxu1 %v1931_v51 }
 0x86b   : > { %2467 = vmatprep.subr.bf16.mxu1 %v2571_v17 }
 0x86d   : > { %v1339_v45 = vpop.permute.xlu0 %1338 }
 0x86e   : > { %v1341_v52 = vadd.f32 %v1339_v45, %v2688_v38 }
 0x870   : > { %v2560_v53 = vpop.eup %2559  ;;  %1343 = vst.msk [vmem:[%s2819_s12] sm:$0xff] %vm1342_vm6, %v1341_v52 }
 0x871   : > { %v1925_v55 = vmul.f32 %v2560_v53, %v2558_v37  ;;  %v1723_v56 = vpop.permute.xlu0 %1722 }
 0x872   : > { %v1725_v57 = vadd.f32 %v1723_v56, %v2688_v38 }
 0x873   : > { %2465 = vmatmul.mubr.msk.f32.vlgmr.msra.gmra.mrb[24].mxu1 %vm589_vm2, %v1925_v55  ;;  %v2007_v59 = vmul.f32 %v1925_v55, %v1925_v55  ;;  %v1926_v60 = vsub.f32 1.0, %v1925_v55 }
 0x874   : > { %1727 = vst.msk [vmem:[%s2819_s12] sm:$0xff] %vm1726_vm7, %v1725_v57  ;;  %2468 = vmatpush3.bf16.msra.mxu1 %v2015_v58  ;;  %2469 = vmatprep.mubr.msk.bf16.mxu1 %vm2570_vm1, %v2571_v17 }
 0x875   : > { %2473 = vmatprep.subr.bf16.mxu1 %v2571_v17  ;;  %v2008_v61 = vpack.c.bf16 %v2007_v59, %v2007_v59  ;;  %v1927_v62 = vmul.f32 %v1926_v60, %v1925_v55 }
 0x877   : > { %2470 = vmatmul.mubr.msk.bf16.vlgmr.msra.gmra.mrb[28].mxu1 %vm589_vm2, %v2008_v61  ;;  %v1928_v1 = vmul.f32 %v1927_v62, %v1927_v62 }
 0x878   : > { %2474 = vmatpush3.bf16.msra.mxu1 %v2063_v0  ;;  %2475 = vmatprep.mubr.msk.bf16.mxu1 %vm2570_vm1, %v2571_v17 }
 0x879   : > { %v1929_v8 = vmul.f32 %v1928_v1, %v1913_v6 }
 0x87a   : > { %v1730_v3 = vpop.permute.xlu1 %1729 }
 0x87b   : > { %v1732_v7 = vadd.f32 %v1730_v3, %v2721_v50  ;;  %v2006_v9 = vpack.c.bf16 %v1929_v8, %v1929_v8 }
 0x87d   : > { %1733 = vst.msk [vmem:[%s2840_s18] sm:$0xff] %vm1726_vm7, %v1732_v7 }
 0x883   : > { %2476 = vmatmul.mubr.msk.bf16.vlgmr.msra.gmra.mrb[28].mxu1 %vm589_vm2, %v2006_v9 }
 0x946   : > { %v2002_v10 = vpop.f32.mrb[24].mxu1 }
 0x947   : > { %v2466_v11 = vpop.f32.mrb[25].mxu1  ;;  %2106 = vrot.lane.b32.xlu0 %v2002_v10, %s2586_s23 }
 0x956   : > { %v2099_v12 = vpop.f32.mrb[28].mxu1 }
 0x957   : > { %2113 = vrot.lane.b32.xlu1 %v2099_v12, %s2586_s23  ;;  %v2477_v17 = vpop.f32.mrb[29].mxu1 }
 0x958   : > { %v2102_v13 = vpop.f32.mrb[30].mxu1 }
 0x959   : > { %v2478_v14 = vpop.f32.mrb[31].mxu1 }
 0x9b9   : > { %v2107_v15 = vpop.permute.xlu0 %2106 }
 0x9ba   : > { %v2109_v16 = vadd.f32 %v2107_v15, %v2688_v38 }
 0x9bc   : > { %2111 = vst.msk [vmem:[%s2819_s12] sm:$0xff] %vm2110_vm8, %v2109_v16 }
 0x9c9   : > { %v2114_v18 = vpop.permute.xlu1 %2113 }
 0x9ca   : > { %v2116_v19 = vadd.f32 %v2114_v18, %v2721_v50 }
 0x9cc   : > { %2117 = vst.msk [vmem:[%s2840_s18] sm:$0xff] %vm2110_vm8, %v2116_v19 }
 0x9cd PF: > { %s20_s30 = sadd.s32 1, %s2567_s30  }
 0x9ce   : > { %p17_p4 = scmp.ge.s32.totalorder %s20_s30, 4  }
 0x9d0   :  { %19 = sbr.rel (!%p17_p4) target bundleno = 1 (0x1), region = 97 }

// kernel: decoder_vmp_forward.11
= control target key start
LH: loop header
LB: loop body
LE: loop exit
PB: predicated region body
PF: predicated region fallthrough
CT: control target
= control target key end

     0   :  { %17 = vsyncpa [#allocation3], 0  ;;  %vm48_vm0 = vcmask 261120   ;;  %s714_s0 = inlined_call_operand.vmem [shape: f32[16,32], index: 0, kind: input, shape index: {}]   ;;  %s715_s1 = inlined_call_operand.vmem [shape: f32[16,32], index: 1, kind: input, shape index: {}]   ;;  %s716_s2 = inlined_call_operand.vmem [shape: f32[1,32], index: 2, kind: input, shape index: {}]   ;;  %s717_s3 = inlined_call_operand.vmem [shape: f32[1,32], index: 3, kind: input, shape index: {}]   ;;  %s718_s4 = inlined_call_operand.vmem [shape: f32[1,32], index: 4, kind: input, shape index: {}]   ;;  %s719_s5 = inlined_call_operand.vmem [shape: f32[1,32], index: 5, kind: input, shape index: {}]   ;;  %s720_s6 = inlined_call_operand.vmem [shape: f32[32,32], index: 6, kind: input, shape index: {}]   ;;  %s721_s7 = inlined_call_operand.vmem [shape: bf16[64,32], index: 7, kind: input, shape index: {}]   ;;  %s722_s8 = inlined_call_operand.vmem [shape: f32[1,32], index: 8, kind: input, shape index: {}]   ;;  %s723_s9 = inlined_call_operand.vmem [shape: f32[1,32], index: 9, kind: input, shape index: {}]   ;;  %s724_s10 = inlined_call_operand.hbm [shape: f32[16,32], index: 10, kind: output, shape index: {0}]   ;;  %s725_s11 = inlined_call_operand.hbm [shape: f32[16,32], index: 11, kind: output, shape index: {1}]  }
   0x1   :  { %v594_v0 = vld [vmem:[%s714_s0] sm:$0xff]  ;;  %v599_v1 = vld [vmem:[%s714_s0 + $0x8] sm:$0xff] }
   0x2   :  { %v49_v2 = vsel %vm48_vm0, %v594_v0, 0.0  ;;  %v58_v3 = vmul.f32 %v594_v0, %v594_v0  ;;  %v59_v4 = vmul.f32 %v599_v1, %v599_v1  ;;  %v52_v6 = vsel %vm48_vm0, %v599_v1, 0.0 }
   0x3   :  { %50 = vadd.xlane.f32.xlu0 %v49_v2 }
   0x4   :  { %v60_v5 = vsel %vm48_vm0, %v58_v3, 0.0 }
   0x5   :  { %61 = vadd.xlane.f32.xlu1 %v60_v5 }
   0x6   :  { %18 = vsyncpa [#allocation5], 0  ;;  %v63_v7 = vsel %vm48_vm0, %v59_v4, 0.0  ;;  %v83_v8 = vlaneseq  ;;  %v44_v10 = vld [vmem:[%s716_s2] sm:$0x1]  ;;  %v132_v15 = vld [vmem:[%s720_s6 + $0x8] sm:$0xff] }
   0x7   :  { %53 = vadd.xlane.f32.xlu0 %v52_v6  ;;  %v98_v12 = vmul.f32 %v44_v10, %v44_v10  ;;  %v131_v14 = vld [vmem:[%s720_s6] sm:$0xff]  ;;  %v133_v17 = vld [vmem:[%s720_s6 + $0x10] sm:$0xff]  ;;  %v134_v18 = vld [vmem:[%s720_s6 + $0x18] sm:$0xff]  ;;  %v524_v21 = vmov 0.0   ;;  %vm525_vm1 = vmmov 0   ;;  %vm275_vm2 = vcmask 523264  }
   0x8   :  { %v84_v9 = vshrl.u32 %v83_v8, 7  ;;  %v440_v16 = vpack.c.bf16 %v132_v15, %v131_v14  ;;  %v444_v19 = vpack.c.bf16 %v134_v18, %v133_v17  ;;  %v460_v20 = vld [vmem:[%s721_s7] sm:$0xff]   ;;  %428 = vmatprep.subr.bf16.mxu1 %v524_v21  ;;  %v461_v22 = vld [vmem:[%s721_s7 + $0x8] sm:$0xff]   ;;  %v462_v23 = vld [vmem:[%s721_s7 + $0x10] sm:$0xff]   ;;  %436 = vmatprep.mubr.msk.bf16.mxu1 %vm525_vm1, %v524_v21 }
   0x9   :  { %64 = vadd.xlane.f32.xlu1 %v63_v7  ;;  %429 = vmatpush3.bf16.msra.mxu1 %v460_v20  ;;  %v42_v40 = vld [vmem:[%s715_s1] sm:$0xff]  ;;  %v43_v42 = vld [vmem:[%s715_s1 + $0x8] sm:$0xff]  ;;  %v463_v55 = vld [vmem:[%s721_s7 + $0x18] sm:$0xff]  }
   0xa   :  { %v85_v11 = vsub.s32 0, %v84_v9  ;;  %441 = vmatprep.subr.bf16.mxu0 %v440_v16  ;;  %430 = vmatprep.subr.bf16.mxu1 %v524_v21  ;;  %v391_v48 = vld [vmem:[%s717_s3] ss:$0 sm:$0xff]  ;;  %s526_s3 = smov 32  }
   0xb   :  { %443 = vmatpush3.bf16.msra.mxu0 %v440_v16  ;;  %v390_v49 = vld [vmem:[%s718_s4] ss:$0 sm:$0xff] }
   0xc   :  { %v103_v13 = vrot.slane %v98_v12, %v85_v11  ;;  %445 = vmatprep.subr.bf16.mxu0 %v444_v19  ;;  %v86_v43 = vrot.slane %v44_v10, %v85_v11  ;;  %v392_v7 = vld [vmem:[%s719_s5] ss:$0 sm:$0xff]  ;;  %s527_s5 = smov [#allocation2]  }
   0xd   :  { %431 = vmatpush3.bf16.msra.mxu1 %v461_v22  ;;  %v393_v16 = vld [vmem:[%s722_s8] ss:$0 sm:$0xff]  ;;  %s363_s8 = sshll.u32 %s527_s5, 4  ;;  %s364_s8 = int_to_ptr.vmem [resolvable:$true] %s363_s8 }
   0xe   :  { %432 = vmatprep.subr.bf16.mxu1 %v524_v21  ;;  %v105_v44 = vmul.f32 %v103_v13, %v42_v40  ;;  %v106_v50 = vmul.f32 %v103_v13, %v43_v42  ;;  %s476_s25 = scalar_lea.vmem %s364_s8, 256  ;;  %p481_p1 = scmp.lt.s32.totalorder %s364_s8, %s364_s8 }
   0xf   :  { %447 = vmatpush3.bf16.msra.mxu0 %v444_v19  ;;  %p477_p0 = scmp.ne.s32.totalorder %s364_s8, %s476_s25  ;;  %p482_p2 = scmp.lt.s32.totalorder %s476_s25, %s476_s25 }
  0x11   :  { %433 = vmatpush3.bf16.msra.mxu1 %v462_v23  ;;  %p483_p3 = por %p482_p2, %p481_p1 }
  0x12   :  { %434 = vmatprep.subr.bf16.mxu1 %v524_v21 }
  0x13   :  { %p484_p4 = pnand %p483_p3, %p477_p0 }
  0x15   :  { %435 = vmatpush3.bf16.msra.mxu1 %v463_v55 }
  0x90   :  { %v51_v24 = vpop.xlane.xlu0 %50 }
  0x91   :  { %v56_v25 = vmul.f32 0.03125, %v51_v24 }
  0x92   :  { %v62_v26 = vpop.xlane.xlu1 %61 }
  0x93   :  { %v68_v27 = vmul.f32 %v56_v25, %v56_v25  ;;  %v66_v28 = vmul.f32 0.03125, %v62_v26  ;;  %v78_v41 = vsub.f32 %v594_v0, %v56_v25 }
  0x94   :  { %v54_v29 = vpop.xlane.xlu0 %53 }
  0x95   :  { %v70_v30 = vsub.f32 %v66_v28, %v68_v27  ;;  %v57_v31 = vmul.f32 0.03125, %v54_v29 }
  0x96   :  { %v65_v32 = vpop.xlane.xlu1 %64 }
  0x97   :  { %v72_v33 = vmax.f32 %v70_v30, 0.0  ;;  %v69_v34 = vmul.f32 %v57_v31, %v57_v31  ;;  %v67_v35 = vmul.f32 0.03125, %v65_v32  ;;  %v79_v51 = vsub.f32 %v599_v1, %v57_v31 }
  0x99   :  { %v74_v36 = vadd.f32 1e-05, %v72_v33  ;;  %v71_v37 = vsub.f32 %v67_v35, %v69_v34 }
  0x9b   :  { %464 = vrsqrt.f32 %v74_v36  ;;  %v73_v38 = vmax.f32 %v71_v37, 0.0 }
  0x9d   :  { %v75_v39 = vadd.f32 1e-05, %v73_v38 }
  0x9f   :  { %466 = vrsqrt.f32 %v75_v39 }
  0xa5   :  { %v465_v45 = vpop.eup %464 }
  0xa6   :  { %v107_v46 = vmul.f32 %v465_v45, %v465_v45  ;;  %v80_v47 = vmul.f32 %v465_v45, %v78_v41 }
  0xa8   :  { %v88_v52 = vmul.f32 %v86_v43, %v80_v47  ;;  %v111_v53 = vmul.f32 %v80_v47, %v80_v47  ;;  %v109_v54 = vmul.f32 %v107_v46, %v105_v44 }
  0xa9   :  { %v467_v56 = vpop.eup %466 }
  0xaa   :  { %v108_v57 = vmul.f32 %v467_v56, %v467_v56  ;;  %v81_v58 = vmul.f32 %v467_v56, %v79_v51  ;;  %v96_v59 = vadd.f32 %v390_v49, %v88_v52  ;;  %v119_v60 = vmul.f32 %v391_v48, %v111_v53 }
  0xac   :  { %v89_v61 = vmul.f32 %v86_v43, %v81_v58  ;;  %v112_v62 = vmul.f32 %v81_v58, %v81_v58  ;;  %425 = vmatprep.mubr.msk.f32.mxu0 %vm48_vm0, %v96_v59  ;;  %v110_v63 = vmul.f32 %v108_v57, %v106_v50  ;;  %v121_v0 = vadd.f32 %v119_v60, %v109_v54 }
  0xad   :  { %v143_v3 = vmul.f32 %v96_v59, %v96_v59 }
  0xae   :  { %v97_v1 = vadd.f32 %v390_v49, %v89_v61  ;;  %v120_v2 = vmul.f32 %v391_v48, %v112_v62  ;;  %v662_v9 = vadd.f32 %v392_v7, %v121_v0 }
  0xb0   :  { %426 = vmatmul.mubr.msk.f32.vlgmr.msra.gmra.mrb[0].mxu0 %vm48_vm0, %v97_v1  ;;  %v144_v4 = vmul.f32 %v97_v1, %v97_v1  ;;  %v122_v5 = vadd.f32 %v120_v2, %v110_v63 }
  0xb2   :  { %v455_v6 = vpack.i.bf16 %v144_v4, %v143_v3  ;;  %v664_v10 = vadd.f32 %v392_v7, %v122_v5 }
  0xb4   :  { %456 = vrot.lane.b32.xlu0 %v455_v6, %s526_s3 }
 0x126   :  { %v457_v8 = vpop.permute.xlu0 %456 }
 0x127   :  { %v459_v11 = vunpack.i.h.bf16 %v457_v8  ;;  %v458_v12 = vunpack.i.l.bf16 %v457_v8 }
 0x129   :  { %v154_v13 = vsel %vm48_vm0, %v664_v10, %v459_v11  ;;  %v153_v14 = vsel %vm48_vm0, %v662_v9, %v458_v12 }
 0x12a   :  { %v155_v15 = vpack.c.bf16 %v154_v13, %v153_v14 }
 0x12c   :  { %437 = vmatmul.mubr.msk.bf16.vlgmr.msra.gmra.mrb[0].mxu1 %vm275_vm2, %v155_v15 }
 0x183   :  { %v427_v17 = vpop.f32.mrb[0].mxu0 }
 0x184   :  { %v241_v18 = vadd.f32 %v427_v17, %v393_v16  ;;  %v235_v19 = vpop.f32.mrb[1].mxu0 }
 0x185   :  { %v236_v20 = vadd.f32 %v393_v16, %v235_v19 }
 0x186   :  { %vm321_vm3 = vcmp.gt.f32.partialorder %v241_v18, 0.0 }
 0x187   :  { %v403_v22 = vsel %vm321_vm3, 1.0, %v524_v21  ;;  %vm320_vm4 = vcmp.gt.f32.partialorder %v236_v20, 0.0 }
 0x188   :  { %v327_v23 = vmul.f32 %v403_v22, %v241_v18  ;;  %v402_v24 = vsel %vm320_vm4, 1.0, %v524_v21 }
 0x189   :  { %v326_v25 = vmul.f32 %v402_v24, %v236_v20 }
 0x18a   :  { %v331_v26 = vadd.f32 %v327_v23, %v97_v1 }
 0x18b   :  { %v330_v27 = vadd.f32 %v326_v25, %v96_v59 }
 0x18c   :  { %v405_v28 = vmul.f32 -1.442695, %v331_v26 }
 0x18d   :  { %v404_v29 = vmul.f32 -1.442695, %v330_v27 }
 0x18e   :  { %468 = vpow2.f32 %v405_v28 }
 0x18f   :  { %470 = vpow2.f32 %v404_v29 }
 0x198   :  { %v469_v30 = vpop.eup %468 }
 0x199   :  { %v471_v31 = vpop.eup %470  ;;  %v341_v32 = vadd.f32 1.0, %v469_v30 }
 0x19a   :  { %v340_v33 = vadd.f32 1.0, %v471_v31 }
 0x19b   :  { %472 = vrcp.f32 %v341_v32 }
 0x19c   :  { %474 = vrcp.f32 %v340_v33 }
 0x1a5   :  { %v473_v34 = vpop.eup %472 }
 0x1a6   :  { %v475_v35 = vpop.eup %474  ;;  %355 = vst.msk [vmem:[#allocation2 + $0x8] sm:$0xff] %vm48_vm0, %v473_v34 }
 0x1a7   :  { %354 = vst.msk [vmem:[#allocation2] sm:$0xff] %vm48_vm0, %v475_v35 }
 0x1a8   :  { %487 = shalt.err (!%p484_p4)
}
 0x1a9   :  { %s488_s28 = scalar_lea.hbm %s724_s10, 256 }
 0x1aa   :  { %p489_p5 = scmp.ne.s32.totalorder %s724_s10, %s488_s28  ;;  %p492_p6 = scmp.lt.u32.totalorder %s488_s28, %s724_s10 }
 0x1ac   :  { %p494_p7 = pnand %p492_p6, %p489_p5 }
 0x1ae   :  { %497 = shalt.err (!%p494_p7)
}
 0x1af   :  { %s528_s13 = smov 128   ;;  %s529_s14 = smov 8   ;;  %v346_v21 = vsub.f32 1.0, %v475_v35  ;;  %v396_v36 = vld [vmem:[%s723_s9] ss:$0 sm:$0xff]  ;;  %v347_v37 = vsub.f32 1.0, %v473_v34 }
 0x1b0   :  { %369 = dma.vmem_to_hbm [thread:$0]  %s364_s8, 256, %s724_s10, [#allocation3], %s528_s13, %s528_s13, %s529_s14  }
 0x1b1   :  { %v348_v40 = vmul.f32 %v475_v35, %v346_v21  ;;  %v349_v45 = vmul.f32 %v473_v34, %v347_v37  ;;  %s530_s10 = smov [#allocation4]  }
 0x1b2   :  { %s375_s18 = sshll.u32 %s530_s10, 4  ;;  %s376_s18 = int_to_ptr.vmem [resolvable:$true] %s375_s18 }
 0x1b3   :  { %v350_v48 = vmul.f32 %v348_v40, %v348_v40  ;;  %v351_v52 = vmul.f32 %v349_v45, %v349_v45  ;;  %s498_s9 = scalar_lea.vmem %s376_s18, 256  ;;  %p503_p9 = scmp.lt.s32.totalorder %s376_s18, %s376_s18 }
 0x1b4   :  { %p499_p8 = scmp.ne.s32.totalorder %s376_s18, %s498_s9  ;;  %p504_p10 = scmp.lt.s32.totalorder %s498_s9, %s498_s9 }
 0x1b6   :  { %p505_p11 = por %p504_p10, %p503_p9 }
 0x1b8   :  { %p506_p12 = pnand %p505_p11, %p499_p8 }
 0x1ff   :  { %v313_v38 = vpop.f32.mrb[0].mxu1 }
 0x200   :  { %v314_v39 = vadd.f32 %v396_v36, %v313_v38  ;;  %v438_v41 = vpop.f32.mrb[1].mxu1 }
 0x201   :  { %v316_v42 = vpop.f32.mrb[2].mxu1 }
 0x202   :  { %v328_v43 = vmul.f32 %v402_v24, %v314_v39  ;;  %v317_v44 = vadd.f32 %v396_v36, %v316_v42  ;;  %v439_v46 = vpop.f32.mrb[3].mxu1 }
 0x204   :  { %v332_v47 = vadd.f32 %v328_v43, %v662_v9  ;;  %v329_v49 = vmul.f32 %v403_v22, %v317_v44 }
 0x206   :  { %v352_v50 = vmul.f32 %v350_v48, %v332_v47  ;;  %v333_v51 = vadd.f32 %v329_v49, %v664_v10 }
 0x208   :  { %356 = vst.msk [vmem:[#allocation4] sm:$0xff] %vm48_vm0, %v352_v50  ;;  %v353_v53 = vmul.f32 %v351_v52, %v333_v51 }
 0x20a   :  { %357 = vst.msk [vmem:[#allocation4 + $0x8] sm:$0xff] %vm48_vm0, %v353_v53 }
 0x20b   :  { %509 = shalt.err (!%p506_p12)
}
 0x20c   :  { %s510_s0 = scalar_lea.hbm %s725_s11, 256 }
 0x20d   :  { %p511_p13 = scmp.ne.s32.totalorder %s725_s11, %s510_s0  ;;  %p514_p0 = scmp.lt.u32.totalorder %s510_s0, %s725_s11 }
 0x20f   :  { %p516_p1 = pnand %p514_p0, %p511_p13 }
 0x211   :  { %519 = shalt.err (!%p516_p1)
}
 0x212   :  { %381 = dma.vmem_to_hbm [thread:$0]  %s376_s18, 256, %s725_s11, [#allocation5], %s528_s13, %s528_s13, %s529_s14  }
 0x213   :  { %520 = dma.done.wait [#allocation3], 256  }
 0x214   :  { %521 = vsyncadd [#allocation3], 4294967040 }
 0x215   :  { %522 = dma.done.wait [#allocation5], 256  }
 0x216   :  { %523 = vsyncadd [#allocation5], 4294967040 }
 0x217   :  { %388 = vsyncpa [#allocation3], 1 }
 0x218   :  { %389 = vsyncpa [#allocation5], 1 }

</bundles_post_ra>
